<compile_context>
chip_gen: v7x
topology: tpu7x:2x2x1
jax: 0.10.0
libtpu: 0.0.40
codegen_flags: <defaults>
</compile_context>

<pallas_src>
import functools

import numpy as np

import jax
import jax.numpy as jnp
from jax.experimental import pallas as pl
from jax.experimental.pallas import tpu as pltpu


# --------------------------------------------------------------------------------------
# Fused kernel: conv stack -> fc -> LayerNorm -> tanh -> all Q heads.
# One grid step == TB batch elements (grid axis is 'parallel').
# --------------------------------------------------------------------------------------
def _fused_kernel(*refs, plan, n_mats, eps):
    n_layers = len(plan)
    idx = 0
    x_ref = refs[idx]; idx += 1
    conv_w = refs[idx:idx + n_mats]; idx += n_mats
    conv_b = refs[idx:idx + n_layers]; idx += n_layers
    fcw, fcb, lng, lnb = refs[idx:idx + 4]; idx += 4
    a_ref = refs[idx]; idx += 1
    qw1f, qw1a, qb1, qw2, qb2, qw3, qb3 = refs[idx:idx + 7]; idx += 7
    o_ref = refs[idx]; idx += 1
    scratches = refs[idx:idx + n_layers]

    def mm(a, w):
        # f32 accumulation on the MXU; only the (small) activation operand is cast
        # when the packed weights are bf16.
        return jnp.dot(a.astype(w.dtype), w, preferred_element_type=jnp.float32)

    # ---- conv stack: each layer is (h_out x n_width_tiles x KH) row-tap matmuls
    #      with M = TB.  Activations live in 2-D (TB, rows*width*C) scratch, so all
    #      slices are static lane offsets and stay lane-contiguous for the fc. ----
    src = x_ref
    mat_i = 0
    for li, lp in enumerate(plan):
        dst = scratches[li]
        kh, kw, cin, cout = lp["KH"], lp["KW"], lp["cin"], lp["cout"]
        in_rs = lp["w_in"] * cin
        out_rs = lp["ow"] * cout
        tile_mats = conv_w[mat_i:mat_i + len(lp["tiles"])]
        mat_i += len(lp["tiles"])
        b_ref = conv_b[li]
        for r in range(lp["h_out"]):
            for (q0, tw), w_ref in zip(lp["tiles"], tile_mats):
                k_len = (tw + kw - 1) * cin
                c0 = r * in_rs + q0 * cin
                acc = mm(src[:, c0:c0 + k_len], w_ref[0])
                for i in range(1, kh):
                    ci = (r + i) * in_rs + q0 * cin
                    acc = acc + mm(src[:, ci:ci + k_len], w_ref[i])
                bias = b_ref[:, q0 * cout:(q0 + tw) * cout]
                o0 = r * out_rs + q0 * cout
                dst[:, o0:o0 + tw * cout] = jnp.maximum(acc + bias, 0.0)
        src = dst

    # ---- encoder fc (+bias), LayerNorm, tanh: a single [TB, conv_flat] matmul.
    #      fc rows were permuted at pack time to fold PyTorch's CHW flatten order.
    y = mm(src[...], fcw[...]) + fcb[...]
    mu = jnp.mean(y, axis=-1, keepdims=True)
    var = jnp.mean(jnp.square(y - mu), axis=-1, keepdims=True)
    feat = jnp.tanh((y - mu) * jax.lax.rsqrt(var + eps) * lng[...] + lnb[...])

    # ---- all Q heads fused: cat([feat, act]) @ W1 == feat @ W1f + act @ W1a;
    #      W2 block-diagonal, W3 block-column -> one chain gives [TB, num_critics].
    act = a_ref[...]
    h1 = jnp.maximum(mm(feat, qw1f[...]) + mm(act, qw1a[...]) + qb1[...], 0.0)
    h2 = jnp.maximum(mm(h1, qw2[...]) + qb2[...], 0.0)
    o_ref[...] = (mm(h2, qw3[...]) + qb3[...]).astype(o_ref.dtype)


# --------------------------------------------------------------------------------------
# Forward wrapper
# --------------------------------------------------------------------------------------
def _round_up(x, m):
    return (x + m - 1) // m * m


def sac_ae_critic_forward(params, obs_nchw, action, detach_encoder_features=False,
                          batch_block=128):
    # TODO(synk): detach_encoder_features only changes autograd behavior
    #             (stop-gradient); it is a no-op in this forward-only kernel.
    del detach_encoder_features

    plan = params["plan"]
    B, C, H, W = obs_nchw.shape
    assert H == W and H % 2 == 0, "SAC-AE pixel encoder expects even square frames"
    h2, w2 = H // 2, W // 2
    assert (plan[0]["h_in"] == h2 and plan[0]["w_in"] == w2
            and plan[0]["cin"] == 4 * C), "params packed for a different frame geometry"

    num_critics = params["qw3"].shape[1]
    action_dim = action.shape[-1]

    # ---- batch blocking: TB elements per grid step; even grid length when > 1 ----
    TB = int(min(batch_block, _round_up(B, 8)))
    n_blocks = -(-B // TB)
    if n_blocks > 1 and n_blocks % 2 == 1:
        n_blocks += 1
    Bp = n_blocks * TB

    # Space-to-depth (factor 2) + NCHW->NHWC + row flatten: one small XLA copy.
    # Lane index within an image = r*(W/2*4C) + w'*4C + ri*2C + rj*C + c.
    x = obs_nchw.reshape(B, C, h2, 2, w2, 2)
    x = jnp.transpose(x, (0, 2, 4, 3, 5, 1)).reshape(B, h2 * w2 * 4 * C)
    x = x.astype(jnp.float32)
    act2d = action.reshape(B, action_dim).astype(jnp.float32)
    if Bp != B:
        x = jnp.pad(x, ((0, Bp - B), (0, 0)))
        act2d = jnp.pad(act2d, ((0, Bp - B), (0, 0)))

    conv_mats = list(params["conv_mats"])
    conv_biases = list(params["conv_biases"])
    enc_ws = [params["fc_w"], params["fc_b"], params["ln_g"], params["ln_b"]]
    q_ws = [params["qw1f"], params["qw1a"], params["qb1"], params["qw2"],
            params["qb2"], params["qw3"], params["qb3"]]
    resident = conv_mats + conv_biases + enc_ws + q_ws

    single_buf = pl.Buffered(1)

    def w_spec(a):
        # Full-array block + constant index map -> DMA'd once, resident across grid
        # steps; Buffered(1) avoids a pointless second (double-buffer) copy in VMEM.
        return pl.BlockSpec(a.shape, lambda b, _n=a.ndim: (0,) * _n,
                            pipeline_mode=single_buf)

    in_specs = ([pl.BlockSpec((TB, x.shape[1]), lambda b: (b, 0))]
                + [w_spec(a) for a in conv_mats + conv_biases + enc_ws]
                + [pl.BlockSpec((TB, action_dim), lambda b: (b, 0))]
                + [w_spec(a) for a in q_ws])
    out_spec = pl.BlockSpec((TB, num_critics), lambda b: (b, 0))

    scratch = [pltpu.VMEM((TB, lp["h_out"] * lp["ow"] * lp["cout"]), jnp.float32)
               for lp in plan]

    # VMEM budget: single-buffered resident weights + activation scratch +
    # double-buffered x/action/output blocks, with headroom.  Default scoped limits
    # (16/32 MiB) are too small for realistic frame sizes.
    weight_bytes = sum(a.size * a.dtype.itemsize for a in resident)
    scratch_bytes = sum(TB * lp["h_out"] * lp["ow"] * lp["cout"] * 4 for lp in plan)
    io_bytes = 2 * (TB * x.shape[1] * x.dtype.itemsize
                    + TB * action_dim * 4 + TB * num_critics * 4)
    vmem_limit = int(min(100 * 2 ** 20,
                         max(32 * 2 ** 20,
                             2 * (weight_bytes + scratch_bytes + io_bytes))))

    kernel = functools.partial(_fused_kernel, plan=plan, n_mats=len(conv_mats),
                               eps=1e-5)
    out = pl.pallas_call(
        kernel,
        out_shape=jax.ShapeDtypeStruct((Bp, num_critics), jnp.float32),
        grid_spec=pltpu.PrefetchScalarGridSpec(
            num_scalar_prefetch=0,
            grid=(n_blocks,),
            in_specs=in_specs,
            out_specs=out_spec,
            scratch_shapes=scratch),
        compiler_params=pltpu.CompilerParams(
            dimension_semantics=("parallel",),
            vmem_limit_bytes=vmem_limit),
    )(x, *conv_mats, *conv_biases, *enc_ws, act2d, *q_ws)
    return out[:B]


# --------------------------------------------------------------------------------------
# Deterministic synthetic parameters in "PyTorch-like" layout (replaces weight_init)
# --------------------------------------------------------------------------------------
def init_raw_params(key, *, in_channels, screen_size, action_dim, features_dim=50,
                    hidden_size=32, num_critics=2, cnn_channels=32):
    def dense(k, fi, fo):
        kw_, kb_ = jax.random.split(k)
        s = 1.0 / jnp.sqrt(jnp.float32(fi))
        return (jax.random.normal(kw_, (fi, fo), jnp.float32) * s,
                jax.random.normal(kb_, (fo,), jnp.float32) * 0.01)

    def conv(k, cin, cout, ksz=3):
        kw_, kb_ = jax.random.split(k)
        s = 1.0 / jnp.sqrt(jnp.float32(ksz * ksz * cin))
        return (jax.random.normal(kw_, (ksz, ksz, cin, cout), jnp.float32) * s,
                jax.random.normal(kb_, (cout,), jnp.float32) * 0.01)

    keys = iter(jax.random.split(key, 5 + 3 * num_critics))
    convs = []
    cin, size = in_channels, screen_size
    for s in (2, 1, 1, 1):                       # SAC-AE conv stack strides
        convs.append(conv(next(keys), cin, cnn_channels))
        size = (size - 3) // s + 1
        cin = cnn_channels
    conv_flat = cnn_channels * size * size

    fc_w, fc_b = dense(next(keys), conv_flat, features_dim)
    qfs = []
    for _ in range(num_critics):
        w1, b1 = dense(next(keys), features_dim + action_dim, hidden_size)
        w2, b2 = dense(next(keys), hidden_size, hidden_size)
        w3, b3 = dense(next(keys), hidden_size, 1)
        qfs.append((w1, b1, w2, b2, w3, b3))

    return {"convs": convs, "fc_w": fc_w, "fc_b": fc_b,
            "ln_g": jnp.ones((features_dim,), jnp.float32),
            "ln_b": jnp.zeros((features_dim,), jnp.float32),
            "qfs": qfs}


# --------------------------------------------------------------------------------------
# One-time repack of the raw params into the fused-kernel layout
# --------------------------------------------------------------------------------------
def pack_params(raw, *, in_channels, screen_size, features_dim, hidden_size,
                num_critics, cnn_channels=32, weight_dtype=jnp.float32,
                conv_n_tile=256):
    C = in_channels
    assert screen_size % 2 == 0, "kernel packing assumes even square frames"
    h2 = w2 = screen_size // 2

    # -- conv1: fold the stride-2 3x3 conv into a stride-1 2x2 conv over the
    #    space-to-depth (factor-2) input --
    w1 = np.asarray(raw["convs"][0][0])                 # [3,3,C,cnn]
    b1 = np.asarray(raw["convs"][0][1])
    w1p = np.zeros((2, 2, 2, 2, C, cnn_channels), np.float32)
    for di in range(2):
        for ri in range(2):
            if 2 * di + ri >= 3:
                continue
            for dj in range(2):
                for rj in range(2):
                    if 2 * dj + rj >= 3:
                        continue
                    w1p[di, dj, ri, rj] = w1[2 * di + ri, 2 * dj + rj]
    layer_ws = [(w1p.reshape(2, 2, 4 * C, cnn_channels), b1)]
    layer_ws += [(np.asarray(w), np.asarray(b)) for (w, b) in raw["convs"][1:]]

    # -- each conv layer -> width-tiled Toeplitz row-tap matmuls --
    plan, conv_mats, conv_biases = [], [], []
    h_in, w_in = h2, w2
    for (w, b) in layer_ws:
        kh, kw, cin, cout = w.shape
        ow, h_out = w_in - kw + 1, h_in - kh + 1
        tw_full = max(1, conv_n_tile // cout)
        tiles, q0 = [], 0
        while q0 < ow:
            t = min(tw_full, ow - q0)
            m = np.zeros((kh, (t + kw - 1) * cin, t * cout), np.float32)
            for i in range(kh):
                for q in range(t):
                    for j in range(kw):
                        m[i, (q + j) * cin:(q + j + 1) * cin,
                          q * cout:(q + 1) * cout] = w[i, j]
            conv_mats.append(m)
            tiles.append((q0, t))
            q0 += t
        conv_biases.append(np.tile(b, ow)[None, :].astype(np.float32))
        plan.append(dict(KH=kh, KW=kw, cin=cin, cout=cout, h_in=h_in, w_in=w_in,
                         h_out=h_out, ow=ow, tiles=tuple(tiles)))
        h_in, w_in = h_out, ow

    # -- fold PyTorch's CHW flatten order into the fc rows (kernel emits HWC) --
    hf, wf = h_in, w_in
    cflat = cnn_channels * hf * wf
    assert np.asarray(raw["fc_w"]).shape[0] == cflat
    chw_of_hwc = np.transpose(np.arange(cflat).reshape(cnn_channels, hf, wf),
                              (1, 2, 0)).reshape(-1)
    fc_w = np.asarray(raw["fc_w"])[chw_of_hwc, :]

    # -- merge all critics into one matmul chain --
    nch = num_critics * hidden_size
    qw1_full = np.concatenate([np.asarray(w1_) for (w1_, *_) in raw["qfs"]], axis=1)
    qb1 = np.concatenate([np.asarray(b1_) for (_, b1_, *_) in raw["qfs"]])[None, :]
    qw2 = np.zeros((nch, nch), np.float32)
    qb2 = np.zeros((1, nch), np.float32)
    qw3 = np.zeros((nch, num_critics), np.float32)
    qb3 = np.zeros((1, num_critics), np.float32)
    for k, (_, _, w2_, b2_, w3_, b3_) in enumerate(raw["qfs"]):
        sl = slice(k * hidden_size, (k + 1) * hidden_size)
        qw2[sl, sl] = np.asarray(w2_)
        qb2[0, sl] = np.asarray(b2_)
        qw3[sl, k] = np.asarray(w3_)[:, 0]
        qb3[0, k] = np.asarray(b3_)[0]

    wd = lambda a: jnp.asarray(a, weight_dtype)        # big matmul weights
    f32 = lambda a: jnp.asarray(a, jnp.float32)        # biases / LN params
    return {"plan": tuple(plan),
            "conv_mats": [wd(m) for m in conv_mats],
            "conv_biases": [f32(b) for b in conv_biases],
            "fc_w": wd(fc_w), "fc_b": f32(np.asarray(raw["fc_b"])[None, :]),
            "ln_g": f32(np.asarray(raw["ln_g"])[None, :]),
            "ln_b": f32(np.asarray(raw["ln_b"])[None, :]),
            "qw1f": wd(qw1_full[:features_dim, :]),
            "qw1a": wd(qw1_full[features_dim:, :]),
            "qb1": f32(qb1), "qw2": wd(qw2), "qb2": f32(qb2),
            "qw3": wd(qw3), "qb3": f32(qb3)}


# --------------------------------------------------------------------------------------
# Pure-JAX reference of the original PyTorch module (for correctness check only)
# --------------------------------------------------------------------------------------
def _reference_forward(raw, obs_nchw, action):
    x = jnp.transpose(obs_nchw, (0, 2, 3, 1))                       # NHWC
    for (w, b), s in zip(raw["convs"], (2, 1, 1, 1)):
        x = jax.lax.conv_general_dilated(
            x, w, window_strides=(s, s), padding="VALID",
            dimension_numbers=("NHWC", "HWIO", "NHWC"))
        x = jnp.maximum(x + b, 0.0)
    x = jnp.transpose(x, (0, 3, 1, 2)).reshape(x.shape[0], -1)      # CHW flatten
    y = x @ raw["fc_w"] + raw["fc_b"]
    mu = y.mean(-1, keepdims=True)
    var = ((y - mu) ** 2).mean(-1, keepdims=True)
    feat = jnp.tanh((y - mu) / jnp.sqrt(var + 1e-5) * raw["ln_g"] + raw["ln_b"])
    xq = jnp.concatenate([feat, action], -1)
    qs = []
    for (w1, b1, w2, b2, w3, b3) in raw["qfs"]:
        h = jnp.maximum(xq @ w1 + b1, 0.0)
        h = jnp.maximum(h @ w2 + b2, 0.0)
        qs.append(h @ w3 + b3)
    return jnp.concatenate(qs, -1)


if __name__ == "__main__":
    B, C, S = 2, 4, 16            # batch, stacked-frame channels, spatial size
    ACTION_DIM = 6
    NUM_CRITICS = 2
    HIDDEN = 32
    FEATURES = 50

    key = jax.random.PRNGKey(0)
    k_params, k_obs, k_act = jax.random.split(key, 3)

    raw = init_raw_params(k_params, in_channels=C, screen_size=S, action_dim=ACTION_DIM,
                          features_dim=FEATURES, hidden_size=HIDDEN,
                          num_critics=NUM_CRITICS)
    packed = pack_params(raw, in_channels=C, screen_size=S, features_dim=FEATURES,
                         hidden_size=HIDDEN, num_critics=NUM_CRITICS)
    # NOTE: pass weight_dtype=jnp.bfloat16 to pack_params for the bf16 training path
    # (validated only with loose tolerances; default f32 matches the reference tightly).

    obs = jax.random.uniform(k_obs, (B, C, S, S), jnp.float32)        # NCHW like PyTorch
    action = jax.random.uniform(k_act, (B, ACTION_DIM), jnp.float32) * 2.0 - 1.0

    fwd = jax.jit(functools.partial(sac_ae_critic_forward, packed))
    q = jax.block_until_ready(fwd(obs, action))

    assert q.shape == (B, NUM_CRITICS), q.shape
    assert bool(jnp.all(jnp.isfinite(q)))

    # correctness vs. a plain-JAX implementation of the original module
    q_ref = jax.block_until_ready(jax.jit(_reference_forward)(raw, obs, action))
    assert bool(jnp.allclose(q, q_ref, atol=1e-4, rtol=1e-3)), (q, q_ref)

    print("KERNEL_OK")
</pallas_src>

<mosaic_0001>
module attributes {stable_mosaic.version = 11 : i64} {
  func.func @_fused_kernel(%arg0: i32, %arg1: memref<8x1024xf32, #tpu.memory_space<vmem>>, %arg2: memref<2x128x224xf32, #tpu.memory_space<vmem>>, %arg3: memref<3x224x160xf32, #tpu.memory_space<vmem>>, %arg4: memref<3x160x96xf32, #tpu.memory_space<vmem>>, %arg5: memref<3x96x32xf32, #tpu.memory_space<vmem>>, %arg6: memref<1x224xf32, #tpu.memory_space<vmem>>, %arg7: memref<1x160xf32, #tpu.memory_space<vmem>>, %arg8: memref<1x96xf32, #tpu.memory_space<vmem>>, %arg9: memref<1x32xf32, #tpu.memory_space<vmem>>, %arg10: memref<32x50xf32, #tpu.memory_space<vmem>>, %arg11: memref<1x50xf32, #tpu.memory_space<vmem>>, %arg12: memref<1x50xf32, #tpu.memory_space<vmem>>, %arg13: memref<1x50xf32, #tpu.memory_space<vmem>>, %arg14: memref<8x6xf32, #tpu.memory_space<vmem>>, %arg15: memref<50x64xf32, #tpu.memory_space<vmem>>, %arg16: memref<6x64xf32, #tpu.memory_space<vmem>>, %arg17: memref<1x64xf32, #tpu.memory_space<vmem>>, %arg18: memref<64x64xf32, #tpu.memory_space<vmem>>, %arg19: memref<1x64xf32, #tpu.memory_space<vmem>>, %arg20: memref<64x2xf32, #tpu.memory_space<vmem>>, %arg21: memref<1x2xf32, #tpu.memory_space<vmem>>, %arg22: memref<8x2xf32, #tpu.memory_space<vmem>>, %arg23: memref<8x1568xf32, #tpu.memory_space<vmem>>, %arg24: memref<8x800xf32, #tpu.memory_space<vmem>>, %arg25: memref<8x288xf32, #tpu.memory_space<vmem>>, %arg26: memref<8x32xf32, #tpu.memory_space<vmem>>) attributes {dimension_semantics = [#tpu.dimension_semantics<parallel>], iteration_bounds = array<i64: 1>, scalar_prefetch = 0 : i64, scratch_operands = 4 : i64, tpu.core_type = #tpu.core_type<tc>, window_params = [{transform_indices = @transform_0, window_bounds = array<i64: 8, 1024>}, {pipeline_mode = #tpu.pipeline_mode<synchronous>, transform_indices = @transform_1, window_bounds = array<i64: 2, 128, 224>}, {pipeline_mode = #tpu.pipeline_mode<synchronous>, transform_indices = @transform_2, window_bounds = array<i64: 3, 224, 160>}, {pipeline_mode = #tpu.pipeline_mode<synchronous>, transform_indices = @transform_3, window_bounds = array<i64: 3, 160, 96>}, {pipeline_mode = #tpu.pipeline_mode<synchronous>, transform_indices = @transform_4, window_bounds = array<i64: 3, 96, 32>}, {pipeline_mode = #tpu.pipeline_mode<synchronous>, transform_indices = @transform_5, window_bounds = array<i64: 1, 224>}, {pipeline_mode = #tpu.pipeline_mode<synchronous>, transform_indices = @transform_6, window_bounds = array<i64: 1, 160>}, {pipeline_mode = #tpu.pipeline_mode<synchronous>, transform_indices = @transform_7, window_bounds = array<i64: 1, 96>}, {pipeline_mode = #tpu.pipeline_mode<synchronous>, transform_indices = @transform_8, window_bounds = array<i64: 1, 32>}, {pipeline_mode = #tpu.pipeline_mode<synchronous>, transform_indices = @transform_9, window_bounds = array<i64: 32, 50>}, {pipeline_mode = #tpu.pipeline_mode<synchronous>, transform_indices = @transform_10, window_bounds = array<i64: 1, 50>}, {pipeline_mode = #tpu.pipeline_mode<synchronous>, transform_indices = @transform_11, window_bounds = array<i64: 1, 50>}, {pipeline_mode = #tpu.pipeline_mode<synchronous>, transform_indices = @transform_12, window_bounds = array<i64: 1, 50>}, {transform_indices = @transform_13, window_bounds = array<i64: 8, 6>}, {pipeline_mode = #tpu.pipeline_mode<synchronous>, transform_indices = @transform_14, window_bounds = array<i64: 50, 64>}, {pipeline_mode = #tpu.pipeline_mode<synchronous>, transform_indices = @transform_15, window_bounds = array<i64: 6, 64>}, {pipeline_mode = #tpu.pipeline_mode<synchronous>, transform_indices = @transform_16, window_bounds = array<i64: 1, 64>}, {pipeline_mode = #tpu.pipeline_mode<synchronous>, transform_indices = @transform_17, window_bounds = array<i64: 64, 64>}, {pipeline_mode = #tpu.pipeline_mode<synchronous>, transform_indices = @transform_18, window_bounds = array<i64: 1, 64>}, {pipeline_mode = #tpu.pipeline_mode<synchronous>, transform_indices = @transform_19, window_bounds = array<i64: 64, 2>}, {pipeline_mode = #tpu.pipeline_mode<synchronous>, transform_indices = @transform_20, window_bounds = array<i64: 1, 2>}, {transform_indices = @transform_21, window_bounds = array<i64: 8, 2>}]} {
    %c0 = arith.constant 0 : index
    %c0_0 = arith.constant 0 : index
    %0 = vector.load %arg1[%c0, %c0_0] : memref<8x1024xf32, #tpu.memory_space<vmem>>, vector<8x128xf32>
    %c0_1 = arith.constant 0 : index
    %c0_2 = arith.constant 0 : index
    %c0_3 = arith.constant 0 : index
    %1 = vector.load %arg2[%c0_1, %c0_2, %c0_3] : memref<2x128x224xf32, #tpu.memory_space<vmem>>, vector<1x128x224xf32>
    %2 = vector.shape_cast %1 : vector<1x128x224xf32> to vector<128x224xf32>
    %cst = arith.constant dense<0.000000e+00> : vector<8x224xf32>
    %3 = tpu.matmul %0, %2, %cst {dimension_numbers = #tpu.dot_dimension_numbers<[1], [0], [0], [1], [0, 0, 1, 1], [], []>} : vector<8x128xf32>, vector<128x224xf32>, vector<8x224xf32> -> vector<8x224xf32>
    %c0_4 = arith.constant 0 : index
    %c128 = arith.constant 128 : index
    %4 = vector.load %arg1[%c0_4, %c128] : memref<8x1024xf32, #tpu.memory_space<vmem>>, vector<8x128xf32>
    %c1 = arith.constant 1 : index
    %c0_5 = arith.constant 0 : index
    %c0_6 = arith.constant 0 : index
    %5 = vector.load %arg2[%c1, %c0_5, %c0_6] : memref<2x128x224xf32, #tpu.memory_space<vmem>>, vector<1x128x224xf32>
    %6 = vector.shape_cast %5 : vector<1x128x224xf32> to vector<128x224xf32>
    %cst_7 = arith.constant dense<0.000000e+00> : vector<8x224xf32>
    %7 = tpu.matmul %4, %6, %cst_7 {dimension_numbers = #tpu.dot_dimension_numbers<[1], [0], [0], [1], [0, 0, 1, 1], [], []>} : vector<8x128xf32>, vector<128x224xf32>, vector<8x224xf32> -> vector<8x224xf32>
    %8 = arith.addf %3, %7 : vector<8x224xf32>
    %c0_8 = arith.constant 0 : index
    %c0_9 = arith.constant 0 : index
    %9 = vector.load %arg6[%c0_8, %c0_9] : memref<1x224xf32, #tpu.memory_space<vmem>>, vector<1x224xf32>
    %10 = vector.broadcast %9 : vector<1x224xf32> to vector<8x224xf32>
    %11 = arith.addf %8, %10 : vector<8x224xf32>
    %cst_10 = arith.constant 0.000000e+00 : f32
    %12 = vector.broadcast %cst_10 : f32 to vector<8x224xf32>
    %13 = arith.maximumf %11, %12 : vector<8x224xf32>
    %c0_11 = arith.constant 0 : index
    %c0_12 = arith.constant 0 : index
    %14 = vector.load %arg23[%c0_11, %c0_12] : memref<8x1568xf32, #tpu.memory_space<vmem>>, vector<8x224xf32>
    tpu.vector_store %arg23[%c0_11, %c0_12], %13 {strides = array<i32>} : memref<8x1568xf32, #tpu.memory_space<vmem>>, vector<8x224xf32>,
    %c0_13 = arith.constant 0 : index
    %c128_14 = arith.constant 128 : index
    %15 = vector.load %arg1[%c0_13, %c128_14] : memref<8x1024xf32, #tpu.memory_space<vmem>>, vector<8x128xf32>
    %c0_15 = arith.constant 0 : index
    %c0_16 = arith.constant 0 : index
    %c0_17 = arith.constant 0 : index
    %16 = vector.load %arg2[%c0_15, %c0_16, %c0_17] : memref<2x128x224xf32, #tpu.memory_space<vmem>>, vector<1x128x224xf32>
    %17 = vector.shape_cast %16 : vector<1x128x224xf32> to vector<128x224xf32>
    %cst_18 = arith.constant dense<0.000000e+00> : vector<8x224xf32>
    %18 = tpu.matmul %15, %17, %cst_18 {dimension_numbers = #tpu.dot_dimension_numbers<[1], [0], [0], [1], [0, 0, 1, 1], [], []>} : vector<8x128xf32>, vector<128x224xf32>, vector<8x224xf32> -> vector<8x224xf32>
    %c0_19 = arith.constant 0 : index
    %c256 = arith.constant 256 : index
    %19 = vector.load %arg1[%c0_19, %c256] : memref<8x1024xf32, #tpu.memory_space<vmem>>, vector<8x128xf32>
    %c1_20 = arith.constant 1 : index
    %c0_21 = arith.constant 0 : index
    %c0_22 = arith.constant 0 : index
    %20 = vector.load %arg2[%c1_20, %c0_21, %c0_22] : memref<2x128x224xf32, #tpu.memory_space<vmem>>, vector<1x128x224xf32>
    %21 = vector.shape_cast %20 : vector<1x128x224xf32> to vector<128x224xf32>
    %cst_23 = arith.constant dense<0.000000e+00> : vector<8x224xf32>
    %22 = tpu.matmul %19, %21, %cst_23 {dimension_numbers = #tpu.dot_dimension_numbers<[1], [0], [0], [1], [0, 0, 1, 1], [], []>} : vector<8x128xf32>, vector<128x224xf32>, vector<8x224xf32> -> vector<8x224xf32>
    %23 = arith.addf %18, %22 : vector<8x224xf32>
    %c0_24 = arith.constant 0 : index
    %c0_25 = arith.constant 0 : index
    %24 = vector.load %arg6[%c0_24, %c0_25] : memref<1x224xf32, #tpu.memory_space<vmem>>, vector<1x224xf32>
    %25 = vector.broadcast %24 : vector<1x224xf32> to vector<8x224xf32>
    %26 = arith.addf %23, %25 : vector<8x224xf32>
    %cst_26 = arith.constant 0.000000e+00 : f32
    %27 = vector.broadcast %cst_26 : f32 to vector<8x224xf32>
    %28 = arith.maximumf %26, %27 : vector<8x224xf32>
    %c0_27 = arith.constant 0 : index
    %c224 = arith.constant 224 : index
    %29 = vector.load %arg23[%c0_27, %c224] : memref<8x1568xf32, #tpu.memory_space<vmem>>, vector<8x224xf32>
    tpu.vector_store %arg23[%c0_27, %c224], %28 {strides = array<i32>} : memref<8x1568xf32, #tpu.memory_space<vmem>>, vector<8x224xf32>,
    %c0_28 = arith.constant 0 : index
    %c256_29 = arith.constant 256 : index
    %30 = vector.load %arg1[%c0_28, %c256_29] : memref<8x1024xf32, #tpu.memory_space<vmem>>, vector<8x128xf32>
    %c0_30 = arith.constant 0 : index
    %c0_31 = arith.constant 0 : index
    %c0_32 = arith.constant 0 : index
    %31 = vector.load %arg2[%c0_30, %c0_31, %c0_32] : memref<2x128x224xf32, #tpu.memory_space<vmem>>, vector<1x128x224xf32>
    %32 = vector.shape_cast %31 : vector<1x128x224xf32> to vector<128x224xf32>
    %cst_33 = arith.constant dense<0.000000e+00> : vector<8x224xf32>
    %33 = tpu.matmul %30, %32, %cst_33 {dimension_numbers = #tpu.dot_dimension_numbers<[1], [0], [0], [1], [0, 0, 1, 1], [], []>} : vector<8x128xf32>, vector<128x224xf32>, vector<8x224xf32> -> vector<8x224xf32>
    %c0_34 = arith.constant 0 : index
    %c384 = arith.constant 384 : index
    %34 = vector.load %arg1[%c0_34, %c384] : memref<8x1024xf32, #tpu.memory_space<vmem>>, vector<8x128xf32>
    %c1_35 = arith.constant 1 : index
    %c0_36 = arith.constant 0 : index
    %c0_37 = arith.constant 0 : index
    %35 = vector.load %arg2[%c1_35, %c0_36, %c0_37] : memref<2x128x224xf32, #tpu.memory_space<vmem>>, vector<1x128x224xf32>
    %36 = vector.shape_cast %35 : vector<1x128x224xf32> to vector<128x224xf32>
    %cst_38 = arith.constant dense<0.000000e+00> : vector<8x224xf32>
    %37 = tpu.matmul %34, %36, %cst_38 {dimension_numbers = #tpu.dot_dimension_numbers<[1], [0], [0], [1], [0, 0, 1, 1], [], []>} : vector<8x128xf32>, vector<128x224xf32>, vector<8x224xf32> -> vector<8x224xf32>
    %38 = arith.addf %33, %37 : vector<8x224xf32>
    %c0_39 = arith.constant 0 : index
    %c0_40 = arith.constant 0 : index
    %39 = vector.load %arg6[%c0_39, %c0_40] : memref<1x224xf32, #tpu.memory_space<vmem>>, vector<1x224xf32>
    %40 = vector.broadcast %39 : vector<1x224xf32> to vector<8x224xf32>
    %41 = arith.addf %38, %40 : vector<8x224xf32>
    %cst_41 = arith.constant 0.000000e+00 : f32
    %42 = vector.broadcast %cst_41 : f32 to vector<8x224xf32>
    %43 = arith.maximumf %41, %42 : vector<8x224xf32>
    %c0_42 = arith.constant 0 : index
    %c448 = arith.constant 448 : index
    %44 = vector.load %arg23[%c0_42, %c448] : memref<8x1568xf32, #tpu.memory_space<vmem>>, vector<8x224xf32>
    tpu.vector_store %arg23[%c0_42, %c448], %43 {strides = array<i32>} : memref<8x1568xf32, #tpu.memory_space<vmem>>, vector<8x224xf32>,
    %c0_43 = arith.constant 0 : index
    %c384_44 = arith.constant 384 : index
    %45 = vector.load %arg1[%c0_43, %c384_44] : memref<8x1024xf32, #tpu.memory_space<vmem>>, vector<8x128xf32>
    %c0_45 = arith.constant 0 : index
    %c0_46 = arith.constant 0 : index
    %c0_47 = arith.constant 0 : index
    %46 = vector.load %arg2[%c0_45, %c0_46, %c0_47] : memref<2x128x224xf32, #tpu.memory_space<vmem>>, vector<1x128x224xf32>
    %47 = vector.shape_cast %46 : vector<1x128x224xf32> to vector<128x224xf32>
    %cst_48 = arith.constant dense<0.000000e+00> : vector<8x224xf32>
    %48 = tpu.matmul %45, %47, %cst_48 {dimension_numbers = #tpu.dot_dimension_numbers<[1], [0], [0], [1], [0, 0, 1, 1], [], []>} : vector<8x128xf32>, vector<128x224xf32>, vector<8x224xf32> -> vector<8x224xf32>
    %c0_49 = arith.constant 0 : index
    %c512 = arith.constant 512 : index
    %49 = vector.load %arg1[%c0_49, %c512] : memref<8x1024xf32, #tpu.memory_space<vmem>>, vector<8x128xf32>
    %c1_50 = arith.constant 1 : index
    %c0_51 = arith.constant 0 : index
    %c0_52 = arith.constant 0 : index
    %50 = vector.load %arg2[%c1_50, %c0_51, %c0_52] : memref<2x128x224xf32, #tpu.memory_space<vmem>>, vector<1x128x224xf32>
    %51 = vector.shape_cast %50 : vector<1x128x224xf32> to vector<128x224xf32>
    %cst_53 = arith.constant dense<0.000000e+00> : vector<8x224xf32>
    %52 = tpu.matmul %49, %51, %cst_53 {dimension_numbers = #tpu.dot_dimension_numbers<[1], [0], [0], [1], [0, 0, 1, 1], [], []>} : vector<8x128xf32>, vector<128x224xf32>, vector<8x224xf32> -> vector<8x224xf32>
    %53 = arith.addf %48, %52 : vector<8x224xf32>
    %c0_54 = arith.constant 0 : index
    %c0_55 = arith.constant 0 : index
    %54 = vector.load %arg6[%c0_54, %c0_55] : memref<1x224xf32, #tpu.memory_space<vmem>>, vector<1x224xf32>
    %55 = vector.broadcast %54 : vector<1x224xf32> to vector<8x224xf32>
    %56 = arith.addf %53, %55 : vector<8x224xf32>
    %cst_56 = arith.constant 0.000000e+00 : f32
    %57 = vector.broadcast %cst_56 : f32 to vector<8x224xf32>
    %58 = arith.maximumf %56, %57 : vector<8x224xf32>
    %c0_57 = arith.constant 0 : index
    %c672 = arith.constant 672 : index
    %59 = vector.load %arg23[%c0_57, %c672] : memref<8x1568xf32, #tpu.memory_space<vmem>>, vector<8x224xf32>
    tpu.vector_store %arg23[%c0_57, %c672], %58 {strides = array<i32>} : memref<8x1568xf32, #tpu.memory_space<vmem>>, vector<8x224xf32>,
    %c0_58 = arith.constant 0 : index
    %c512_59 = arith.constant 512 : index
    %60 = vector.load %arg1[%c0_58, %c512_59] : memref<8x1024xf32, #tpu.memory_space<vmem>>, vector<8x128xf32>
    %c0_60 = arith.constant 0 : index
    %c0_61 = arith.constant 0 : index
    %c0_62 = arith.constant 0 : index
    %61 = vector.load %arg2[%c0_60, %c0_61, %c0_62] : memref<2x128x224xf32, #tpu.memory_space<vmem>>, vector<1x128x224xf32>
    %62 = vector.shape_cast %61 : vector<1x128x224xf32> to vector<128x224xf32>
    %cst_63 = arith.constant dense<0.000000e+00> : vector<8x224xf32>
    %63 = tpu.matmul %60, %62, %cst_63 {dimension_numbers = #tpu.dot_dimension_numbers<[1], [0], [0], [1], [0, 0, 1, 1], [], []>} : vector<8x128xf32>, vector<128x224xf32>, vector<8x224xf32> -> vector<8x224xf32>
    %c0_64 = arith.constant 0 : index
    %c640 = arith.constant 640 : index
    %64 = vector.load %arg1[%c0_64, %c640] : memref<8x1024xf32, #tpu.memory_space<vmem>>, vector<8x128xf32>
    %c1_65 = arith.constant 1 : index
    %c0_66 = arith.constant 0 : index
    %c0_67 = arith.constant 0 : index
    %65 = vector.load %arg2[%c1_65, %c0_66, %c0_67] : memref<2x128x224xf32, #tpu.memory_space<vmem>>, vector<1x128x224xf32>
    %66 = vector.shape_cast %65 : vector<1x128x224xf32> to vector<128x224xf32>
    %cst_68 = arith.constant dense<0.000000e+00> : vector<8x224xf32>
    %67 = tpu.matmul %64, %66, %cst_68 {dimension_numbers = #tpu.dot_dimension_numbers<[1], [0], [0], [1], [0, 0, 1, 1], [], []>} : vector<8x128xf32>, vector<128x224xf32>, vector<8x224xf32> -> vector<8x224xf32>
    %68 = arith.addf %63, %67 : vector<8x224xf32>
    %c0_69 = arith.constant 0 : index
    %c0_70 = arith.constant 0 : index
    %69 = vector.load %arg6[%c0_69, %c0_70] : memref<1x224xf32, #tpu.memory_space<vmem>>, vector<1x224xf32>
    %70 = vector.broadcast %69 : vector<1x224xf32> to vector<8x224xf32>
    %71 = arith.addf %68, %70 : vector<8x224xf32>
    %cst_71 = arith.constant 0.000000e+00 : f32
    %72 = vector.broadcast %cst_71 : f32 to vector<8x224xf32>
    %73 = arith.maximumf %71, %72 : vector<8x224xf32>
    %c0_72 = arith.constant 0 : index
    %c896 = arith.constant 896 : index
    %74 = vector.load %arg23[%c0_72, %c896] : memref<8x1568xf32, #tpu.memory_space<vmem>>, vector<8x224xf32>
    tpu.vector_store %arg23[%c0_72, %c896], %73 {strides = array<i32>} : memref<8x1568xf32, #tpu.memory_space<vmem>>, vector<8x224xf32>,
    %c0_73 = arith.constant 0 : index
    %c640_74 = arith.constant 640 : index
    %75 = vector.load %arg1[%c0_73, %c640_74] : memref<8x1024xf32, #tpu.memory_space<vmem>>, vector<8x128xf32>
    %c0_75 = arith.constant 0 : index
    %c0_76 = arith.constant 0 : index
    %c0_77 = arith.constant 0 : index
    %76 = vector.load %arg2[%c0_75, %c0_76, %c0_77] : memref<2x128x224xf32, #tpu.memory_space<vmem>>, vector<1x128x224xf32>
    %77 = vector.shape_cast %76 : vector<1x128x224xf32> to vector<128x224xf32>
    %cst_78 = arith.constant dense<0.000000e+00> : vector<8x224xf32>
    %78 = tpu.matmul %75, %77, %cst_78 {dimension_numbers = #tpu.dot_dimension_numbers<[1], [0], [0], [1], [0, 0, 1, 1], [], []>} : vector<8x128xf32>, vector<128x224xf32>, vector<8x224xf32> -> vector<8x224xf32>
    %c0_79 = arith.constant 0 : index
    %c768 = arith.constant 768 : index
    %79 = vector.load %arg1[%c0_79, %c768] : memref<8x1024xf32, #tpu.memory_space<vmem>>, vector<8x128xf32>
    %c1_80 = arith.constant 1 : index
    %c0_81 = arith.constant 0 : index
    %c0_82 = arith.constant 0 : index
    %80 = vector.load %arg2[%c1_80, %c0_81, %c0_82] : memref<2x128x224xf32, #tpu.memory_space<vmem>>, vector<1x128x224xf32>
    %81 = vector.shape_cast %80 : vector<1x128x224xf32> to vector<128x224xf32>
    %cst_83 = arith.constant dense<0.000000e+00> : vector<8x224xf32>
    %82 = tpu.matmul %79, %81, %cst_83 {dimension_numbers = #tpu.dot_dimension_numbers<[1], [0], [0], [1], [0, 0, 1, 1], [], []>} : vector<8x128xf32>, vector<128x224xf32>, vector<8x224xf32> -> vector<8x224xf32>
    %83 = arith.addf %78, %82 : vector<8x224xf32>
    %c0_84 = arith.constant 0 : index
    %c0_85 = arith.constant 0 : index
    %84 = vector.load %arg6[%c0_84, %c0_85] : memref<1x224xf32, #tpu.memory_space<vmem>>, vector<1x224xf32>
    %85 = vector.broadcast %84 : vector<1x224xf32> to vector<8x224xf32>
    %86 = arith.addf %83, %85 : vector<8x224xf32>
    %cst_86 = arith.constant 0.000000e+00 : f32
    %87 = vector.broadcast %cst_86 : f32 to vector<8x224xf32>
    %88 = arith.maximumf %86, %87 : vector<8x224xf32>
    %c0_87 = arith.constant 0 : index
    %c1120 = arith.constant 1120 : index
    %89 = vector.load %arg23[%c0_87, %c1120] : memref<8x1568xf32, #tpu.memory_space<vmem>>, vector<8x224xf32>
    tpu.vector_store %arg23[%c0_87, %c1120], %88 {strides = array<i32>} : memref<8x1568xf32, #tpu.memory_space<vmem>>, vector<8x224xf32>,
    %c0_88 = arith.constant 0 : index
    %c768_89 = arith.constant 768 : index
    %90 = vector.load %arg1[%c0_88, %c768_89] : memref<8x1024xf32, #tpu.memory_space<vmem>>, vector<8x128xf32>
    %c0_90 = arith.constant 0 : index
    %c0_91 = arith.constant 0 : index
    %c0_92 = arith.constant 0 : index
    %91 = vector.load %arg2[%c0_90, %c0_91, %c0_92] : memref<2x128x224xf32, #tpu.memory_space<vmem>>, vector<1x128x224xf32>
    %92 = vector.shape_cast %91 : vector<1x128x224xf32> to vector<128x224xf32>
    %cst_93 = arith.constant dense<0.000000e+00> : vector<8x224xf32>
    %93 = tpu.matmul %90, %92, %cst_93 {dimension_numbers = #tpu.dot_dimension_numbers<[1], [0], [0], [1], [0, 0, 1, 1], [], []>} : vector<8x128xf32>, vector<128x224xf32>, vector<8x224xf32> -> vector<8x224xf32>
    %c0_94 = arith.constant 0 : index
    %c896_95 = arith.constant 896 : index
    %94 = vector.load %arg1[%c0_94, %c896_95] : memref<8x1024xf32, #tpu.memory_space<vmem>>, vector<8x128xf32>
    %c1_96 = arith.constant 1 : index
    %c0_97 = arith.constant 0 : index
    %c0_98 = arith.constant 0 : index
    %95 = vector.load %arg2[%c1_96, %c0_97, %c0_98] : memref<2x128x224xf32, #tpu.memory_space<vmem>>, vector<1x128x224xf32>
    %96 = vector.shape_cast %95 : vector<1x128x224xf32> to vector<128x224xf32>
    %cst_99 = arith.constant dense<0.000000e+00> : vector<8x224xf32>
    %97 = tpu.matmul %94, %96, %cst_99 {dimension_numbers = #tpu.dot_dimension_numbers<[1], [0], [0], [1], [0, 0, 1, 1], [], []>} : vector<8x128xf32>, vector<128x224xf32>, vector<8x224xf32> -> vector<8x224xf32>
    %98 = arith.addf %93, %97 : vector<8x224xf32>
    %c0_100 = arith.constant 0 : index
    %c0_101 = arith.constant 0 : index
    %99 = vector.load %arg6[%c0_100, %c0_101] : memref<1x224xf32, #tpu.memory_space<vmem>>, vector<1x224xf32>
    %100 = vector.broadcast %99 : vector<1x224xf32> to vector<8x224xf32>
    %101 = arith.addf %98, %100 : vector<8x224xf32>
    %cst_102 = arith.constant 0.000000e+00 : f32
    %102 = vector.broadcast %cst_102 : f32 to vector<8x224xf32>
    %103 = arith.maximumf %101, %102 : vector<8x224xf32>
    %c0_103 = arith.constant 0 : index
    %c1344 = arith.constant 1344 : index
    %104 = vector.load %arg23[%c0_103, %c1344] : memref<8x1568xf32, #tpu.memory_space<vmem>>, vector<8x224xf32>
    tpu.vector_store %arg23[%c0_103, %c1344], %103 {strides = array<i32>} : memref<8x1568xf32, #tpu.memory_space<vmem>>, vector<8x224xf32>,
    %c0_104 = arith.constant 0 : index
    %c0_105 = arith.constant 0 : index
    %105 = vector.load %arg23[%c0_104, %c0_105] : memref<8x1568xf32, #tpu.memory_space<vmem>>, vector<8x224xf32>
    %c0_106 = arith.constant 0 : index
    %c0_107 = arith.constant 0 : index
    %c0_108 = arith.constant 0 : index
    %106 = vector.load %arg3[%c0_106, %c0_107, %c0_108] : memref<3x224x160xf32, #tpu.memory_space<vmem>>, vector<1x224x160xf32>
    %107 = vector.shape_cast %106 : vector<1x224x160xf32> to vector<224x160xf32>
    %cst_109 = arith.constant dense<0.000000e+00> : vector<8x160xf32>
    %108 = tpu.matmul %105, %107, %cst_109 {dimension_numbers = #tpu.dot_dimension_numbers<[1], [0], [0], [1], [0, 0, 1, 1], [], []>} : vector<8x224xf32>, vector<224x160xf32>, vector<8x160xf32> -> vector<8x160xf32>
    %c0_110 = arith.constant 0 : index
    %c224_111 = arith.constant 224 : index
    %109 = vector.load %arg23[%c0_110, %c224_111] : memref<8x1568xf32, #tpu.memory_space<vmem>>, vector<8x224xf32>
    %c1_112 = arith.constant 1 : index
    %c0_113 = arith.constant 0 : index
    %c0_114 = arith.constant 0 : index
    %110 = vector.load %arg3[%c1_112, %c0_113, %c0_114] : memref<3x224x160xf32, #tpu.memory_space<vmem>>, vector<1x224x160xf32>
    %111 = vector.shape_cast %110 : vector<1x224x160xf32> to vector<224x160xf32>
    %cst_115 = arith.constant dense<0.000000e+00> : vector<8x160xf32>
    %112 = tpu.matmul %109, %111, %cst_115 {dimension_numbers = #tpu.dot_dimension_numbers<[1], [0], [0], [1], [0, 0, 1, 1], [], []>} : vector<8x224xf32>, vector<224x160xf32>, vector<8x160xf32> -> vector<8x160xf32>
    %113 = arith.addf %108, %112 : vector<8x160xf32>
    %c0_116 = arith.constant 0 : index
    %c448_117 = arith.constant 448 : index
    %114 = vector.load %arg23[%c0_116, %c448_117] : memref<8x1568xf32, #tpu.memory_space<vmem>>, vector<8x224xf32>
    %c2 = arith.constant 2 : index
    %c0_118 = arith.constant 0 : index
    %c0_119 = arith.constant 0 : index
    %115 = vector.load %arg3[%c2, %c0_118, %c0_119] : memref<3x224x160xf32, #tpu.memory_space<vmem>>, vector<1x224x160xf32>
    %116 = vector.shape_cast %115 : vector<1x224x160xf32> to vector<224x160xf32>
    %cst_120 = arith.constant dense<0.000000e+00> : vector<8x160xf32>
    %117 = tpu.matmul %114, %116, %cst_120 {dimension_numbers = #tpu.dot_dimension_numbers<[1], [0], [0], [1], [0, 0, 1, 1], [], []>} : vector<8x224xf32>, vector<224x160xf32>, vector<8x160xf32> -> vector<8x160xf32>
    %118 = arith.addf %113, %117 : vector<8x160xf32>
    %c0_121 = arith.constant 0 : index
    %c0_122 = arith.constant 0 : index
    %119 = vector.load %arg7[%c0_121, %c0_122] : memref<1x160xf32, #tpu.memory_space<vmem>>, vector<1x160xf32>
    %120 = vector.broadcast %119 : vector<1x160xf32> to vector<8x160xf32>
    %121 = arith.addf %118, %120 : vector<8x160xf32>
    %cst_123 = arith.constant 0.000000e+00 : f32
    %122 = vector.broadcast %cst_123 : f32 to vector<8x160xf32>
    %123 = arith.maximumf %121, %122 : vector<8x160xf32>
    %c0_124 = arith.constant 0 : index
    %c0_125 = arith.constant 0 : index
    %124 = vector.load %arg24[%c0_124, %c0_125] : memref<8x800xf32, #tpu.memory_space<vmem>>, vector<8x160xf32>
    tpu.vector_store %arg24[%c0_124, %c0_125], %123 {strides = array<i32>} : memref<8x800xf32, #tpu.memory_space<vmem>>, vector<8x160xf32>,
    %c0_126 = arith.constant 0 : index
    %c224_127 = arith.constant 224 : index
    %125 = vector.load %arg23[%c0_126, %c224_127] : memref<8x1568xf32, #tpu.memory_space<vmem>>, vector<8x224xf32>
    %c0_128 = arith.constant 0 : index
    %c0_129 = arith.constant 0 : index
    %c0_130 = arith.constant 0 : index
    %126 = vector.load %arg3[%c0_128, %c0_129, %c0_130] : memref<3x224x160xf32, #tpu.memory_space<vmem>>, vector<1x224x160xf32>
    %127 = vector.shape_cast %126 : vector<1x224x160xf32> to vector<224x160xf32>
    %cst_131 = arith.constant dense<0.000000e+00> : vector<8x160xf32>
    %128 = tpu.matmul %125, %127, %cst_131 {dimension_numbers = #tpu.dot_dimension_numbers<[1], [0], [0], [1], [0, 0, 1, 1], [], []>} : vector<8x224xf32>, vector<224x160xf32>, vector<8x160xf32> -> vector<8x160xf32>
    %c0_132 = arith.constant 0 : index
    %c448_133 = arith.constant 448 : index
    %129 = vector.load %arg23[%c0_132, %c448_133] : memref<8x1568xf32, #tpu.memory_space<vmem>>, vector<8x224xf32>
    %c1_134 = arith.constant 1 : index
    %c0_135 = arith.constant 0 : index
    %c0_136 = arith.constant 0 : index
    %130 = vector.load %arg3[%c1_134, %c0_135, %c0_136] : memref<3x224x160xf32, #tpu.memory_space<vmem>>, vector<1x224x160xf32>
    %131 = vector.shape_cast %130 : vector<1x224x160xf32> to vector<224x160xf32>
    %cst_137 = arith.constant dense<0.000000e+00> : vector<8x160xf32>
    %132 = tpu.matmul %129, %131, %cst_137 {dimension_numbers = #tpu.dot_dimension_numbers<[1], [0], [0], [1], [0, 0, 1, 1], [], []>} : vector<8x224xf32>, vector<224x160xf32>, vector<8x160xf32> -> vector<8x160xf32>
    %133 = arith.addf %128, %132 : vector<8x160xf32>
    %c0_138 = arith.constant 0 : index
    %c672_139 = arith.constant 672 : index
    %134 = vector.load %arg23[%c0_138, %c672_139] : memref<8x1568xf32, #tpu.memory_space<vmem>>, vector<8x224xf32>
    %c2_140 = arith.constant 2 : index
    %c0_141 = arith.constant 0 : index
    %c0_142 = arith.constant 0 : index
    %135 = vector.load %arg3[%c2_140, %c0_141, %c0_142] : memref<3x224x160xf32, #tpu.memory_space<vmem>>, vector<1x224x160xf32>
    %136 = vector.shape_cast %135 : vector<1x224x160xf32> to vector<224x160xf32>
    %cst_143 = arith.constant dense<0.000000e+00> : vector<8x160xf32>
    %137 = tpu.matmul %134, %136, %cst_143 {dimension_numbers = #tpu.dot_dimension_numbers<[1], [0], [0], [1], [0, 0, 1, 1], [], []>} : vector<8x224xf32>, vector<224x160xf32>, vector<8x160xf32> -> vector<8x160xf32>
    %138 = arith.addf %133, %137 : vector<8x160xf32>
    %c0_144 = arith.constant 0 : index
    %c0_145 = arith.constant 0 : index
    %139 = vector.load %arg7[%c0_144, %c0_145] : memref<1x160xf32, #tpu.memory_space<vmem>>, vector<1x160xf32>
    %140 = vector.broadcast %139 : vector<1x160xf32> to vector<8x160xf32>
    %141 = arith.addf %138, %140 : vector<8x160xf32>
    %cst_146 = arith.constant 0.000000e+00 : f32
    %142 = vector.broadcast %cst_146 : f32 to vector<8x160xf32>
    %143 = arith.maximumf %141, %142 : vector<8x160xf32>
    %c0_147 = arith.constant 0 : index
    %c160 = arith.constant 160 : index
    %144 = vector.load %arg24[%c0_147, %c160] : memref<8x800xf32, #tpu.memory_space<vmem>>, vector<8x160xf32>
    tpu.vector_store %arg24[%c0_147, %c160], %143 {strides = array<i32>} : memref<8x800xf32, #tpu.memory_space<vmem>>, vector<8x160xf32>,
    %c0_148 = arith.constant 0 : index
    %c448_149 = arith.constant 448 : index
    %145 = vector.load %arg23[%c0_148, %c448_149] : memref<8x1568xf32, #tpu.memory_space<vmem>>, vector<8x224xf32>
    %c0_150 = arith.constant 0 : index
    %c0_151 = arith.constant 0 : index
    %c0_152 = arith.constant 0 : index
    %146 = vector.load %arg3[%c0_150, %c0_151, %c0_152] : memref<3x224x160xf32, #tpu.memory_space<vmem>>, vector<1x224x160xf32>
    %147 = vector.shape_cast %146 : vector<1x224x160xf32> to vector<224x160xf32>
    %cst_153 = arith.constant dense<0.000000e+00> : vector<8x160xf32>
    %148 = tpu.matmul %145, %147, %cst_153 {dimension_numbers = #tpu.dot_dimension_numbers<[1], [0], [0], [1], [0, 0, 1, 1], [], []>} : vector<8x224xf32>, vector<224x160xf32>, vector<8x160xf32> -> vector<8x160xf32>
    %c0_154 = arith.constant 0 : index
    %c672_155 = arith.constant 672 : index
    %149 = vector.load %arg23[%c0_154, %c672_155] : memref<8x1568xf32, #tpu.memory_space<vmem>>, vector<8x224xf32>
    %c1_156 = arith.constant 1 : index
    %c0_157 = arith.constant 0 : index
    %c0_158 = arith.constant 0 : index
    %150 = vector.load %arg3[%c1_156, %c0_157, %c0_158] : memref<3x224x160xf32, #tpu.memory_space<vmem>>, vector<1x224x160xf32>
    %151 = vector.shape_cast %150 : vector<1x224x160xf32> to vector<224x160xf32>
    %cst_159 = arith.constant dense<0.000000e+00> : vector<8x160xf32>
    %152 = tpu.matmul %149, %151, %cst_159 {dimension_numbers = #tpu.dot_dimension_numbers<[1], [0], [0], [1], [0, 0, 1, 1], [], []>} : vector<8x224xf32>, vector<224x160xf32>, vector<8x160xf32> -> vector<8x160xf32>
    %153 = arith.addf %148, %152 : vector<8x160xf32>
    %c0_160 = arith.constant 0 : index
    %c896_161 = arith.constant 896 : index
    %154 = vector.load %arg23[%c0_160, %c896_161] : memref<8x1568xf32, #tpu.memory_space<vmem>>, vector<8x224xf32>
    %c2_162 = arith.constant 2 : index
    %c0_163 = arith.constant 0 : index
    %c0_164 = arith.constant 0 : index
    %155 = vector.load %arg3[%c2_162, %c0_163, %c0_164] : memref<3x224x160xf32, #tpu.memory_space<vmem>>, vector<1x224x160xf32>
    %156 = vector.shape_cast %155 : vector<1x224x160xf32> to vector<224x160xf32>
    %cst_165 = arith.constant dense<0.000000e+00> : vector<8x160xf32>
    %157 = tpu.matmul %154, %156, %cst_165 {dimension_numbers = #tpu.dot_dimension_numbers<[1], [0], [0], [1], [0, 0, 1, 1], [], []>} : vector<8x224xf32>, vector<224x160xf32>, vector<8x160xf32> -> vector<8x160xf32>
    %158 = arith.addf %153, %157 : vector<8x160xf32>
    %c0_166 = arith.constant 0 : index
    %c0_167 = arith.constant 0 : index
    %159 = vector.load %arg7[%c0_166, %c0_167] : memref<1x160xf32, #tpu.memory_space<vmem>>, vector<1x160xf32>
    %160 = vector.broadcast %159 : vector<1x160xf32> to vector<8x160xf32>
    %161 = arith.addf %158, %160 : vector<8x160xf32>
    %cst_168 = arith.constant 0.000000e+00 : f32
    %162 = vector.broadcast %cst_168 : f32 to vector<8x160xf32>
    %163 = arith.maximumf %161, %162 : vector<8x160xf32>
    %c0_169 = arith.constant 0 : index
    %c320 = arith.constant 320 : index
    %164 = vector.load %arg24[%c0_169, %c320] : memref<8x800xf32, #tpu.memory_space<vmem>>, vector<8x160xf32>
    tpu.vector_store %arg24[%c0_169, %c320], %163 {strides = array<i32>} : memref<8x800xf32, #tpu.memory_space<vmem>>, vector<8x160xf32>,
    %c0_170 = arith.constant 0 : index
    %c672_171 = arith.constant 672 : index
    %165 = vector.load %arg23[%c0_170, %c672_171] : memref<8x1568xf32, #tpu.memory_space<vmem>>, vector<8x224xf32>
    %c0_172 = arith.constant 0 : index
    %c0_173 = arith.constant 0 : index
    %c0_174 = arith.constant 0 : index
    %166 = vector.load %arg3[%c0_172, %c0_173, %c0_174] : memref<3x224x160xf32, #tpu.memory_space<vmem>>, vector<1x224x160xf32>
    %167 = vector.shape_cast %166 : vector<1x224x160xf32> to vector<224x160xf32>
    %cst_175 = arith.constant dense<0.000000e+00> : vector<8x160xf32>
    %168 = tpu.matmul %165, %167, %cst_175 {dimension_numbers = #tpu.dot_dimension_numbers<[1], [0], [0], [1], [0, 0, 1, 1], [], []>} : vector<8x224xf32>, vector<224x160xf32>, vector<8x160xf32> -> vector<8x160xf32>
    %c0_176 = arith.constant 0 : index
    %c896_177 = arith.constant 896 : index
    %169 = vector.load %arg23[%c0_176, %c896_177] : memref<8x1568xf32, #tpu.memory_space<vmem>>, vector<8x224xf32>
    %c1_178 = arith.constant 1 : index
    %c0_179 = arith.constant 0 : index
    %c0_180 = arith.constant 0 : index
    %170 = vector.load %arg3[%c1_178, %c0_179, %c0_180] : memref<3x224x160xf32, #tpu.memory_space<vmem>>, vector<1x224x160xf32>
    %171 = vector.shape_cast %170 : vector<1x224x160xf32> to vector<224x160xf32>
    %cst_181 = arith.constant dense<0.000000e+00> : vector<8x160xf32>
    %172 = tpu.matmul %169, %171, %cst_181 {dimension_numbers = #tpu.dot_dimension_numbers<[1], [0], [0], [1], [0, 0, 1, 1], [], []>} : vector<8x224xf32>, vector<224x160xf32>, vector<8x160xf32> -> vector<8x160xf32>
    %173 = arith.addf %168, %172 : vector<8x160xf32>
    %c0_182 = arith.constant 0 : index
    %c1120_183 = arith.constant 1120 : index
    %174 = vector.load %arg23[%c0_182, %c1120_183] : memref<8x1568xf32, #tpu.memory_space<vmem>>, vector<8x224xf32>
    %c2_184 = arith.constant 2 : index
    %c0_185 = arith.constant 0 : index
    %c0_186 = arith.constant 0 : index
    %175 = vector.load %arg3[%c2_184, %c0_185, %c0_186] : memref<3x224x160xf32, #tpu.memory_space<vmem>>, vector<1x224x160xf32>
    %176 = vector.shape_cast %175 : vector<1x224x160xf32> to vector<224x160xf32>
    %cst_187 = arith.constant dense<0.000000e+00> : vector<8x160xf32>
    %177 = tpu.matmul %174, %176, %cst_187 {dimension_numbers = #tpu.dot_dimension_numbers<[1], [0], [0], [1], [0, 0, 1, 1], [], []>} : vector<8x224xf32>, vector<224x160xf32>, vector<8x160xf32> -> vector<8x160xf32>
    %178 = arith.addf %173, %177 : vector<8x160xf32>
    %c0_188 = arith.constant 0 : index
    %c0_189 = arith.constant 0 : index
    %179 = vector.load %arg7[%c0_188, %c0_189] : memref<1x160xf32, #tpu.memory_space<vmem>>, vector<1x160xf32>
    %180 = vector.broadcast %179 : vector<1x160xf32> to vector<8x160xf32>
    %181 = arith.addf %178, %180 : vector<8x160xf32>
    %cst_190 = arith.constant 0.000000e+00 : f32
    %182 = vector.broadcast %cst_190 : f32 to vector<8x160xf32>
    %183 = arith.maximumf %181, %182 : vector<8x160xf32>
    %c0_191 = arith.constant 0 : index
    %c480 = arith.constant 480 : index
    %184 = vector.load %arg24[%c0_191, %c480] : memref<8x800xf32, #tpu.memory_space<vmem>>, vector<8x160xf32>
    tpu.vector_store %arg24[%c0_191, %c480], %183 {strides = array<i32>} : memref<8x800xf32, #tpu.memory_space<vmem>>, vector<8x160xf32>,
    %c0_192 = arith.constant 0 : index
    %c896_193 = arith.constant 896 : index
    %185 = vector.load %arg23[%c0_192, %c896_193] : memref<8x1568xf32, #tpu.memory_space<vmem>>, vector<8x224xf32>
    %c0_194 = arith.constant 0 : index
    %c0_195 = arith.constant 0 : index
    %c0_196 = arith.constant 0 : index
    %186 = vector.load %arg3[%c0_194, %c0_195, %c0_196] : memref<3x224x160xf32, #tpu.memory_space<vmem>>, vector<1x224x160xf32>
    %187 = vector.shape_cast %186 : vector<1x224x160xf32> to vector<224x160xf32>
    %cst_197 = arith.constant dense<0.000000e+00> : vector<8x160xf32>
    %188 = tpu.matmul %185, %187, %cst_197 {dimension_numbers = #tpu.dot_dimension_numbers<[1], [0], [0], [1], [0, 0, 1, 1], [], []>} : vector<8x224xf32>, vector<224x160xf32>, vector<8x160xf32> -> vector<8x160xf32>
    %c0_198 = arith.constant 0 : index
    %c1120_199 = arith.constant 1120 : index
    %189 = vector.load %arg23[%c0_198, %c1120_199] : memref<8x1568xf32, #tpu.memory_space<vmem>>, vector<8x224xf32>
    %c1_200 = arith.constant 1 : index
    %c0_201 = arith.constant 0 : index
    %c0_202 = arith.constant 0 : index
    %190 = vector.load %arg3[%c1_200, %c0_201, %c0_202] : memref<3x224x160xf32, #tpu.memory_space<vmem>>, vector<1x224x160xf32>
    %191 = vector.shape_cast %190 : vector<1x224x160xf32> to vector<224x160xf32>
    %cst_203 = arith.constant dense<0.000000e+00> : vector<8x160xf32>
    %192 = tpu.matmul %189, %191, %cst_203 {dimension_numbers = #tpu.dot_dimension_numbers<[1], [0], [0], [1], [0, 0, 1, 1], [], []>} : vector<8x224xf32>, vector<224x160xf32>, vector<8x160xf32> -> vector<8x160xf32>
    %193 = arith.addf %188, %192 : vector<8x160xf32>
    %c0_204 = arith.constant 0 : index
    %c1344_205 = arith.constant 1344 : index
    %194 = vector.load %arg23[%c0_204, %c1344_205] : memref<8x1568xf32, #tpu.memory_space<vmem>>, vector<8x224xf32>
    %c2_206 = arith.constant 2 : index
    %c0_207 = arith.constant 0 : index
    %c0_208 = arith.constant 0 : index
    %195 = vector.load %arg3[%c2_206, %c0_207, %c0_208] : memref<3x224x160xf32, #tpu.memory_space<vmem>>, vector<1x224x160xf32>
    %196 = vector.shape_cast %195 : vector<1x224x160xf32> to vector<224x160xf32>
    %cst_209 = arith.constant dense<0.000000e+00> : vector<8x160xf32>
    %197 = tpu.matmul %194, %196, %cst_209 {dimension_numbers = #tpu.dot_dimension_numbers<[1], [0], [0], [1], [0, 0, 1, 1], [], []>} : vector<8x224xf32>, vector<224x160xf32>, vector<8x160xf32> -> vector<8x160xf32>
    %198 = arith.addf %193, %197 : vector<8x160xf32>
    %c0_210 = arith.constant 0 : index
    %c0_211 = arith.constant 0 : index
    %199 = vector.load %arg7[%c0_210, %c0_211] : memref<1x160xf32, #tpu.memory_space<vmem>>, vector<1x160xf32>
    %200 = vector.broadcast %199 : vector<1x160xf32> to vector<8x160xf32>
    %201 = arith.addf %198, %200 : vector<8x160xf32>
    %cst_212 = arith.constant 0.000000e+00 : f32
    %202 = vector.broadcast %cst_212 : f32 to vector<8x160xf32>
    %203 = arith.maximumf %201, %202 : vector<8x160xf32>
    %c0_213 = arith.constant 0 : index
    %c640_214 = arith.constant 640 : index
    %204 = vector.load %arg24[%c0_213, %c640_214] : memref<8x800xf32, #tpu.memory_space<vmem>>, vector<8x160xf32>
    tpu.vector_store %arg24[%c0_213, %c640_214], %203 {strides = array<i32>} : memref<8x800xf32, #tpu.memory_space<vmem>>, vector<8x160xf32>,
    %c0_215 = arith.constant 0 : index
    %c0_216 = arith.constant 0 : index
    %205 = vector.load %arg24[%c0_215, %c0_216] : memref<8x800xf32, #tpu.memory_space<vmem>>, vector<8x160xf32>
    %c0_217 = arith.constant 0 : index
    %c0_218 = arith.constant 0 : index
    %c0_219 = arith.constant 0 : index
    %206 = vector.load %arg4[%c0_217, %c0_218, %c0_219] : memref<3x160x96xf32, #tpu.memory_space<vmem>>, vector<1x160x96xf32>
    %207 = vector.shape_cast %206 : vector<1x160x96xf32> to vector<160x96xf32>
    %cst_220 = arith.constant dense<0.000000e+00> : vector<8x96xf32>
    %208 = tpu.matmul %205, %207, %cst_220 {dimension_numbers = #tpu.dot_dimension_numbers<[1], [0], [0], [1], [0, 0, 1, 1], [], []>} : vector<8x160xf32>, vector<160x96xf32>, vector<8x96xf32> -> vector<8x96xf32>
    %c0_221 = arith.constant 0 : index
    %c160_222 = arith.constant 160 : index
    %209 = vector.load %arg24[%c0_221, %c160_222] : memref<8x800xf32, #tpu.memory_space<vmem>>, vector<8x160xf32>
    %c1_223 = arith.constant 1 : index
    %c0_224 = arith.constant 0 : index
    %c0_225 = arith.constant 0 : index
    %210 = vector.load %arg4[%c1_223, %c0_224, %c0_225] : memref<3x160x96xf32, #tpu.memory_space<vmem>>, vector<1x160x96xf32>
    %211 = vector.shape_cast %210 : vector<1x160x96xf32> to vector<160x96xf32>
    %cst_226 = arith.constant dense<0.000000e+00> : vector<8x96xf32>
    %212 = tpu.matmul %209, %211, %cst_226 {dimension_numbers = #tpu.dot_dimension_numbers<[1], [0], [0], [1], [0, 0, 1, 1], [], []>} : vector<8x160xf32>, vector<160x96xf32>, vector<8x96xf32> -> vector<8x96xf32>
    %213 = arith.addf %208, %212 : vector<8x96xf32>
    %c0_227 = arith.constant 0 : index
    %c320_228 = arith.constant 320 : index
    %214 = vector.load %arg24[%c0_227, %c320_228] : memref<8x800xf32, #tpu.memory_space<vmem>>, vector<8x160xf32>
    %c2_229 = arith.constant 2 : index
    %c0_230 = arith.constant 0 : index
    %c0_231 = arith.constant 0 : index
    %215 = vector.load %arg4[%c2_229, %c0_230, %c0_231] : memref<3x160x96xf32, #tpu.memory_space<vmem>>, vector<1x160x96xf32>
    %216 = vector.shape_cast %215 : vector<1x160x96xf32> to vector<160x96xf32>
    %cst_232 = arith.constant dense<0.000000e+00> : vector<8x96xf32>
    %217 = tpu.matmul %214, %216, %cst_232 {dimension_numbers = #tpu.dot_dimension_numbers<[1], [0], [0], [1], [0, 0, 1, 1], [], []>} : vector<8x160xf32>, vector<160x96xf32>, vector<8x96xf32> -> vector<8x96xf32>
    %218 = arith.addf %213, %217 : vector<8x96xf32>
    %c0_233 = arith.constant 0 : index
    %c0_234 = arith.constant 0 : index
    %219 = vector.load %arg8[%c0_233, %c0_234] : memref<1x96xf32, #tpu.memory_space<vmem>>, vector<1x96xf32>
    %220 = vector.broadcast %219 : vector<1x96xf32> to vector<8x96xf32>
    %221 = arith.addf %218, %220 : vector<8x96xf32>
    %cst_235 = arith.constant 0.000000e+00 : f32
    %222 = vector.broadcast %cst_235 : f32 to vector<8x96xf32>
    %223 = arith.maximumf %221, %222 : vector<8x96xf32>
    %c0_236 = arith.constant 0 : index
    %c0_237 = arith.constant 0 : index
    %224 = vector.load %arg25[%c0_236, %c0_237] : memref<8x288xf32, #tpu.memory_space<vmem>>, vector<8x96xf32>
    tpu.vector_store %arg25[%c0_236, %c0_237], %223 {strides = array<i32>} : memref<8x288xf32, #tpu.memory_space<vmem>>, vector<8x96xf32>,
    %c0_238 = arith.constant 0 : index
    %c160_239 = arith.constant 160 : index
    %225 = vector.load %arg24[%c0_238, %c160_239] : memref<8x800xf32, #tpu.memory_space<vmem>>, vector<8x160xf32>
    %c0_240 = arith.constant 0 : index
    %c0_241 = arith.constant 0 : index
    %c0_242 = arith.constant 0 : index
    %226 = vector.load %arg4[%c0_240, %c0_241, %c0_242] : memref<3x160x96xf32, #tpu.memory_space<vmem>>, vector<1x160x96xf32>
    %227 = vector.shape_cast %226 : vector<1x160x96xf32> to vector<160x96xf32>
    %cst_243 = arith.constant dense<0.000000e+00> : vector<8x96xf32>
    %228 = tpu.matmul %225, %227, %cst_243 {dimension_numbers = #tpu.dot_dimension_numbers<[1], [0], [0], [1], [0, 0, 1, 1], [], []>} : vector<8x160xf32>, vector<160x96xf32>, vector<8x96xf32> -> vector<8x96xf32>
    %c0_244 = arith.constant 0 : index
    %c320_245 = arith.constant 320 : index
    %229 = vector.load %arg24[%c0_244, %c320_245] : memref<8x800xf32, #tpu.memory_space<vmem>>, vector<8x160xf32>
    %c1_246 = arith.constant 1 : index
    %c0_247 = arith.constant 0 : index
    %c0_248 = arith.constant 0 : index
    %230 = vector.load %arg4[%c1_246, %c0_247, %c0_248] : memref<3x160x96xf32, #tpu.memory_space<vmem>>, vector<1x160x96xf32>
    %231 = vector.shape_cast %230 : vector<1x160x96xf32> to vector<160x96xf32>
    %cst_249 = arith.constant dense<0.000000e+00> : vector<8x96xf32>
    %232 = tpu.matmul %229, %231, %cst_249 {dimension_numbers = #tpu.dot_dimension_numbers<[1], [0], [0], [1], [0, 0, 1, 1], [], []>} : vector<8x160xf32>, vector<160x96xf32>, vector<8x96xf32> -> vector<8x96xf32>
    %233 = arith.addf %228, %232 : vector<8x96xf32>
    %c0_250 = arith.constant 0 : index
    %c480_251 = arith.constant 480 : index
    %234 = vector.load %arg24[%c0_250, %c480_251] : memref<8x800xf32, #tpu.memory_space<vmem>>, vector<8x160xf32>
    %c2_252 = arith.constant 2 : index
    %c0_253 = arith.constant 0 : index
    %c0_254 = arith.constant 0 : index
    %235 = vector.load %arg4[%c2_252, %c0_253, %c0_254] : memref<3x160x96xf32, #tpu.memory_space<vmem>>, vector<1x160x96xf32>
    %236 = vector.shape_cast %235 : vector<1x160x96xf32> to vector<160x96xf32>
    %cst_255 = arith.constant dense<0.000000e+00> : vector<8x96xf32>
    %237 = tpu.matmul %234, %236, %cst_255 {dimension_numbers = #tpu.dot_dimension_numbers<[1], [0], [0], [1], [0, 0, 1, 1], [], []>} : vector<8x160xf32>, vector<160x96xf32>, vector<8x96xf32> -> vector<8x96xf32>
    %238 = arith.addf %233, %237 : vector<8x96xf32>
    %c0_256 = arith.constant 0 : index
    %c0_257 = arith.constant 0 : index
    %239 = vector.load %arg8[%c0_256, %c0_257] : memref<1x96xf32, #tpu.memory_space<vmem>>, vector<1x96xf32>
    %240 = vector.broadcast %239 : vector<1x96xf32> to vector<8x96xf32>
    %241 = arith.addf %238, %240 : vector<8x96xf32>
    %cst_258 = arith.constant 0.000000e+00 : f32
    %242 = vector.broadcast %cst_258 : f32 to vector<8x96xf32>
    %243 = arith.maximumf %241, %242 : vector<8x96xf32>
    %c0_259 = arith.constant 0 : index
    %c96 = arith.constant 96 : index
    %244 = vector.load %arg25[%c0_259, %c96] : memref<8x288xf32, #tpu.memory_space<vmem>>, vector<8x96xf32>
    tpu.vector_store %arg25[%c0_259, %c96], %243 {strides = array<i32>} : memref<8x288xf32, #tpu.memory_space<vmem>>, vector<8x96xf32>,
    %c0_260 = arith.constant 0 : index
    %c320_261 = arith.constant 320 : index
    %245 = vector.load %arg24[%c0_260, %c320_261] : memref<8x800xf32, #tpu.memory_space<vmem>>, vector<8x160xf32>
    %c0_262 = arith.constant 0 : index
    %c0_263 = arith.constant 0 : index
    %c0_264 = arith.constant 0 : index
    %246 = vector.load %arg4[%c0_262, %c0_263, %c0_264] : memref<3x160x96xf32, #tpu.memory_space<vmem>>, vector<1x160x96xf32>
    %247 = vector.shape_cast %246 : vector<1x160x96xf32> to vector<160x96xf32>
    %cst_265 = arith.constant dense<0.000000e+00> : vector<8x96xf32>
    %248 = tpu.matmul %245, %247, %cst_265 {dimension_numbers = #tpu.dot_dimension_numbers<[1], [0], [0], [1], [0, 0, 1, 1], [], []>} : vector<8x160xf32>, vector<160x96xf32>, vector<8x96xf32> -> vector<8x96xf32>
    %c0_266 = arith.constant 0 : index
    %c480_267 = arith.constant 480 : index
    %249 = vector.load %arg24[%c0_266, %c480_267] : memref<8x800xf32, #tpu.memory_space<vmem>>, vector<8x160xf32>
    %c1_268 = arith.constant 1 : index
    %c0_269 = arith.constant 0 : index
    %c0_270 = arith.constant 0 : index
    %250 = vector.load %arg4[%c1_268, %c0_269, %c0_270] : memref<3x160x96xf32, #tpu.memory_space<vmem>>, vector<1x160x96xf32>
    %251 = vector.shape_cast %250 : vector<1x160x96xf32> to vector<160x96xf32>
    %cst_271 = arith.constant dense<0.000000e+00> : vector<8x96xf32>
    %252 = tpu.matmul %249, %251, %cst_271 {dimension_numbers = #tpu.dot_dimension_numbers<[1], [0], [0], [1], [0, 0, 1, 1], [], []>} : vector<8x160xf32>, vector<160x96xf32>, vector<8x96xf32> -> vector<8x96xf32>
    %253 = arith.addf %248, %252 : vector<8x96xf32>
    %c0_272 = arith.constant 0 : index
    %c640_273 = arith.constant 640 : index
    %254 = vector.load %arg24[%c0_272, %c640_273] : memref<8x800xf32, #tpu.memory_space<vmem>>, vector<8x160xf32>
    %c2_274 = arith.constant 2 : index
    %c0_275 = arith.constant 0 : index
    %c0_276 = arith.constant 0 : index
    %255 = vector.load %arg4[%c2_274, %c0_275, %c0_276] : memref<3x160x96xf32, #tpu.memory_space<vmem>>, vector<1x160x96xf32>
    %256 = vector.shape_cast %255 : vector<1x160x96xf32> to vector<160x96xf32>
    %cst_277 = arith.constant dense<0.000000e+00> : vector<8x96xf32>
    %257 = tpu.matmul %254, %256, %cst_277 {dimension_numbers = #tpu.dot_dimension_numbers<[1], [0], [0], [1], [0, 0, 1, 1], [], []>} : vector<8x160xf32>, vector<160x96xf32>, vector<8x96xf32> -> vector<8x96xf32>
    %258 = arith.addf %253, %257 : vector<8x96xf32>
    %c0_278 = arith.constant 0 : index
    %c0_279 = arith.constant 0 : index
    %259 = vector.load %arg8[%c0_278, %c0_279] : memref<1x96xf32, #tpu.memory_space<vmem>>, vector<1x96xf32>
    %260 = vector.broadcast %259 : vector<1x96xf32> to vector<8x96xf32>
    %261 = arith.addf %258, %260 : vector<8x96xf32>
    %cst_280 = arith.constant 0.000000e+00 : f32
    %262 = vector.broadcast %cst_280 : f32 to vector<8x96xf32>
    %263 = arith.maximumf %261, %262 : vector<8x96xf32>
    %c0_281 = arith.constant 0 : index
    %c192 = arith.constant 192 : index
    %264 = vector.load %arg25[%c0_281, %c192] : memref<8x288xf32, #tpu.memory_space<vmem>>, vector<8x96xf32>
    tpu.vector_store %arg25[%c0_281, %c192], %263 {strides = array<i32>} : memref<8x288xf32, #tpu.memory_space<vmem>>, vector<8x96xf32>,
    %c0_282 = arith.constant 0 : index
    %c0_283 = arith.constant 0 : index
    %265 = vector.load %arg25[%c0_282, %c0_283] : memref<8x288xf32, #tpu.memory_space<vmem>>, vector<8x96xf32>
    %c0_284 = arith.constant 0 : index
    %c0_285 = arith.constant 0 : index
    %c0_286 = arith.constant 0 : index
    %266 = vector.load %arg5[%c0_284, %c0_285, %c0_286] : memref<3x96x32xf32, #tpu.memory_space<vmem>>, vector<1x96x32xf32>
    %267 = vector.shape_cast %266 : vector<1x96x32xf32> to vector<96x32xf32>
    %cst_287 = arith.constant dense<0.000000e+00> : vector<8x32xf32>
    %268 = tpu.matmul %265, %267, %cst_287 {dimension_numbers = #tpu.dot_dimension_numbers<[1], [0], [0], [1], [0, 0, 1, 1], [], []>} : vector<8x96xf32>, vector<96x32xf32>, vector<8x32xf32> -> vector<8x32xf32>
    %c0_288 = arith.constant 0 : index
    %c96_289 = arith.constant 96 : index
    %269 = vector.load %arg25[%c0_288, %c96_289] : memref<8x288xf32, #tpu.memory_space<vmem>>, vector<8x96xf32>
    %c1_290 = arith.constant 1 : index
    %c0_291 = arith.constant 0 : index
    %c0_292 = arith.constant 0 : index
    %270 = vector.load %arg5[%c1_290, %c0_291, %c0_292] : memref<3x96x32xf32, #tpu.memory_space<vmem>>, vector<1x96x32xf32>
    %271 = vector.shape_cast %270 : vector<1x96x32xf32> to vector<96x32xf32>
    %cst_293 = arith.constant dense<0.000000e+00> : vector<8x32xf32>
    %272 = tpu.matmul %269, %271, %cst_293 {dimension_numbers = #tpu.dot_dimension_numbers<[1], [0], [0], [1], [0, 0, 1, 1], [], []>} : vector<8x96xf32>, vector<96x32xf32>, vector<8x32xf32> -> vector<8x32xf32>
    %273 = arith.addf %268, %272 : vector<8x32xf32>
    %c0_294 = arith.constant 0 : index
    %c192_295 = arith.constant 192 : index
    %274 = vector.load %arg25[%c0_294, %c192_295] : memref<8x288xf32, #tpu.memory_space<vmem>>, vector<8x96xf32>
    %c2_296 = arith.constant 2 : index
    %c0_297 = arith.constant 0 : index
    %c0_298 = arith.constant 0 : index
    %275 = vector.load %arg5[%c2_296, %c0_297, %c0_298] : memref<3x96x32xf32, #tpu.memory_space<vmem>>, vector<1x96x32xf32>
    %276 = vector.shape_cast %275 : vector<1x96x32xf32> to vector<96x32xf32>
    %cst_299 = arith.constant dense<0.000000e+00> : vector<8x32xf32>
    %277 = tpu.matmul %274, %276, %cst_299 {dimension_numbers = #tpu.dot_dimension_numbers<[1], [0], [0], [1], [0, 0, 1, 1], [], []>} : vector<8x96xf32>, vector<96x32xf32>, vector<8x32xf32> -> vector<8x32xf32>
    %278 = arith.addf %273, %277 : vector<8x32xf32>
    %c0_300 = arith.constant 0 : index
    %c0_301 = arith.constant 0 : index
    %279 = vector.load %arg9[%c0_300, %c0_301] : memref<1x32xf32, #tpu.memory_space<vmem>>, vector<1x32xf32>
    %280 = vector.broadcast %279 : vector<1x32xf32> to vector<8x32xf32>
    %281 = arith.addf %278, %280 : vector<8x32xf32>
    %cst_302 = arith.constant 0.000000e+00 : f32
    %282 = vector.broadcast %cst_302 : f32 to vector<8x32xf32>
    %283 = arith.maximumf %281, %282 : vector<8x32xf32>
    %c0_303 = arith.constant 0 : index
    %c0_304 = arith.constant 0 : index
    %284 = vector.load %arg26[%c0_303, %c0_304] : memref<8x32xf32, #tpu.memory_space<vmem>>, vector<8x32xf32>
    tpu.vector_store %arg26[%c0_303, %c0_304], %283 {strides = array<i32>} : memref<8x32xf32, #tpu.memory_space<vmem>>, vector<8x32xf32>,
    %c0_305 = arith.constant 0 : index
    %c0_306 = arith.constant 0 : index
    %285 = vector.load %arg26[%c0_305, %c0_306] : memref<8x32xf32, #tpu.memory_space<vmem>>, vector<8x32xf32>
    %c0_307 = arith.constant 0 : index
    %c0_308 = arith.constant 0 : index
    %286 = vector.load %arg10[%c0_307, %c0_308] : memref<32x50xf32, #tpu.memory_space<vmem>>, vector<32x50xf32>
    %cst_309 = arith.constant dense<0.000000e+00> : vector<8x50xf32>
    %287 = tpu.matmul %285, %286, %cst_309 {dimension_numbers = #tpu.dot_dimension_numbers<[1], [0], [0], [1], [0, 0, 1, 1], [], []>} : vector<8x32xf32>, vector<32x50xf32>, vector<8x50xf32> -> vector<8x50xf32>
    %c0_310 = arith.constant 0 : index
    %c0_311 = arith.constant 0 : index
    %288 = vector.load %arg11[%c0_310, %c0_311] : memref<1x50xf32, #tpu.memory_space<vmem>>, vector<1x50xf32>
    %289 = vector.broadcast %288 : vector<1x50xf32> to vector<8x50xf32>
    %290 = arith.addf %287, %289 : vector<8x50xf32>
    %cst_312 = arith.constant dense<0.000000e+00> : vector<8xf32>
    %291 = vector.multi_reduction <add>, %290, %cst_312 [1] : vector<8x50xf32> to vector<8xf32>
    %292 = vector.shape_cast %291 : vector<8xf32> to vector<8x1xf32>
    %cst_313 = arith.constant 5.000000e+01 : f32
    %293 = vector.broadcast %cst_313 : f32 to vector<8x1xf32>
    %294 = arith.divf %292, %293 : vector<8x1xf32>
    %295 = vector.broadcast %294 : vector<8x1xf32> to vector<8x50xf32>
    %296 = arith.subf %290, %295 : vector<8x50xf32>
    %297 = arith.mulf %296, %296 : vector<8x50xf32>
    %cst_314 = arith.constant dense<0.000000e+00> : vector<8xf32>
    %298 = vector.multi_reduction <add>, %297, %cst_314 [1] : vector<8x50xf32> to vector<8xf32>
    %299 = vector.shape_cast %298 : vector<8xf32> to vector<8x1xf32>
    %cst_315 = arith.constant 5.000000e+01 : f32
    %300 = vector.broadcast %cst_315 : f32 to vector<8x1xf32>
    %301 = arith.divf %299, %300 : vector<8x1xf32>
    %302 = vector.broadcast %294 : vector<8x1xf32> to vector<8x50xf32>
    %303 = arith.subf %290, %302 : vector<8x50xf32>
    %cst_316 = arith.constant 9.99999974E-6 : f32
    %304 = vector.broadcast %cst_316 : f32 to vector<8x1xf32>
    %305 = arith.addf %301, %304 : vector<8x1xf32>
    %306 = math.rsqrt %305 : vector<8x1xf32>
    %307 = vector.broadcast %306 : vector<8x1xf32> to vector<8x50xf32>
    %308 = arith.mulf %303, %307 : vector<8x50xf32>
    %c0_317 = arith.constant 0 : index
    %c0_318 = arith.constant 0 : index
    %309 = vector.load %arg12[%c0_317, %c0_318] : memref<1x50xf32, #tpu.memory_space<vmem>>, vector<1x50xf32>
    %310 = vector.broadcast %309 : vector<1x50xf32> to vector<8x50xf32>
    %311 = arith.mulf %308, %310 : vector<8x50xf32>
    %c0_319 = arith.constant 0 : index
    %c0_320 = arith.constant 0 : index
    %312 = vector.load %arg13[%c0_319, %c0_320] : memref<1x50xf32, #tpu.memory_space<vmem>>, vector<1x50xf32>
    %313 = vector.broadcast %312 : vector<1x50xf32> to vector<8x50xf32>
    %314 = arith.addf %311, %313 : vector<8x50xf32>
    %315 = math.tanh %314 : vector<8x50xf32>
    %c0_321 = arith.constant 0 : index
    %c0_322 = arith.constant 0 : index
    %316 = vector.load %arg14[%c0_321, %c0_322] : memref<8x6xf32, #tpu.memory_space<vmem>>, vector<8x6xf32>
    %c0_323 = arith.constant 0 : index
    %c0_324 = arith.constant 0 : index
    %317 = vector.load %arg15[%c0_323, %c0_324] : memref<50x64xf32, #tpu.memory_space<vmem>>, vector<50x64xf32>
    %cst_325 = arith.constant dense<0.000000e+00> : vector<8x64xf32>
    %318 = tpu.matmul %315, %317, %cst_325 {dimension_numbers = #tpu.dot_dimension_numbers<[1], [0], [0], [1], [0, 0, 1, 1], [], []>} : vector<8x50xf32>, vector<50x64xf32>, vector<8x64xf32> -> vector<8x64xf32>
    %c0_326 = arith.constant 0 : index
    %c0_327 = arith.constant 0 : index
    %319 = vector.load %arg16[%c0_326, %c0_327] : memref<6x64xf32, #tpu.memory_space<vmem>>, vector<6x64xf32>
    %cst_328 = arith.constant dense<0.000000e+00> : vector<8x64xf32>
    %320 = tpu.matmul %316, %319, %cst_328 {dimension_numbers = #tpu.dot_dimension_numbers<[1], [0], [0], [1], [0, 0, 1, 1], [], []>} : vector<8x6xf32>, vector<6x64xf32>, vector<8x64xf32> -> vector<8x64xf32>
    %321 = arith.addf %318, %320 : vector<8x64xf32>
    %c0_329 = arith.constant 0 : index
    %c0_330 = arith.constant 0 : index
    %322 = vector.load %arg17[%c0_329, %c0_330] : memref<1x64xf32, #tpu.memory_space<vmem>>, vector<1x64xf32>
    %323 = vector.broadcast %322 : vector<1x64xf32> to vector<8x64xf32>
    %324 = arith.addf %321, %323 : vector<8x64xf32>
    %cst_331 = arith.constant 0.000000e+00 : f32
    %325 = vector.broadcast %cst_331 : f32 to vector<8x64xf32>
    %326 = arith.maximumf %324, %325 : vector<8x64xf32>
    %c0_332 = arith.constant 0 : index
    %c0_333 = arith.constant 0 : index
    %327 = vector.load %arg18[%c0_332, %c0_333] : memref<64x64xf32, #tpu.memory_space<vmem>>, vector<64x64xf32>
    %cst_334 = arith.constant dense<0.000000e+00> : vector<8x64xf32>
    %328 = tpu.matmul %326, %327, %cst_334 {dimension_numbers = #tpu.dot_dimension_numbers<[1], [0], [0], [1], [0, 0, 1, 1], [], []>} : vector<8x64xf32>, vector<64x64xf32>, vector<8x64xf32> -> vector<8x64xf32>
    %c0_335 = arith.constant 0 : index
    %c0_336 = arith.constant 0 : index
    %329 = vector.load %arg19[%c0_335, %c0_336] : memref<1x64xf32, #tpu.memory_space<vmem>>, vector<1x64xf32>
    %330 = vector.broadcast %329 : vector<1x64xf32> to vector<8x64xf32>
    %331 = arith.addf %328, %330 : vector<8x64xf32>
    %cst_337 = arith.constant 0.000000e+00 : f32
    %332 = vector.broadcast %cst_337 : f32 to vector<8x64xf32>
    %333 = arith.maximumf %331, %332 : vector<8x64xf32>
    %c0_338 = arith.constant 0 : index
    %c0_339 = arith.constant 0 : index
    %334 = vector.load %arg20[%c0_338, %c0_339] : memref<64x2xf32, #tpu.memory_space<vmem>>, vector<64x2xf32>
    %cst_340 = arith.constant dense<0.000000e+00> : vector<8x2xf32>
    %335 = tpu.matmul %333, %334, %cst_340 {dimension_numbers = #tpu.dot_dimension_numbers<[1], [0], [0], [1], [0, 0, 1, 1], [], []>} : vector<8x64xf32>, vector<64x2xf32>, vector<8x2xf32> -> vector<8x2xf32>
    %c0_341 = arith.constant 0 : index
    %c0_342 = arith.constant 0 : index
    %336 = vector.load %arg21[%c0_341, %c0_342] : memref<1x2xf32, #tpu.memory_space<vmem>>, vector<1x2xf32>
    %337 = vector.broadcast %336 : vector<1x2xf32> to vector<8x2xf32>
    %338 = arith.addf %335, %337 : vector<8x2xf32>
    %c0_343 = arith.constant 0 : index
    %c0_344 = arith.constant 0 : index
    %339 = vector.load %arg22[%c0_343, %c0_344] : memref<8x2xf32, #tpu.memory_space<vmem>>, vector<8x2xf32>
    tpu.vector_store %arg22[%c0_343, %c0_344], %338 {strides = array<i32>} : memref<8x2xf32, #tpu.memory_space<vmem>>, vector<8x2xf32>,
    return
  }
  func.func @transform_0(%arg0: i32) -> (i32, i32) {
    %c0_i32 = arith.constant 0 : i32
    %c0_i32_0 = arith.constant 0 : i32
    return %arg0, %c0_i32 : i32, i32
  }
  func.func @transform_1(%arg0: i32) -> (i32, i32, i32) {
    %c0_i32 = arith.constant 0 : i32
    %c0_i32_0 = arith.constant 0 : i32
    %c0_i32_1 = arith.constant 0 : i32
    %c0_i32_2 = arith.constant 0 : i32
    return %c0_i32, %c0_i32_0, %c0_i32_1 : i32, i32, i32
  }
  func.func @transform_2(%arg0: i32) -> (i32, i32, i32) {
    %c0_i32 = arith.constant 0 : i32
    %c0_i32_0 = arith.constant 0 : i32
    %c0_i32_1 = arith.constant 0 : i32
    %c0_i32_2 = arith.constant 0 : i32
    return %c0_i32, %c0_i32_0, %c0_i32_1 : i32, i32, i32
  }
  func.func @transform_3(%arg0: i32) -> (i32, i32, i32) {
    %c0_i32 = arith.constant 0 : i32
    %c0_i32_0 = arith.constant 0 : i32
    %c0_i32_1 = arith.constant 0 : i32
    %c0_i32_2 = arith.constant 0 : i32
    return %c0_i32, %c0_i32_0, %c0_i32_1 : i32, i32, i32
  }
  func.func @transform_4(%arg0: i32) -> (i32, i32, i32) {
    %c0_i32 = arith.constant 0 : i32
    %c0_i32_0 = arith.constant 0 : i32
    %c0_i32_1 = arith.constant 0 : i32
    %c0_i32_2 = arith.constant 0 : i32
    return %c0_i32, %c0_i32_0, %c0_i32_1 : i32, i32, i32
  }
  func.func @transform_5(%arg0: i32) -> (i32, i32) {
    %c0_i32 = arith.constant 0 : i32
    %c0_i32_0 = arith.constant 0 : i32
    %c0_i32_1 = arith.constant 0 : i32
    return %c0_i32, %c0_i32_0 : i32, i32
  }
  func.func @transform_6(%arg0: i32) -> (i32, i32) {
    %c0_i32 = arith.constant 0 : i32
    %c0_i32_0 = arith.constant 0 : i32
    %c0_i32_1 = arith.constant 0 : i32
    return %c0_i32, %c0_i32_0 : i32, i32
  }
  func.func @transform_7(%arg0: i32) -> (i32, i32) {
    %c0_i32 = arith.constant 0 : i32
    %c0_i32_0 = arith.constant 0 : i32
    %c0_i32_1 = arith.constant 0 : i32
    return %c0_i32, %c0_i32_0 : i32, i32
  }
  func.func @transform_8(%arg0: i32) -> (i32, i32) {
    %c0_i32 = arith.constant 0 : i32
    %c0_i32_0 = arith.constant 0 : i32
    %c0_i32_1 = arith.constant 0 : i32
    return %c0_i32, %c0_i32_0 : i32, i32
  }
  func.func @transform_9(%arg0: i32) -> (i32, i32) {
    %c0_i32 = arith.constant 0 : i32
    %c0_i32_0 = arith.constant 0 : i32
    %c0_i32_1 = arith.constant 0 : i32
    return %c0_i32, %c0_i32_0 : i32, i32
  }
  func.func @transform_10(%arg0: i32) -> (i32, i32) {
    %c0_i32 = arith.constant 0 : i32
    %c0_i32_0 = arith.constant 0 : i32
    %c0_i32_1 = arith.constant 0 : i32
    return %c0_i32, %c0_i32_0 : i32, i32
  }
  func.func @transform_11(%arg0: i32) -> (i32, i32) {
    %c0_i32 = arith.constant 0 : i32
    %c0_i32_0 = arith.constant 0 : i32
    %c0_i32_1 = arith.constant 0 : i32
    return %c0_i32, %c0_i32_0 : i32, i32
  }
  func.func @transform_12(%arg0: i32) -> (i32, i32) {
    %c0_i32 = arith.constant 0 : i32
    %c0_i32_0 = arith.constant 0 : i32
    %c0_i32_1 = arith.constant 0 : i32
    return %c0_i32, %c0_i32_0 : i32, i32
  }
  func.func @transform_13(%arg0: i32) -> (i32, i32) {
    %c0_i32 = arith.constant 0 : i32
    %c0_i32_0 = arith.constant 0 : i32
    return %arg0, %c0_i32 : i32, i32
  }
  func.func @transform_14(%arg0: i32) -> (i32, i32) {
    %c0_i32 = arith.constant 0 : i32
    %c0_i32_0 = arith.constant 0 : i32
    %c0_i32_1 = arith.constant 0 : i32
    return %c0_i32, %c0_i32_0 : i32, i32
  }
  func.func @transform_15(%arg0: i32) -> (i32, i32) {
    %c0_i32 = arith.constant 0 : i32
    %c0_i32_0 = arith.constant 0 : i32
    %c0_i32_1 = arith.constant 0 : i32
    return %c0_i32, %c0_i32_0 : i32, i32
  }
  func.func @transform_16(%arg0: i32) -> (i32, i32) {
    %c0_i32 = arith.constant 0 : i32
    %c0_i32_0 = arith.constant 0 : i32
    %c0_i32_1 = arith.constant 0 : i32
    return %c0_i32, %c0_i32_0 : i32, i32
  }
  func.func @transform_17(%arg0: i32) -> (i32, i32) {
    %c0_i32 = arith.constant 0 : i32
    %c0_i32_0 = arith.constant 0 : i32
    %c0_i32_1 = arith.constant 0 : i32
    return %c0_i32, %c0_i32_0 : i32, i32
  }
  func.func @transform_18(%arg0: i32) -> (i32, i32) {
    %c0_i32 = arith.constant 0 : i32
    %c0_i32_0 = arith.constant 0 : i32
    %c0_i32_1 = arith.constant 0 : i32
    return %c0_i32, %c0_i32_0 : i32, i32
  }
  func.func @transform_19(%arg0: i32) -> (i32, i32) {
    %c0_i32 = arith.constant 0 : i32
    %c0_i32_0 = arith.constant 0 : i32
    %c0_i32_1 = arith.constant 0 : i32
    return %c0_i32, %c0_i32_0 : i32, i32
  }
  func.func @transform_20(%arg0: i32) -> (i32, i32) {
    %c0_i32 = arith.constant 0 : i32
    %c0_i32_0 = arith.constant 0 : i32
    %c0_i32_1 = arith.constant 0 : i32
    return %c0_i32, %c0_i32_0 : i32, i32
  }
  func.func @transform_21(%arg0: i32) -> (i32, i32) {
    %c0_i32 = arith.constant 0 : i32
    %c0_i32_0 = arith.constant 0 : i32
    return %arg0, %c0_i32 : i32, i32
  }
}

</mosaic_0001>

<bundles_post_ra>
// kernel: sac_ae_critic_forward.1
= control target key start
LH: loop header
LB: loop body
LE: loop exit
PB: predicated region body
PF: predicated region fallthrough
CT: control target
= control target key end

     0   :  { %s12632_s0 = inlined_call_operand.vmem [shape: f32[8,1024], index: 0, kind: input, shape index: {}]   ;;  %s12633_s1 = inlined_call_operand.vmem [shape: f32[2,128,224], index: 1, kind: input, shape index: {}]   ;;  %s12634_s2 = inlined_call_operand.vmem [shape: f32[3,224,160], index: 2, kind: input, shape index: {}]   ;;  %s12635_s3 = inlined_call_operand.vmem [shape: f32[3,160,96], index: 3, kind: input, shape index: {}]   ;;  %s12636_s4 = inlined_call_operand.hbm [shape: f32[3,96,32], index: 4, kind: input, shape index: {}]   ;;  %s12637_s5 = inlined_call_operand.vmem [shape: f32[1,224], index: 5, kind: input, shape index: {}]   ;;  %s12638_s6 = inlined_call_operand.vmem [shape: f32[1,160], index: 6, kind: input, shape index: {}]   ;;  %s12639_s7 = inlined_call_operand.vmem [shape: f32[1,96], index: 7, kind: input, shape index: {}]   ;;  %s12640_s8 = inlined_call_operand.vmem [shape: f32[1,32], index: 8, kind: input, shape index: {}]   ;;  %s12641_s9 = inlined_call_operand.hbm [shape: f32[32,50], index: 9, kind: input, shape index: {}]   ;;  %s12642_s10 = inlined_call_operand.vmem [shape: f32[1,50], index: 10, kind: input, shape index: {}]   ;;  %s12643_s11 = inlined_call_operand.vmem [shape: f32[1,50], index: 11, kind: input, shape index: {}]   ;;  %s12644_s12 = inlined_call_operand.vmem [shape: f32[1,50], index: 12, kind: input, shape index: {}]   ;;  %s12645_s13 = inlined_call_operand.vmem [shape: f32[8,6], index: 13, kind: input, shape index: {}]   ;;  %s12646_s14 = inlined_call_operand.hbm [shape: f32[50,64], index: 14, kind: input, shape index: {}]   ;;  %s12647_s15 = inlined_call_operand.vmem [shape: f32[6,64], index: 15, kind: input, shape index: {}]   ;;  %s12648_s16 = inlined_call_operand.vmem [shape: f32[1,64], index: 16, kind: input, shape index: {}]   ;;  %s12649_s17 = inlined_call_operand.hbm [shape: f32[64,64], index: 17, kind: input, shape index: {}]   ;;  %s12650_s18 = inlined_call_operand.vmem [shape: f32[1,64], index: 18, kind: input, shape index: {}]   ;;  %s12651_s19 = inlined_call_operand.hbm [shape: f32[64,2], index: 19, kind: input, shape index: {}]   ;;  %s12652_s20 = inlined_call_operand.vmem [shape: f32[1,2], index: 20, kind: input, shape index: {}]   ;;  %s12653_s21 = inlined_call_operand.vmem [shape: f32[8,2], index: 21, kind: output, shape index: {}]  }
   0x1   :  { %12673 = sst [smem:[#allocation28_spill]] %s12632_s0 }
   0x2   :  { %12674 = sst [smem:[#allocation29_spill]] %s12633_s1 }
   0x3   :  { %12675 = sst [smem:[#allocation30_spill]] %s12634_s2 }
   0x4   :  { %12676 = sst [smem:[#allocation31_spill]] %s12635_s3 }
   0x5   :  { %12677 = sst [smem:[#allocation32_spill]] %s12636_s4 }
   0x6   :  { %12678 = sst [smem:[#allocation33_spill]] %s12637_s5 }
   0x7   :  { %12679 = sst [smem:[#allocation34_spill]] %s12653_s21 }
   0x8   :  { %26 = vsyncpa [#allocation7], 0 }
   0x9   :  { %27 = vsyncpa [#allocation9], 0 }
   0xa   :  { %28 = vsyncpa [#allocation12], 0  ;;  %s8693_s2 = smov [#allocation8]   ;;  %s8694_s26 = smov [#allocation11]  }
   0xb   :  { %s62_s25 = sshll.u32 %s8693_s2, 4  ;;  %s98_s27 = sshll.u32 %s8694_s26, 4  ;;  %s63_s25 = int_to_ptr.vmem [resolvable:$true] %s62_s25  ;;  %s8816_s27 = int_to_ptr.vmem [resolvable:$true] %s98_s27 }
   0xc   :  { %s8577_s29 = scalar_lea.hbm %s12641_s9, 512 }
   0xd   :  { %p8578_p0 = scmp.ne.s32.totalorder %s12641_s9, %s8577_s29  ;;  %p8581_p1 = scmp.lt.u32.totalorder %s8577_s29, %s12641_s9 }
   0xf   :  { %p8583_p2 = pnand %p8581_p1, %p8578_p0 }
  0x11   :  { %8586 = shalt.err (!%p8583_p2)
}
  0x12   :  { %s8587_s22 = scalar_lea.vmem %s63_s25, 512  ;;  %p8592_p4 = scmp.lt.s32.totalorder %s63_s25, %s63_s25 }
  0x13   :  { %p8588_p3 = scmp.ne.s32.totalorder %s63_s25, %s8587_s22  ;;  %p8593_p5 = scmp.lt.s32.totalorder %s8587_s22, %s8587_s22 }
  0x15   :  { %p8594_p6 = por %p8593_p5, %p8592_p4 }
  0x17   :  { %p8595_p7 = pnand %p8594_p6, %p8588_p3 }
  0x19   :  { %8598 = shalt.err (!%p8595_p7)
}
  0x1a   :  { %s8695_s23 = smov 128   ;;  %s8696_s1 = smov 8  }
  0x1b   :  { %68 = dma.hbm_to_vmem [thread:$0]  %s12641_s9, 512, %s63_s25, [#allocation9], %s8695_s23, %s8695_s23, %s8696_s1  }
  0x1c   :  { %s8599_s28 = scalar_lea.hbm %s12649_s17, 1024 }
  0x1d   :  { %p8600_p8 = scmp.ne.s32.totalorder %s12649_s17, %s8599_s28  ;;  %p8603_p9 = scmp.lt.u32.totalorder %s8599_s28, %s12649_s17 }
  0x1f   :  { %p8605_p10 = pnand %p8603_p9, %p8600_p8 }
  0x21   :  { %8608 = shalt.err (!%p8605_p10)
}
  0x22   :  { %s8609_s5 = scalar_lea.vmem %s8816_s27, 1024  ;;  %p8614_p12 = scmp.lt.s32.totalorder %s8816_s27, %s8816_s27 }
  0x23   :  { %p8610_p11 = scmp.ne.s32.totalorder %s8816_s27, %s8609_s5  ;;  %p8615_p13 = scmp.lt.s32.totalorder %s8609_s5, %s8609_s5 }
  0x25   :  { %p8616_p0 = por %p8615_p13, %p8614_p12 }
  0x27   :  { %p8617_p1 = pnand %p8616_p0, %p8610_p11 }
  0x29   :  { %8620 = shalt.err (!%p8617_p1)
}
  0x2a   :  { %104 = dma.hbm_to_vmem [thread:$0]  %s12649_s17, 1024, %s8816_s27, [#allocation12], %s8695_s23, %s8695_s23, %s8696_s1  }
  0x2b   :  { %s8697_s22 = smov [#allocation6]   ;;  %s8698_s2 = smov [#allocation10]  }
  0x2c   :  { %s42_s24 = sshll.u32 %s8697_s22, 4  ;;  %s82_s26 = sshll.u32 %s8698_s2, 4  ;;  %s43_s24 = int_to_ptr.vmem [resolvable:$true] %s42_s24  ;;  %s8853_s26 = int_to_ptr.vmem [resolvable:$true] %s82_s26 }
  0x2d   :  { %s12680_s29 = sld [smem:[#allocation32_spill]] }
  0x33   :  { %s8621_s0 = scalar_lea.hbm %s12680_s29, 4608 }
  0x34   :  { %p8622_p2 = scmp.ne.s32.totalorder %s12680_s29, %s8621_s0  ;;  %p8625_p3 = scmp.lt.u32.totalorder %s8621_s0, %s12680_s29 }
  0x36   :  { %p8627_p4 = pnand %p8625_p3, %p8622_p2 }
  0x38   :  { %8630 = shalt.err (!%p8627_p4)
}
  0x39   :  { %s8631_s17 = scalar_lea.vmem %s43_s24, 4608  ;;  %p8636_p6 = scmp.lt.s32.totalorder %s43_s24, %s43_s24 }
  0x3a   :  { %p8632_p5 = scmp.ne.s32.totalorder %s43_s24, %s8631_s17  ;;  %p8637_p7 = scmp.lt.s32.totalorder %s8631_s17, %s8631_s17 }
  0x3c   :  { %p8638_p8 = por %p8637_p7, %p8636_p6 }
  0x3e   :  { %p8639_p9 = pnand %p8638_p8, %p8632_p5 }
  0x40   :  { %8642 = shalt.err (!%p8639_p9)
}
  0x41   :  { %48 = dma.hbm_to_vmem [thread:$0]  %s12680_s29, 4608, %s43_s24, [#allocation7], %s8695_s23, %s8695_s23, %s8696_s1  }
  0x42   :  { %s8643_s21 = scalar_lea.hbm %s12646_s14, 896 }
  0x43   :  { %p8644_p10 = scmp.ne.s32.totalorder %s12646_s14, %s8643_s21  ;;  %p8647_p11 = scmp.lt.u32.totalorder %s8643_s21, %s12646_s14 }
  0x45   :  { %p8649_p12 = pnand %p8647_p11, %p8644_p10 }
  0x47   :  { %8652 = shalt.err (!%p8649_p12)
}
  0x48   :  { %s8653_s4 = scalar_lea.vmem %s8853_s26, 896  ;;  %p8658_p0 = scmp.lt.s32.totalorder %s8853_s26, %s8853_s26 }
  0x49   :  { %p8654_p13 = scmp.ne.s32.totalorder %s8853_s26, %s8653_s4  ;;  %p8659_p1 = scmp.lt.s32.totalorder %s8653_s4, %s8653_s4 }
  0x4b   :  { %p8660_p2 = por %p8659_p1, %p8658_p0 }
  0x4d   :  { %p8661_p3 = pnand %p8660_p2, %p8654_p13 }
  0x4f   :  { %8664 = shalt.err (!%p8661_p3)
}
  0x50   :  { %88 = dma.hbm_to_vmem [thread:$0]  %s12646_s14, 896, %s8853_s26, [#allocation9], %s8695_s23, %s8695_s23, %s8696_s1  }
  0x51   :  { %s8699_s30 = smov [#allocation13]   ;;  %s8665_s9 = scalar_lea.hbm %s12651_s19, 1024 }
  0x52   :  { %s112_s5 = sshll.u32 %s8699_s30, 4  ;;  %p8666_p4 = scmp.ne.s32.totalorder %s12651_s19, %s8665_s9  ;;  %s113_s5 = int_to_ptr.vmem [resolvable:$true] %s112_s5 }
  0x53   :  { %p8669_p5 = scmp.lt.u32.totalorder %s8665_s9, %s12651_s19 }
  0x55   :  { %p8671_p6 = pnand %p8669_p5, %p8666_p4 }
  0x57   :  { %8674 = shalt.err (!%p8671_p6)
}
  0x58   :  { %s8675_s3 = scalar_lea.vmem %s113_s5, 1024  ;;  %p8680_p8 = scmp.lt.s32.totalorder %s113_s5, %s113_s5 }
  0x59   :  { %p8676_p7 = scmp.ne.s32.totalorder %s113_s5, %s8675_s3  ;;  %p8681_p9 = scmp.lt.s32.totalorder %s8675_s3, %s8675_s3 }
  0x5b   :  { %p8682_p10 = por %p8681_p9, %p8680_p8 }
  0x5d   :  { %p8683_p11 = pnand %p8682_p10, %p8676_p7 }
  0x5f   :  { %8686 = shalt.err (!%p8683_p11)
}
  0x60   :  { %118 = dma.hbm_to_vmem [thread:$0]  %s12651_s19, 1024, %s113_s5, [#allocation12], %s8695_s23, %s8695_s23, %s8696_s1  }
  0x61   :  { %8687 = dma.done.wait [#allocation7], 4608  }
  0x62   :  { %8688 = vsyncadd [#allocation7], 4294962688 }
  0x63   :  { %8689 = dma.done.wait [#allocation9], 1408  }
  0x64   :  { %8690 = vsyncadd [#allocation9], 4294965888 }
  0x65   :  { %8691 = dma.done.wait [#allocation12], 2048  }
  0x66   :  { %8692 = vsyncadd [#allocation12], 4294965248  ;;  %v12660_v0 = vmov 0.0   ;;  %s12681_s4 = sld [smem:[#allocation29_spill]]  ;;  %s12682_s24 = sld [smem:[#allocation28_spill]]  ;;  %vm362_vm0 = vcmask 785408  }
  0x67   :  { %267 = vmatprep.mubr.f32.mxu0 %v12660_v0  ;;  %494 = vmatprep.mubr.f32.mxu1 %v12660_v0  ;;  %s12683_s14 = sld [smem:[#allocation33_spill]]  ;;  %s12685_s27 = sld [smem:[#allocation30_spill]]  ;;  %vm598_vm1 = vcmask 1048320   ;;  %vm601_vm2 = vcmask 523264   ;;  %vm837_vm3 = vcmask 1048064   ;;  %vm840_vm4 = vcmask 261120  }
  0x68   :  { %s8702_s22 = smov 64   ;;  %s8703_s19 = smov 32   ;;  %vm1075_vm5 = vcmask 1047808   ;;  %vm8705_vm6 = vmmov 0   ;;  %vm5307_vm7 = vcmask 408576   ;;  %vm5352_vm8 = vcmask 1045504  }
  0x69   :  { %s12707_s29 = sld [smem:[#allocation31_spill]]  ;;  %vm5348_vm9 = vcmask 48128   ;;  %vm5429_vm10 = vcmask 1041408   ;;  %vm5689_vm11 = vcmask 15360   ;;  %s12709_s5 = sld [smem:[#allocation34_spill]] }
  0x6c   :  { %v5699_v1 = vld [vmem:[%s12681_s4 + $0x108] sm:$0xff]  ;;  %v5701_v2 = vld [vmem:[%s12681_s4 + $0x118] sm:$0xff]  ;;  %v5698_v3 = vld [vmem:[%s12681_s4 + $0x100] sm:$0xff] }
  0x6d   :  { %v8916_v4 = vpack.c.bf16 %v5701_v2, %v5699_v1  ;;  %v5700_v5 = vld [vmem:[%s12681_s4 + $0x110] sm:$0xff]  ;;  %v5703_v6 = vld [vmem:[%s12681_s4 + $0x128] sm:$0xff]  ;;  %v5705_v7 = vld [vmem:[%s12681_s4 + $0x138] sm:$0xff] }
  0x6e   :  { %v8927_v8 = vpack.c.bf16 %v5700_v5, %v5698_v3  ;;  %v8929_v9 = vpack.c.bf16 %v5705_v7, %v5703_v6  ;;  %v5702_v10 = vld [vmem:[%s12681_s4 + $0x120] sm:$0xff]  ;;  %v5704_v11 = vld [vmem:[%s12681_s4 + $0x130] sm:$0xff]  ;;  %v5707_v12 = vld [vmem:[%s12681_s4 + $0x148] sm:$0xff] }
  0x6f   :  { %6871 = vmatprep.subr.bf16.mxu0 %v8916_v4  ;;  %v5709_v13 = vld [vmem:[%s12681_s4 + $0x158] sm:$0xff]  ;;  %6935 = vmatprep.subr.bf16.mxu1 %v8916_v4  ;;  %v8946_v14 = vpack.c.bf16 %v5704_v11, %v5702_v10  ;;  %v5706_v16 = vld [vmem:[%s12681_s4 + $0x140] sm:$0xff]  ;;  %v5708_v17 = vld [vmem:[%s12681_s4 + $0x150] sm:$0xff] }
  0x70   :  { %6873 = vmatpush1.bf16.msra.mxu0 %v8927_v8  ;;  %6937 = vmatpush1.bf16.msra.mxu1 %v8927_v8  ;;  %v8950_v15 = vpack.c.bf16 %v5709_v13, %v5707_v12  ;;  %v5711_v18 = vld [vmem:[%s12681_s4 + $0x168] sm:$0xff]  ;;  %v5713_v19 = vld [vmem:[%s12681_s4 + $0x178] sm:$0xff]  ;;  %v8966_v20 = vpack.c.bf16 %v5708_v17, %v5706_v16  ;;  %v5710_v22 = vld [vmem:[%s12681_s4 + $0x160] sm:$0xff] }
  0x71   :  { %6875 = vmatprep.subr.bf16.mxu0 %v8929_v9  ;;  %6939 = vmatprep.subr.bf16.mxu1 %v8929_v9  ;;  %v8970_v21 = vpack.c.bf16 %v5713_v19, %v5711_v18  ;;  %v5712_v23 = vld [vmem:[%s12681_s4 + $0x170] sm:$0xff]  ;;  %v5715_v24 = vld [vmem:[%s12681_s4 + $0x188] sm:$0xff]  ;;  %v5717_v25 = vld [vmem:[%s12681_s4 + $0x198] sm:$0xff] }
  0x72   :  { %v8986_v26 = vpack.c.bf16 %v5712_v23, %v5710_v22  ;;  %v8990_v27 = vpack.c.bf16 %v5717_v25, %v5715_v24  ;;  %v5714_v28 = vld [vmem:[%s12681_s4 + $0x180] sm:$0xff]  ;;  %v5716_v29 = vld [vmem:[%s12681_s4 + $0x190] sm:$0xff]  ;;  %v5719_v30 = vld [vmem:[%s12681_s4 + $0x1a8] sm:$0xff] }
  0x73   :  { %v5721_v31 = vld [vmem:[%s12681_s4 + $0x1b8] sm:$0xff]  ;;  %v9006_v32 = vpack.c.bf16 %v5716_v29, %v5714_v28  ;;  %v5718_v34 = vld [vmem:[%s12681_s4 + $0x1a0] sm:$0xff]  ;;  %v5720_v35 = vld [vmem:[%s12681_s4 + $0x1b0] sm:$0xff] }
  0x74   :  { %6877 = vmatpush1.bf16.msra.mxu0 %v8946_v14  ;;  %6941 = vmatpush1.bf16.msra.mxu1 %v8946_v14  ;;  %v9010_v33 = vpack.c.bf16 %v5721_v31, %v5719_v30  ;;  %v5723_v36 = vld [vmem:[%s12681_s4 + $0x1c8] sm:$0xff]  ;;  %v5725_v37 = vld [vmem:[%s12681_s4 + $0x1d8] sm:$0xff]  ;;  %v9026_v38 = vpack.c.bf16 %v5720_v35, %v5718_v34  ;;  %v5722_v40 = vld [vmem:[%s12681_s4 + $0x1c0] sm:$0xff] }
  0x75   :  { %6879 = vmatprep.subr.bf16.mxu0 %v8950_v15  ;;  %6943 = vmatprep.subr.bf16.mxu1 %v8950_v15  ;;  %v9030_v39 = vpack.c.bf16 %v5725_v37, %v5723_v36  ;;  %v5724_v41 = vld [vmem:[%s12681_s4 + $0x1d0] sm:$0xff]  ;;  %v5727_v42 = vld [vmem:[%s12681_s4 + $0x1e8] sm:$0xff]  ;;  %v5729_v43 = vld [vmem:[%s12681_s4 + $0x1f8] sm:$0xff] }
  0x76   :  { %v9046_v44 = vpack.c.bf16 %v5724_v41, %v5722_v40  ;;  %v9050_v45 = vpack.c.bf16 %v5729_v43, %v5727_v42  ;;  %v5726_v46 = vld [vmem:[%s12681_s4 + $0x1e0] sm:$0xff]  ;;  %v5728_v47 = vld [vmem:[%s12681_s4 + $0x1f0] sm:$0xff]  ;;  %v138_v48 = vld [vmem:[%s12681_s4 + $0x8] sm:$0xff] }
  0x77   :  { %v140_v49 = vld [vmem:[%s12681_s4 + $0x18] sm:$0xff]  ;;  %v9066_v50 = vpack.c.bf16 %v5728_v47, %v5726_v46  ;;  %v137_v52 = vld [vmem:[%s12681_s4] sm:$0xff]  ;;  %v139_v53 = vld [vmem:[%s12681_s4 + $0x10] sm:$0xff] }
  0x78   :  { %6881 = vmatpush1.bf16.msra.mxu0 %v8966_v20  ;;  %6945 = vmatpush1.bf16.msra.mxu1 %v8966_v20  ;;  %v9070_v51 = vpack.c.bf16 %v140_v49, %v138_v48  ;;  %v142_v54 = vld [vmem:[%s12681_s4 + $0x28] sm:$0xff]  ;;  %v144_v55 = vld [vmem:[%s12681_s4 + $0x38] sm:$0xff]  ;;  %v9091_v57 = vpack.c.bf16 %v139_v53, %v137_v52  ;;  %v9097_v58 = vld [vmem:[%s12682_s24 + $0x10] sm:$0xff] }
  0x79   :  { %6883 = vmatprep.subr.bf16.mxu0 %v8970_v21  ;;  %6947 = vmatprep.subr.bf16.mxu1 %v8970_v21  ;;  %v9089_v56 = vld [vmem:[%s12682_s24 + $0x8] sm:$0xff]  ;;  %v9100_v59 = vpack.c.bf16 %v144_v55, %v142_v54  ;;  %v141_v60 = vld [vmem:[%s12681_s4 + $0x20] sm:$0xff]  ;;  %v143_v61 = vld [vmem:[%s12681_s4 + $0x30] sm:$0xff] }
  0x7a   :  { %v146_v62 = vld [vmem:[%s12681_s4 + $0x48] sm:$0xff]  ;;  %v148_v63 = vld [vmem:[%s12681_s4 + $0x58] sm:$0xff]  ;;  %v9118_v1 = vpack.c.bf16 %v143_v61, %v141_v60  ;;  %v145_v3 = vld [vmem:[%s12681_s4 + $0x40] sm:$0xff] }
  0x7b   :  { %v9122_v2 = vpack.c.bf16 %v148_v63, %v146_v62  ;;  %v147_v5 = vld [vmem:[%s12681_s4 + $0x50] sm:$0xff]  ;;  %v150_v6 = vld [vmem:[%s12681_s4 + $0x68] sm:$0xff]  ;;  %v152_v7 = vld [vmem:[%s12681_s4 + $0x78] sm:$0xff] }
  0x7c   :  { %6885 = vmatpush1.bf16.msra.mxu0 %v8986_v26  ;;  %6949 = vmatpush1.bf16.msra.mxu1 %v8986_v26  ;;  %v9140_v10 = vpack.c.bf16 %v147_v5, %v145_v3  ;;  %v9144_v11 = vpack.c.bf16 %v152_v7, %v150_v6  ;;  %v149_v12 = vld [vmem:[%s12681_s4 + $0x60] sm:$0xff]  ;;  %v151_v13 = vld [vmem:[%s12681_s4 + $0x70] sm:$0xff]  ;;  %v154_v16 = vld [vmem:[%s12681_s4 + $0x88] sm:$0xff] }
  0x7d   :  { %6887 = vmatprep.subr.bf16.mxu0 %v8990_v27  ;;  %6951 = vmatprep.subr.bf16.mxu1 %v8990_v27  ;;  %v156_v17 = vld [vmem:[%s12681_s4 + $0x98] sm:$0xff]  ;;  %v9160_v18 = vpack.c.bf16 %v151_v13, %v149_v12  ;;  %v153_v22 = vld [vmem:[%s12681_s4 + $0x80] sm:$0xff]  ;;  %v155_v23 = vld [vmem:[%s12681_s4 + $0x90] sm:$0xff] }
  0x7e   :  { %v9164_v19 = vpack.c.bf16 %v156_v17, %v154_v16  ;;  %v158_v24 = vld [vmem:[%s12681_s4 + $0xa8] sm:$0xff]  ;;  %v160_v25 = vld [vmem:[%s12681_s4 + $0xb8] sm:$0xff]  ;;  %v9180_v28 = vpack.c.bf16 %v155_v23, %v153_v22  ;;  %v157_v30 = vld [vmem:[%s12681_s4 + $0xa0] sm:$0xff] }
  0x7f   :  { %v9184_v29 = vpack.c.bf16 %v160_v25, %v158_v24  ;;  %v159_v31 = vld [vmem:[%s12681_s4 + $0xb0] sm:$0xff]  ;;  %v162_v34 = vld [vmem:[%s12681_s4 + $0xc8] sm:$0xff]  ;;  %v164_v35 = vld [vmem:[%s12681_s4 + $0xd8] sm:$0xff] }
  0x80   :  { %6889 = vmatpush1.bf16.msra.mxu0 %v9006_v32  ;;  %6953 = vmatpush1.bf16.msra.mxu1 %v9006_v32  ;;  %v9200_v36 = vpack.c.bf16 %v159_v31, %v157_v30  ;;  %v9204_v37 = vpack.c.bf16 %v164_v35, %v162_v34  ;;  %v161_v40 = vld [vmem:[%s12681_s4 + $0xc0] sm:$0xff]  ;;  %v163_v41 = vld [vmem:[%s12681_s4 + $0xd0] sm:$0xff]  ;;  %v166_v42 = vld [vmem:[%s12681_s4 + $0xe8] sm:$0xff] }
  0x81   :  { %6891 = vmatprep.subr.bf16.mxu0 %v9010_v33  ;;  %6955 = vmatprep.subr.bf16.mxu1 %v9010_v33  ;;  %v168_v43 = vld [vmem:[%s12681_s4 + $0xf8] sm:$0xff]  ;;  %v9220_v46 = vpack.c.bf16 %v163_v41, %v161_v40  ;;  %v165_v48 = vld [vmem:[%s12681_s4 + $0xe0] sm:$0xff]  ;;  %v167_v49 = vld [vmem:[%s12681_s4 + $0xf0] sm:$0xff] }
  0x82   :  { %v9224_v47 = vpack.c.bf16 %v168_v43, %v166_v42  ;;  %v9234_v52 = vpack.c.bf16 %v167_v49, %v165_v48  ;;  %v136_v53 = vld [vmem:[%s12682_s24] sm:$0xff]  ;;  %v5868_v54 = vld [vmem:[%s12681_s4 + $0x150] sm:$0xff]  ;;  %v5875_v62 = vld [vmem:[%s12681_s4 + $0x188] sm:$0xff] }
  0x83   :  { %v5870_v60 = vld [vmem:[%s12681_s4 + $0x160] sm:$0xff]  ;;  %v5872_v61 = vld [vmem:[%s12681_s4 + $0x170] sm:$0xff]  ;;  %v5877_v63 = vld [vmem:[%s12681_s4 + $0x198] sm:$0xff] }
  0x84   :  { %6893 = vmatpush1.bf16.msra.mxu0 %v9026_v38  ;;  %6957 = vmatpush1.bf16.msra.mxu1 %v9026_v38  ;;  %v5874_v3 = vld [vmem:[%s12681_s4 + $0x180] sm:$0xff]  ;;  %v5876_v5 = vld [vmem:[%s12681_s4 + $0x190] sm:$0xff]  ;;  %v5879_v6 = vld [vmem:[%s12681_s4 + $0x1a8] sm:$0xff] }
  0x85   :  { %6895 = vmatprep.subr.bf16.mxu0 %v9030_v39  ;;  %6959 = vmatprep.subr.bf16.mxu1 %v9030_v39  ;;  %v5881_v7 = vld [vmem:[%s12681_s4 + $0x1b8] sm:$0xff]  ;;  %v5878_v12 = vld [vmem:[%s12681_s4 + $0x1a0] sm:$0xff]  ;;  %v5880_v13 = vld [vmem:[%s12681_s4 + $0x1b0] sm:$0xff] }
  0x86   :  { %v5883_v16 = vld [vmem:[%s12681_s4 + $0x1c8] sm:$0xff]  ;;  %v5885_v17 = vld [vmem:[%s12681_s4 + $0x1d8] sm:$0xff]  ;;  %v5882_v22 = vld [vmem:[%s12681_s4 + $0x1c0] sm:$0xff] }
  0x87   :  { %v5884_v23 = vld [vmem:[%s12681_s4 + $0x1d0] sm:$0xff]  ;;  %v5887_v24 = vld [vmem:[%s12681_s4 + $0x1e8] sm:$0xff]  ;;  %v5889_v25 = vld [vmem:[%s12681_s4 + $0x1f8] sm:$0xff] }
  0x88   :  { %6897 = vmatpush1.bf16.msra.mxu0 %v9046_v44  ;;  %6961 = vmatpush1.bf16.msra.mxu1 %v9046_v44  ;;  %v5886_v30 = vld [vmem:[%s12681_s4 + $0x1e0] sm:$0xff]  ;;  %v5888_v31 = vld [vmem:[%s12681_s4 + $0x1f0] sm:$0xff]  ;;  %v1306_v34 = vld [vmem:[%s12681_s4 + $0x8] sm:$0xff] }
  0x89   :  { %6899 = vmatprep.subr.bf16.mxu0 %v9050_v45  ;;  %6963 = vmatprep.subr.bf16.mxu1 %v9050_v45  ;;  %v1308_v35 = vld [vmem:[%s12681_s4 + $0x18] sm:$0xff]  ;;  %v1305_v40 = vld [vmem:[%s12681_s4] sm:$0xff]  ;;  %v1307_v41 = vld [vmem:[%s12681_s4 + $0x10] sm:$0xff] }
  0x8a   :  { %v1310_v42 = vld [vmem:[%s12681_s4 + $0x28] sm:$0xff]  ;;  %v1312_v43 = vld [vmem:[%s12681_s4 + $0x38] sm:$0xff]  ;;  %v1309_v49 = vld [vmem:[%s12681_s4 + $0x20] sm:$0xff] }
  0x8b   :  { %v9513_v48 = vpack.c.bf16 %v1312_v43, %v1310_v42  ;;  %v1333_v42 = vld [vmem:[%s12681_s4 + $0xe0] sm:$0xff]  ;;  %v1335_v43 = vld [vmem:[%s12681_s4 + $0xf0] sm:$0xff] }
  0x8c   :  { %6901 = vmatpush1.bf16.msra.mxu0 %v9066_v50  ;;  %6965 = vmatpush1.bf16.msra.mxu1 %v9066_v50 }
  0x8d   :  { %6903 = vmatprep.subr.bf16.mxu0 %v9070_v51  ;;  %6967 = vmatprep.subr.bf16.mxu1 %v9070_v51 }
  0x8f   :  { %268 = vmatmul.mubr.f32.vlgmr.msra.gmra.mrb[0].mxu0 %v9089_v56  ;;  %495 = vmatmul.mubr.f32.vlgmr.msra.gmra.mrb[0].mxu1 %v9097_v58 }
  0x90   :  { %6905 = vmatpush1.bf16.msra.mxu0 %v9091_v57  ;;  %6969 = vmatpush1.bf16.msra.mxu1 %v9091_v57 }
  0x91   :  { %6907 = vmatprep.subr.bf16.mxu0 %v9100_v59  ;;  %6971 = vmatprep.subr.bf16.mxu1 %v9100_v59 }
  0x92   :  { %338 = vmatprep.mubr.f32.mxu0 %v12660_v0  ;;  %565 = vmatprep.mubr.f32.mxu1 %v12660_v0 }
  0x94   :  { %6909 = vmatpush1.bf16.msra.mxu0 %v9118_v1  ;;  %6973 = vmatpush1.bf16.msra.mxu1 %v9118_v1 }
  0x95   :  { %6911 = vmatprep.subr.bf16.mxu0 %v9122_v2  ;;  %6975 = vmatprep.subr.bf16.mxu1 %v9122_v2 }
  0x98   :  { %6913 = vmatpush1.bf16.msra.mxu0 %v9140_v10  ;;  %6977 = vmatpush1.bf16.msra.mxu1 %v9140_v10 }
  0x99   :  { %6915 = vmatprep.subr.bf16.mxu0 %v9144_v11  ;;  %6979 = vmatprep.subr.bf16.mxu1 %v9144_v11 }
  0x9c   :  { %6917 = vmatpush1.bf16.msra.mxu0 %v9160_v18  ;;  %6981 = vmatpush1.bf16.msra.mxu1 %v9160_v18 }
  0x9d   :  { %6919 = vmatprep.subr.bf16.mxu0 %v9164_v19  ;;  %6983 = vmatprep.subr.bf16.mxu1 %v9164_v19 }
  0xa0   :  { %6921 = vmatpush1.bf16.msra.mxu0 %v9180_v28  ;;  %6985 = vmatpush1.bf16.msra.mxu1 %v9180_v28 }
  0xa1   :  { %6923 = vmatprep.subr.bf16.mxu0 %v9184_v29  ;;  %6987 = vmatprep.subr.bf16.mxu1 %v9184_v29 }
  0xa4   :  { %6925 = vmatpush1.bf16.msra.mxu0 %v9200_v36  ;;  %6989 = vmatpush1.bf16.msra.mxu1 %v9200_v36 }
  0xa5   :  { %6927 = vmatprep.subr.bf16.mxu0 %v9204_v37  ;;  %6991 = vmatprep.subr.bf16.mxu1 %v9204_v37 }
  0xa8   :  { %6929 = vmatpush1.bf16.msra.mxu0 %v9220_v46  ;;  %6993 = vmatpush1.bf16.msra.mxu1 %v9220_v46 }
  0xa9   :  { %6931 = vmatprep.subr.bf16.mxu0 %v9224_v47  ;;  %6995 = vmatprep.subr.bf16.mxu1 %v9224_v47 }
  0xac   :  { %6933 = vmatpush1.bf16.msra.mxu0 %v9234_v52  ;;  %6997 = vmatpush1.bf16.msra.mxu1 %v9234_v52 }
  0xad   :  { %6999 = vmatprep.subr.bf16.mxu0 %v8916_v4  ;;  %7063 = vmatprep.subr.bf16.mxu1 %v8916_v4  ;;  %v636_v4 = vld [vmem:[%s12682_s24 + $0x18] sm:$0xff] }
  0xaf   :  { %339 = vmatmul.mubr.f32.vlgmr.msra.gmra.mrb[0].mxu0 %v136_v53  ;;  %566 = vmatmul.mubr.f32.vlgmr.msra.gmra.mrb[0].mxu1 %v9089_v56  ;;  %v5871_v56 = vld [vmem:[%s12681_s4 + $0x168] sm:$0xff] }
  0xb0   :  { %7001 = vmatpush1.bf16.msra.mxu0 %v8927_v8  ;;  %733 = vmatprep.mubr.f32.mxu0 %v12660_v0  ;;  %v1314_v53 = vld [vmem:[%s12681_s4 + $0x48] sm:$0xff] }
  0xb1   :  { %7003 = vmatprep.subr.bf16.mxu0 %v8929_v9  ;;  %7065 = vmatpush1.bf16.msra.mxu1 %v8927_v8  ;;  %v9287_v8 = vld [vmem:[%s12682_s24 + $0x20] sm:$0xff] }
  0xb2   :  { %7067 = vmatprep.subr.bf16.mxu1 %v8929_v9  ;;  %972 = vmatprep.mubr.f32.mxu1 %v12660_v0  ;;  %v5859_v9 = vld [vmem:[%s12681_s4 + $0x108] sm:$0xff] }
  0xb4   :  { %7005 = vmatpush1.bf16.msra.mxu0 %v8946_v14 }
  0xb5   :  { %7007 = vmatprep.subr.bf16.mxu0 %v8950_v15  ;;  %7069 = vmatpush1.bf16.msra.mxu1 %v8946_v14  ;;  %v5861_v14 = vld [vmem:[%s12681_s4 + $0x118] sm:$0xff] }
  0xb6   :  { %7071 = vmatprep.subr.bf16.mxu1 %v8950_v15  ;;  %v9331_v15 = vpack.c.bf16 %v5861_v14, %v5859_v9 }
  0xb8   :  { %7009 = vmatpush1.bf16.msra.mxu0 %v8966_v20 }
  0xb9   :  { %7011 = vmatprep.subr.bf16.mxu0 %v8970_v21  ;;  %7073 = vmatpush1.bf16.msra.mxu1 %v8966_v20  ;;  %v5858_v20 = vld [vmem:[%s12681_s4 + $0x100] sm:$0xff] }
  0xba   :  { %7075 = vmatprep.subr.bf16.mxu1 %v8970_v21  ;;  %v5860_v21 = vld [vmem:[%s12681_s4 + $0x110] sm:$0xff] }
  0xbc   :  { %7013 = vmatpush1.bf16.msra.mxu0 %v8986_v26 }
  0xbd   :  { %7015 = vmatprep.subr.bf16.mxu0 %v8990_v27  ;;  %7077 = vmatpush1.bf16.msra.mxu1 %v8986_v26  ;;  %v9339_v26 = vpack.c.bf16 %v5860_v21, %v5858_v20  ;;  %v1313_v20 = vld [vmem:[%s12681_s4 + $0x40] sm:$0xff]  ;;  %v1315_v21 = vld [vmem:[%s12681_s4 + $0x50] sm:$0xff] }
  0xbe   :  { %7079 = vmatprep.subr.bf16.mxu1 %v8990_v27  ;;  %v5863_v27 = vld [vmem:[%s12681_s4 + $0x128] sm:$0xff] }
  0xc0   :  { %7017 = vmatpush1.bf16.msra.mxu0 %v9006_v32 }
  0xc1   :  { %7019 = vmatprep.subr.bf16.mxu0 %v9010_v33  ;;  %7081 = vmatpush1.bf16.msra.mxu1 %v9006_v32  ;;  %v5865_v32 = vld [vmem:[%s12681_s4 + $0x138] sm:$0xff] }
  0xc2   :  { %7083 = vmatprep.subr.bf16.mxu1 %v9010_v33  ;;  %v9351_v33 = vpack.c.bf16 %v5865_v32, %v5863_v27  ;;  %v1318_v27 = vld [vmem:[%s12681_s4 + $0x68] sm:$0xff]  ;;  %v1320_v32 = vld [vmem:[%s12681_s4 + $0x78] sm:$0xff] }
  0xc4   :  { %7021 = vmatpush1.bf16.msra.mxu0 %v9026_v38 }
  0xc5   :  { %7023 = vmatprep.subr.bf16.mxu0 %v9030_v39  ;;  %7085 = vmatpush1.bf16.msra.mxu1 %v9026_v38  ;;  %v5862_v38 = vld [vmem:[%s12681_s4 + $0x120] sm:$0xff] }
  0xc6   :  { %7087 = vmatprep.subr.bf16.mxu1 %v9030_v39  ;;  %v5864_v39 = vld [vmem:[%s12681_s4 + $0x130] sm:$0xff] }
  0xc8   :  { %7025 = vmatpush1.bf16.msra.mxu0 %v9046_v44 }
  0xc9   :  { %7027 = vmatprep.subr.bf16.mxu0 %v9050_v45  ;;  %7089 = vmatpush1.bf16.msra.mxu1 %v9046_v44  ;;  %v5867_v44 = vld [vmem:[%s12681_s4 + $0x148] sm:$0xff] }
  0xca   :  { %7091 = vmatprep.subr.bf16.mxu1 %v9050_v45  ;;  %v9362_v45 = vpack.c.bf16 %v5864_v39, %v5862_v38  ;;  %v9549_v38 = vpack.c.bf16 %v1315_v21, %v1313_v20  ;;  %v9552_v39 = vpack.c.bf16 %v1320_v32, %v1318_v27 }
  0xcc   :  { %7029 = vmatpush1.bf16.msra.mxu0 %v9066_v50 }
  0xcd   :  { %7031 = vmatprep.subr.bf16.mxu0 %v9070_v51  ;;  %7093 = vmatpush1.bf16.msra.mxu1 %v9066_v50  ;;  %v5869_v50 = vld [vmem:[%s12681_s4 + $0x158] sm:$0xff] }
  0xce   :  { %7095 = vmatprep.subr.bf16.mxu1 %v9070_v51  ;;  %v5866_v51 = vld [vmem:[%s12681_s4 + $0x140] sm:$0xff]  ;;  %v9374_v55 = vpack.c.bf16 %v5869_v50, %v5867_v44  ;;  %v1319_v50 = vld [vmem:[%s12681_s4 + $0x70] sm:$0xff] }
  0xcf   :  { %734 = vmatmul.mubr.f32.vlgmr.msra.gmra.mrb[2].mxu0 %v636_v4  ;;  %v1317_v44 = vld [vmem:[%s12681_s4 + $0x60] sm:$0xff] }
  0xd0   :  { %7033 = vmatpush1.bf16.msra.mxu0 %v9091_v57  ;;  %804 = vmatprep.mubr.f32.mxu0 %v12660_v0 }
  0xd1   :  { %7035 = vmatprep.subr.bf16.mxu0 %v9100_v59  ;;  %973 = vmatmul.mubr.f32.vlgmr.msra.gmra.mrb[2].mxu1 %v9287_v8 }
  0xd2   :  { %7097 = vmatpush1.bf16.msra.mxu1 %v9091_v57  ;;  %1043 = vmatprep.mubr.f32.mxu1 %v12660_v0  ;;  %v5873_v57 = vld [vmem:[%s12681_s4 + $0x178] sm:$0xff] }
  0xd3   :  { %7099 = vmatprep.subr.bf16.mxu1 %v9100_v59  ;;  %v9388_v59 = vpack.c.bf16 %v5873_v57, %v5871_v56  ;;  %v9567_v56 = vpack.c.bf16 %v1319_v50, %v1317_v44 }
  0xd4   :  { %7037 = vmatpush1.bf16.msra.mxu0 %v9118_v1 }
  0xd5   :  { %7039 = vmatprep.subr.bf16.mxu0 %v9122_v2 }
  0xd6   :  { %7101 = vmatpush1.bf16.msra.mxu1 %v9118_v1  ;;  %v9404_v1 = vpack.c.bf16 %v5872_v61, %v5870_v60  ;;  %v1321_v60 = vld [vmem:[%s12681_s4 + $0x80] sm:$0xff]  ;;  %v1323_v61 = vld [vmem:[%s12681_s4 + $0x90] sm:$0xff] }
  0xd7   :  { %7103 = vmatprep.subr.bf16.mxu1 %v9122_v2  ;;  %v9408_v2 = vpack.c.bf16 %v5877_v63, %v5875_v62  ;;  %v1326_v62 = vld [vmem:[%s12681_s4 + $0xa8] sm:$0xff]  ;;  %v1328_v63 = vld [vmem:[%s12681_s4 + $0xb8] sm:$0xff] }
  0xd8   :  { %7041 = vmatpush1.bf16.msra.mxu0 %v9140_v10 }
  0xd9   :  { %7043 = vmatprep.subr.bf16.mxu0 %v9144_v11 }
  0xda   :  { %7105 = vmatpush1.bf16.msra.mxu1 %v9140_v10  ;;  %v9424_v10 = vpack.c.bf16 %v5876_v5, %v5874_v3  ;;  %v9585_v3 = vpack.c.bf16 %v1323_v61, %v1321_v60  ;;  %v347_v5 = vlaneseq }
  0xdb   :  { %7107 = vmatprep.subr.bf16.mxu1 %v9144_v11  ;;  %v9428_v11 = vpack.c.bf16 %v5881_v7, %v5879_v6  ;;  %v9588_v6 = vpack.c.bf16 %v1328_v63, %v1326_v62  ;;  %v1325_v7 = vld [vmem:[%s12681_s4 + $0xa0] sm:$0xff] }
  0xdc   :  { %7045 = vmatpush1.bf16.msra.mxu0 %v9160_v18 }
  0xdd   :  { %7047 = vmatprep.subr.bf16.mxu0 %v9164_v19 }
  0xde   :  { %7109 = vmatpush1.bf16.msra.mxu1 %v9160_v18  ;;  %v9444_v18 = vpack.c.bf16 %v5880_v13, %v5878_v12  ;;  %v1327_v12 = vld [vmem:[%s12681_s4 + $0xb0] sm:$0xff]  ;;  %v1330_v13 = vld [vmem:[%s12681_s4 + $0xc8] sm:$0xff] }
  0xdf   :  { %7111 = vmatprep.subr.bf16.mxu1 %v9164_v19  ;;  %v9448_v19 = vpack.c.bf16 %v5885_v17, %v5883_v16  ;;  %v1332_v16 = vld [vmem:[%s12681_s4 + $0xd8] sm:$0xff]  ;;  %v9603_v17 = vpack.c.bf16 %v1327_v12, %v1325_v7 }
  0xe0   :  { %7049 = vmatpush1.bf16.msra.mxu0 %v9180_v28 }
  0xe1   :  { %7051 = vmatprep.subr.bf16.mxu0 %v9184_v29 }
  0xe2   :  { %7113 = vmatpush1.bf16.msra.mxu1 %v9180_v28  ;;  %v9464_v28 = vpack.c.bf16 %v5884_v23, %v5882_v22  ;;  %v348_v22 = vshrl.u32 %v347_v5, 7  ;;  %v9606_v23 = vpack.c.bf16 %v1332_v16, %v1330_v13  ;;  %v5924_v16 = vld [vmem:[%s12685_s27 + $0x1d0] sm:$0xff] }
  0xe3   :  { %7115 = vmatprep.subr.bf16.mxu1 %v9184_v29  ;;  %v9468_v29 = vpack.c.bf16 %v5889_v25, %v5887_v24  ;;  %v1329_v24 = vld [vmem:[%s12681_s4 + $0xc0] sm:$0xff]  ;;  %v1331_v25 = vld [vmem:[%s12681_s4 + $0xd0] sm:$0xff] }
  0xe4   :  { %7053 = vmatpush1.bf16.msra.mxu0 %v9200_v36 }
  0xe5   :  { %7055 = vmatprep.subr.bf16.mxu0 %v9204_v37 }
  0xe6   :  { %7117 = vmatpush1.bf16.msra.mxu1 %v9200_v36  ;;  %v9484_v36 = vpack.c.bf16 %v5888_v31, %v5886_v30  ;;  %v1334_v30 = vld [vmem:[%s12681_s4 + $0xe8] sm:$0xff]  ;;  %v1336_v31 = vld [vmem:[%s12681_s4 + $0xf8] sm:$0xff] }
  0xe7   :  { %7119 = vmatprep.subr.bf16.mxu1 %v9204_v37  ;;  %v9488_v37 = vpack.c.bf16 %v1308_v35, %v1306_v34  ;;  %v9621_v34 = vpack.c.bf16 %v1331_v25, %v1329_v24  ;;  %v1304_v35 = vld [vmem:[%s12682_s24 + $0x28] sm:$0xff]  ;;  %v5929_v25 = vld [vmem:[%s12685_s27 + $0x1f8] sm:$0xff] }
  0xe8   :  { %7057 = vmatpush1.bf16.msra.mxu0 %v9220_v46 }
  0xe9   :  { %7059 = vmatprep.subr.bf16.mxu0 %v9224_v47 }
  0xea   :  { %7121 = vmatpush1.bf16.msra.mxu1 %v9220_v46  ;;  %v9507_v46 = vld [vmem:[%s12682_s24 + $0x30] sm:$0xff] }
  0xeb   :  { %7123 = vmatprep.subr.bf16.mxu1 %v9224_v47  ;;  %v9509_v47 = vpack.c.bf16 %v1307_v41, %v1305_v40  ;;  %v9626_v40 = vsub.s32 0, %v348_v22  ;;  %v9629_v41 = vpack.c.bf16 %v1336_v31, %v1334_v30  ;;  %v5926_v30 = vld [vmem:[%s12685_s27 + $0x1e0] sm:$0xff]  ;;  %v5928_v31 = vld [vmem:[%s12685_s27 + $0x1f0] sm:$0xff] }
  0xec   :  { %7061 = vmatpush1.bf16.msra.mxu0 %v9234_v52 }
  0xed   :  { %7127 = vmatprep.subr.bf16.mxu0 %v9331_v15 }
  0xee   :  { %7125 = vmatpush1.bf16.msra.mxu1 %v9234_v52  ;;  %v1311_v52 = vld [vmem:[%s12681_s4 + $0x30] sm:$0xff] }
  0xef   :  { %805 = vmatmul.mubr.f32.vlgmr.msra.gmra.mrb[2].mxu0 %v9097_v58  ;;  %7191 = vmatprep.subr.bf16.mxu1 %v9331_v15  ;;  %v9384_v58 = vpack.c.bf16 %v5868_v54, %v5866_v51  ;;  %v9530_v9 = vpack.c.bf16 %v1311_v52, %v1309_v49  ;;  %v1322_v51 = vld [vmem:[%s12681_s4 + $0x88] sm:$0xff]  ;;  %v1324_v54 = vld [vmem:[%s12681_s4 + $0x98] sm:$0xff]  ;;  %v345_v49 = vld [vmem:[%s12683_s14] sm:$0x3]  ;;  %v9640_v52 = vsub.s32 1, %v348_v22 }
  0xf0   :  { %1208 = vmatprep.mubr.f32.mxu0 %v12660_v0  ;;  %7129 = vmatpush1.bf16.msra.mxu0 %v9339_v26  ;;  %v9570_v57 = vpack.c.bf16 %v1324_v54, %v1322_v51  ;;  %v350_v20 = vrot.slane %v345_v49, %v9626_v40  ;;  %v5927_v22 = vld [vmem:[%s12685_s27 + $0x1e8] sm:$0xff] }
  0xf1   :  { %1044 = vmatmul.mubr.f32.vlgmr.msra.gmra.mrb[2].mxu1 %v636_v4  ;;  %7131 = vmatprep.subr.bf16.mxu0 %v9351_v33  ;;  %v1316_v4 = vld [vmem:[%s12681_s4 + $0x58] sm:$0xff]  ;;  %12684 = vst [vmem:[#allocation17_spill] sm:$0xff] %v9640_v52  ;;  %v354_v27 = vrot.slane %v345_v49, %v9640_v52  ;;  %s8701_s4 = smov 96  }
  0xf2   :  { %1434 = vmatprep.mubr.f32.mxu1 %v12660_v0  ;;  %7193 = vmatpush1.bf16.msra.mxu1 %v9339_v26  ;;  %v9534_v14 = vpack.c.bf16 %v1316_v4, %v1314_v53  ;;  %v572_v53 = vld [vmem:[%s12683_s14] sm:$0x3]  ;;  %v9649_v4 = vpack.c.bf16 %v1335_v43, %v1333_v42  ;;  %v5933_v42 = vld [vmem:[%s12685_s27 + $0x218] sm:$0xff]  ;;  %v7324_v43 = vpack.c.bf16 %v5928_v31, %v5926_v30 }
  0xf3   :  { %7195 = vmatprep.subr.bf16.mxu1 %v9351_v33  ;;  %v577_v21 = vrot.slane %v572_v53, %v9626_v40  ;;  %v581_v32 = vrot.slane %v572_v53, %v9640_v52  ;;  %v5930_v53 = vld [vmem:[%s12685_s27 + $0x200] sm:$0xff]  ;;  %v5965_v30 = vld [vmem:[%s12685_s27 + $0x318] sm:$0xff] }
  0xf4   :  { %7133 = vmatpush1.bf16.msra.mxu0 %v9362_v45 }
  0xf5   :  { %7135 = vmatprep.subr.bf16.mxu0 %v9374_v55 }
  0xf6   :  { %7197 = vmatpush1.bf16.msra.mxu1 %v9362_v45 }
  0xf7   :  { %7199 = vmatprep.subr.bf16.mxu1 %v9374_v55 }
  0xf8   :  { %7137 = vmatpush1.bf16.msra.mxu0 %v9384_v58 }
  0xf9   :  { %7139 = vmatprep.subr.bf16.mxu0 %v9388_v59 }
  0xfa   :  { %7201 = vmatpush1.bf16.msra.mxu1 %v9384_v58 }
  0xfb   :  { %7203 = vmatprep.subr.bf16.mxu1 %v9388_v59 }
  0xfc   :  { %7141 = vmatpush1.bf16.msra.mxu0 %v9404_v1 }
  0xfd   :  { %7143 = vmatprep.subr.bf16.mxu0 %v9408_v2 }
  0xfe   :  { %7205 = vmatpush1.bf16.msra.mxu1 %v9404_v1 }
  0xff   :  { %7207 = vmatprep.subr.bf16.mxu1 %v9408_v2 }
 0x100   :  { %7145 = vmatpush1.bf16.msra.mxu0 %v9424_v10 }
 0x101   :  { %7147 = vmatprep.subr.bf16.mxu0 %v9428_v11 }
 0x102   :  { %7209 = vmatpush1.bf16.msra.mxu1 %v9424_v10 }
 0x103   :  { %7211 = vmatprep.subr.bf16.mxu1 %v9428_v11 }
 0x104   :  { %7149 = vmatpush1.bf16.msra.mxu0 %v9444_v18 }
 0x105   :  { %7151 = vmatprep.subr.bf16.mxu0 %v9448_v19 }
 0x106   :  { %7213 = vmatpush1.bf16.msra.mxu1 %v9444_v18 }
 0x107   :  { %7215 = vmatprep.subr.bf16.mxu1 %v9448_v19 }
 0x108   :  { %7153 = vmatpush1.bf16.msra.mxu0 %v9464_v28 }
 0x109   :  { %7155 = vmatprep.subr.bf16.mxu0 %v9468_v29 }
 0x10a   :  { %7217 = vmatpush1.bf16.msra.mxu1 %v9464_v28 }
 0x10b   :  { %7219 = vmatprep.subr.bf16.mxu1 %v9468_v29 }
 0x10c   :  { %7157 = vmatpush1.bf16.msra.mxu0 %v9484_v36 }
 0x10d   :  { %7159 = vmatprep.subr.bf16.mxu0 %v9488_v37 }
 0x10e   :  { %7221 = vmatpush1.bf16.msra.mxu1 %v9484_v36 }
 0x10f   :  { %7223 = vmatprep.subr.bf16.mxu1 %v9488_v37  ;;  %1209 = vmatmul.mubr.f32.vlgmr.msra.gmra.mrb[4].mxu0 %v1304_v35 }
 0x110   :  { %7161 = vmatpush1.bf16.msra.mxu0 %v9509_v47  ;;  %1279 = vmatprep.mubr.f32.mxu0 %v12660_v0 }
 0x111   :  { %1435 = vmatmul.mubr.f32.vlgmr.msra.gmra.mrb[4].mxu1 %v9507_v46  ;;  %7163 = vmatprep.subr.bf16.mxu0 %v9513_v48 }
 0x112   :  { %7225 = vmatpush1.bf16.msra.mxu1 %v9509_v47  ;;  %1505 = vmatprep.mubr.f32.mxu1 %v12660_v0 }
 0x113   :  { %7227 = vmatprep.subr.bf16.mxu1 %v9513_v48 }
 0x114   :  { %7165 = vmatpush1.bf16.msra.mxu0 %v9530_v9 }
 0x115   :  { %7167 = vmatprep.subr.bf16.mxu0 %v9534_v14 }
 0x116   :  { %7229 = vmatpush1.bf16.msra.mxu1 %v9530_v9 }
 0x117   :  { %7231 = vmatprep.subr.bf16.mxu1 %v9534_v14 }
 0x118   :  { %7169 = vmatpush1.bf16.msra.mxu0 %v9549_v38 }
 0x119   :  { %7171 = vmatprep.subr.bf16.mxu0 %v9552_v39 }
 0x11a   :  { %7233 = vmatpush1.bf16.msra.mxu1 %v9549_v38 }
 0x11b   :  { %7235 = vmatprep.subr.bf16.mxu1 %v9552_v39 }
 0x11c   :  { %7173 = vmatpush1.bf16.msra.mxu0 %v9567_v56 }
 0x11d   :  { %7175 = vmatprep.subr.bf16.mxu0 %v9570_v57 }
 0x11e   :  { %7237 = vmatpush1.bf16.msra.mxu1 %v9567_v56 }
 0x11f   :  { %7239 = vmatprep.subr.bf16.mxu1 %v9570_v57 }
 0x120   :  { %7177 = vmatpush1.bf16.msra.mxu0 %v9585_v3 }
 0x121   :  { %7179 = vmatprep.subr.bf16.mxu0 %v9588_v6 }
 0x122   :  { %7241 = vmatpush1.bf16.msra.mxu1 %v9585_v3 }
 0x123   :  { %7243 = vmatprep.subr.bf16.mxu1 %v9588_v6 }
 0x124   :  { %7181 = vmatpush1.bf16.msra.mxu0 %v9603_v17 }
 0x125   :  { %7183 = vmatprep.subr.bf16.mxu0 %v9606_v23 }
 0x126   :  { %7245 = vmatpush1.bf16.msra.mxu1 %v9603_v17 }
 0x127   :  { %7247 = vmatprep.subr.bf16.mxu1 %v9606_v23 }
 0x128   :  { %7185 = vmatpush1.bf16.msra.mxu0 %v9621_v34 }
 0x129   :  { %7187 = vmatprep.subr.bf16.mxu0 %v9629_v41 }
 0x12a   :  { %7249 = vmatpush1.bf16.msra.mxu1 %v9621_v34 }
 0x12b   :  { %7251 = vmatprep.subr.bf16.mxu1 %v9629_v41 }
 0x12c   :  { %7189 = vmatpush1.bf16.msra.mxu0 %v9649_v4 }
 0x12d   :  { %7255 = vmatprep.subr.bf16.mxu0 %v9331_v15 }
 0x12e   :  { %7253 = vmatpush1.bf16.msra.mxu1 %v9649_v4 }
 0x12f   :  { %1280 = vmatmul.mubr.f32.vlgmr.msra.gmra.mrb[4].mxu0 %v9287_v8  ;;  %v811_v8 = vld [vmem:[%s12683_s14] sm:$0x3] }
 0x130   :  { %7257 = vmatpush1.bf16.msra.mxu0 %v9339_v26  ;;  %1671 = vmatprep.mubr.f32.mxu0 %v12660_v0  ;;  %v816_v15 = vrot.slane %v811_v8, %v9626_v40  ;;  %v9699_v26 = vld [vmem:[%s12683_s14] sm:$0x3] }
 0x131   :  { %1506 = vmatmul.mubr.f32.vlgmr.msra.gmra.mrb[4].mxu1 %v1304_v35  ;;  %7259 = vmatprep.subr.bf16.mxu0 %v9351_v33  ;;  %v820_v33 = vrot.slane %v811_v8, %v9640_v52  ;;  %v7322_v35 = vpack.c.bf16 %v5929_v25, %v5927_v22  ;;  %v5958_v22 = vld [vmem:[%s12685_s27 + $0x2e0] sm:$0xff]  ;;  %v5963_v25 = vld [vmem:[%s12685_s27 + $0x308] sm:$0xff] }
 0x134   :  { %7261 = vmatpush1.bf16.msra.mxu0 %v9362_v45 }
 0x135   :  { %7263 = vmatprep.subr.bf16.mxu0 %v9374_v55  ;;  %v1059_v55 = vrot.slane %v9699_v26, %v9640_v52 }
 0x138   :  { %7265 = vmatpush1.bf16.msra.mxu0 %v9384_v58 }
 0x139   :  { %7267 = vmatprep.subr.bf16.mxu0 %v9388_v59 }
 0x13c   :  { %7269 = vmatpush1.bf16.msra.mxu0 %v9404_v1 }
 0x13d   :  { %7271 = vmatprep.subr.bf16.mxu0 %v9408_v2 }
 0x140   :  { %7273 = vmatpush1.bf16.msra.mxu0 %v9424_v10 }
 0x141   :  { %7275 = vmatprep.subr.bf16.mxu0 %v9428_v11 }
 0x144   :  { %7277 = vmatpush1.bf16.msra.mxu0 %v9444_v18 }
 0x145   :  { %7279 = vmatprep.subr.bf16.mxu0 %v9448_v19  ;;  %v1574_v19 = vld [vmem:[%s12682_s24 + $0x38] sm:$0xff] }
 0x148   :  { %7281 = vmatpush1.bf16.msra.mxu0 %v9464_v28  ;;  %v5923_v28 = vld [vmem:[%s12685_s27 + $0x1c8] sm:$0xff] }
 0x149   :  { %7283 = vmatprep.subr.bf16.mxu0 %v9468_v29  ;;  %v5925_v29 = vld [vmem:[%s12685_s27 + $0x1d8] sm:$0xff] }
 0x14c   :  { %7285 = vmatpush1.bf16.msra.mxu0 %v9484_v36  ;;  %v7318_v36 = vpack.c.bf16 %v5925_v29, %v5923_v28  ;;  %v5956_v28 = vld [vmem:[%s12685_s27 + $0x2d0] sm:$0xff]  ;;  %v5959_v29 = vld [vmem:[%s12685_s27 + $0x2e8] sm:$0xff] }
 0x14d   :  { %7287 = vmatprep.subr.bf16.mxu0 %v9488_v37  ;;  %v5922_v37 = vld [vmem:[%s12685_s27 + $0x1c0] sm:$0xff] }
 0x14e   :  { %v7320_v24 = vpack.c.bf16 %v5924_v16, %v5922_v37  ;;  %7319 = vmatprep.subr.bf16.mxu1 %v7318_v36 }
 0x14f   :  { %1672 = vmatmul.mubr.f32.vlgmr.msra.gmra.mrb[6].mxu0 %v1574_v19  ;;  %v5954_v19 = vld [vmem:[%s12685_s27 + $0x2c0] sm:$0xff] }
 0x150   :  { %7289 = vmatpush1.bf16.msra.mxu0 %v9509_v47  ;;  %1742 = vmatprep.mubr.f32.mxu0 %v12660_v0  ;;  %v5931_v47 = vld [vmem:[%s12685_s27 + $0x208] sm:$0xff]  ;;  %v7352_v37 = vpack.c.bf16 %v5956_v28, %v5954_v19  ;;  %v1791_v19 = vld [vmem:[%s12685_s27 + $0x58] sm:$0xff]  ;;  %v6026_v0 = vld [vmem:[%s12685_s27 + $0x4f0] sm:$0xff] }
 0x151   :  { %7291 = vmatprep.subr.bf16.mxu0 %v9513_v48  ;;  %7321 = vmatpush1.bf16.msra.mxu1 %v7320_v24  ;;  %v7326_v49 = vpack.c.bf16 %v5933_v42, %v5931_v47  ;;  %v5932_v48 = vld [vmem:[%s12685_s27 + $0x210] sm:$0xff]  ;;  %v5962_v47 = vld [vmem:[%s12685_s27 + $0x300] sm:$0xff] }
 0x152   :  { %7323 = vmatprep.subr.bf16.mxu1 %v7322_v35  ;;  %v5964_v42 = vld [vmem:[%s12685_s27 + $0x310] sm:$0xff] }
 0x154   :  { %7293 = vmatpush1.bf16.msra.mxu0 %v9530_v9  ;;  %v5935_v9 = vld [vmem:[%s12685_s27 + $0x228] sm:$0xff] }
 0x155   :  { %7295 = vmatprep.subr.bf16.mxu0 %v9534_v14  ;;  %7325 = vmatpush1.bf16.msra.mxu1 %v7324_v43  ;;  %v5937_v14 = vld [vmem:[%s12685_s27 + $0x238] sm:$0xff] }
 0x156   :  { %7327 = vmatprep.subr.bf16.mxu1 %v7326_v49 }
 0x158   :  { %7297 = vmatpush1.bf16.msra.mxu0 %v9549_v38  ;;  %v5934_v38 = vld [vmem:[%s12685_s27 + $0x220] sm:$0xff] }
 0x159   :  { %7299 = vmatprep.subr.bf16.mxu0 %v9552_v39  ;;  %v7330_v39 = vpack.c.bf16 %v5937_v14, %v5935_v9  ;;  %v5968_v9 = vld [vmem:[%s12685_s27 + $0x330] sm:$0xff]  ;;  %v5971_v14 = vld [vmem:[%s12685_s27 + $0x348] sm:$0xff] }
 0x15c   :  { %7301 = vmatpush1.bf16.msra.mxu0 %v9567_v56 }
 0x15d   :  { %7303 = vmatprep.subr.bf16.mxu0 %v9570_v57  ;;  %v5939_v57 = vld [vmem:[%s12685_s27 + $0x248] sm:$0xff] }
 0x160   :  { %7305 = vmatpush1.bf16.msra.mxu0 %v9585_v3  ;;  %v5941_v3 = vld [vmem:[%s12685_s27 + $0x258] sm:$0xff] }
 0x161   :  { %7307 = vmatprep.subr.bf16.mxu0 %v9588_v6  ;;  %v5938_v6 = vld [vmem:[%s12685_s27 + $0x240] sm:$0xff] }
 0x164   :  { %7309 = vmatpush1.bf16.msra.mxu0 %v9603_v17  ;;  %v7334_v17 = vpack.c.bf16 %v5941_v3, %v5939_v57  ;;  %v5972_v57 = vld [vmem:[%s12685_s27 + $0x350] sm:$0xff]  ;;  %v5975_v3 = vld [vmem:[%s12685_s27 + $0x368] sm:$0xff] }
 0x165   :  { %7311 = vmatprep.subr.bf16.mxu0 %v9606_v23  ;;  %v5940_v23 = vld [vmem:[%s12685_s27 + $0x250] sm:$0xff] }
 0x168   :  { %7313 = vmatpush1.bf16.msra.mxu0 %v9621_v34  ;;  %v5943_v34 = vld [vmem:[%s12685_s27 + $0x268] sm:$0xff] }
 0x169   :  { %7315 = vmatprep.subr.bf16.mxu0 %v9629_v41  ;;  %v5945_v41 = vld [vmem:[%s12685_s27 + $0x278] sm:$0xff] }
 0x16c   :  { %7317 = vmatpush1.bf16.msra.mxu0 %v9649_v4  ;;  %v7336_v4 = vpack.c.bf16 %v5940_v23, %v5938_v6  ;;  %v5977_v6 = vld [vmem:[%s12685_s27 + $0x378] sm:$0xff] }
 0x16d   :  { %7487 = vmatprep.subr.bf16.mxu0 %v7318_v36  ;;  %v5961_v36 = vld [vmem:[%s12685_s27 + $0x2f8] sm:$0xff]  ;;  %v7370_v23 = vpack.c.bf16 %v5977_v6, %v5975_v3  ;;  %v1800_v6 = vld [vmem:[%s12685_s27 + $0xa0] sm:$0xff] }
 0x16e   :  { %v7354_v16 = vpack.c.bf16 %v5961_v36, %v5959_v29 }
 0x16f   :  { %1743 = vmatmul.mubr.f32.vlgmr.msra.gmra.mrb[6].mxu0 %v9507_v46  ;;  %v5936_v46 = vld [vmem:[%s12685_s27 + $0x230] sm:$0xff] }
 0x170   :  { %7489 = vmatpush1.bf16.msra.mxu0 %v7320_v24  ;;  %v7332_v56 = vpack.c.bf16 %v5936_v46, %v5934_v38  ;;  %v5960_v24 = vld [vmem:[%s12685_s27 + $0x2f0] sm:$0xff]  ;;  %v5973_v38 = vld [vmem:[%s12685_s27 + $0x358] sm:$0xff] }
 0x171   :  { %7491 = vmatprep.subr.bf16.mxu0 %v7322_v35  ;;  %v7356_v31 = vpack.c.bf16 %v5960_v24, %v5958_v22  ;;  %v7358_v35 = vpack.c.bf16 %v5965_v30, %v5963_v25  ;;  %v7366_v46 = vpack.c.bf16 %v5973_v38, %v5971_v14  ;;  %v1788_v22 = vld [vmem:[%s12685_s27 + $0x40] sm:$0xff]  ;;  %v1790_v24 = vld [vmem:[%s12685_s27 + $0x50] sm:$0xff]  ;;  %v1793_v25 = vld [vmem:[%s12685_s27 + $0x68] sm:$0xff] }
 0x172   :  { %v1795_v30 = vld [vmem:[%s12685_s27 + $0x78] sm:$0xff]  ;;  %v1798_v14 = vld [vmem:[%s12685_s27 + $0x90] sm:$0xff]  ;;  %v1801_v38 = vld [vmem:[%s12685_s27 + $0xa8] sm:$0xff] }
 0x174   :  { %7493 = vmatpush1.bf16.msra.mxu0 %v7324_v43  ;;  %v5967_v43 = vld [vmem:[%s12685_s27 + $0x328] sm:$0xff] }
 0x175   :  { %7495 = vmatprep.subr.bf16.mxu0 %v7326_v49  ;;  %v5969_v49 = vld [vmem:[%s12685_s27 + $0x338] sm:$0xff] }
 0x182   :  { %v340_v44 = vpop.f32.mrb[0].mxu0  ;;  %v567_v50 = vpop.f32.mrb[0].mxu1 }
 0x183   :  { %v357_v51 = vadd.f32 %v350_v20, %v340_v44  ;;  %v342_v54 = vpop.f32.mrb[1].mxu0  ;;  %v584_v60 = vadd.f32 %v577_v21, %v567_v50  ;;  %v569_v61 = vpop.f32.mrb[1].mxu1  ;;  %v7328_v20 = vpack.c.bf16 %v5932_v48, %v5930_v53  ;;  %v7338_v21 = vpack.c.bf16 %v5945_v41, %v5943_v34  ;;  %v5947_v44 = vld [vmem:[%s12685_s27 + $0x288] sm:$0xff]  ;;  %v5974_v34 = vld [vmem:[%s12685_s27 + $0x360] sm:$0xff]  ;;  %v5976_v41 = vld [vmem:[%s12685_s27 + $0x370] sm:$0xff] }
 0x184   :  { %v358_v62 = vadd.f32 %v354_v27, %v342_v54  ;;  %v585_v63 = vadd.f32 %v581_v32, %v569_v61  ;;  %v5942_v27 = vld [vmem:[%s12685_s27 + $0x260] sm:$0xff]  ;;  %v5944_v32 = vld [vmem:[%s12685_s27 + $0x270] sm:$0xff]  ;;  %v7360_v53 = vpack.c.bf16 %v5964_v42, %v5962_v47  ;;  %v7362_v48 = vpack.c.bf16 %v5969_v49, %v5967_v43  ;;  %v1797_v43 = vld [vmem:[%s12685_s27 + $0x88] sm:$0xff] }
 0x185   :  { %v359_v5 = vmax.f32 %v357_v51, 0.0  ;;  %v586_v7 = vmax.f32 %v584_v60, 0.0  ;;  %7329 = vmatpush1.bf16.msra.mxu1 %v7328_v20  ;;  %7497 = vmatpush1.bf16.msra.mxu0 %v7328_v20  ;;  %v5949_v51 = vld [vmem:[%s12685_s27 + $0x298] sm:$0xff]  ;;  %v7340_v54 = vpack.c.bf16 %v5944_v32, %v5942_v27  ;;  %v1055_v60 = vrot.slane %v9699_v26, %v9626_v40  ;;  %v5966_v20 = vld [vmem:[%s12685_s27 + $0x320] sm:$0xff]  ;;  %v1794_v42 = vld [vmem:[%s12685_s27 + $0x70] sm:$0xff] }
 0x186   :  { %v360_v12 = vmax.f32 %v358_v62, 0.0  ;;  %v587_v13 = vmax.f32 %v585_v63, 0.0  ;;  %7331 = vmatprep.subr.bf16.mxu1 %v7330_v39  ;;  %7499 = vmatprep.subr.bf16.mxu0 %v7330_v39  ;;  %v7342_v61 = vpack.c.bf16 %v5949_v51, %v5947_v44  ;;  %v5946_v62 = vld [vmem:[%s12685_s27 + $0x280] sm:$0xff]  ;;  %v5948_v63 = vld [vmem:[%s12685_s27 + $0x290] sm:$0xff]  ;;  %v7364_v39 = vpack.c.bf16 %v5968_v9, %v5966_v20  ;;  %v1783_v27 = vld [vmem:[%s12685_s27 + $0x18] sm:$0xff] }
 0x187   :  { %361 = vst [vmem:[#allocation2] sm:$0xff] %v359_v5  ;;  %590 = vrot.lane.b32.xlu0 %v586_v7, %s8701_s4  ;;  %v5951_v5 = vld [vmem:[%s12685_s27 + $0x2a8] sm:$0xff]  ;;  %v5953_v7 = vld [vmem:[%s12685_s27 + $0x2b8] sm:$0xff]  ;;  %v7344_v8 = vpack.c.bf16 %v5948_v63, %v5946_v62  ;;  %v1792_v47 = vld [vmem:[%s12685_s27 + $0x60] sm:$0xff] }
 0x188   :  { %363 = vst.msk [vmem:[#allocation2 + $0x8] sm:$0xff] %vm362_vm0, %v360_v12  ;;  %v7346_v26 = vpack.c.bf16 %v5953_v7, %v5951_v5  ;;  %v1782_v7 = vld [vmem:[%s12685_s27 + $0x10] sm:$0xff]  ;;  %v1799_v49 = vld [vmem:[%s12685_s27 + $0x98] sm:$0xff]  ;;  %v1796_v9 = vld [vmem:[%s12685_s27 + $0x80] sm:$0xff] }
 0x189   :  { %7333 = vmatpush1.bf16.msra.mxu1 %v7332_v56  ;;  %7501 = vmatpush1.bf16.msra.mxu0 %v7332_v56  ;;  %v5970_v56 = vld [vmem:[%s12685_s27 + $0x340] sm:$0xff]  ;;  %v10025_v20 = vpack.c.bf16 %v1799_v49, %v1797_v43  ;;  %v1823_v43 = vld [vmem:[%s12685_s27 + $0x158] sm:$0xff] }
 0x18a   :  { %7335 = vmatprep.subr.bf16.mxu1 %v7334_v17  ;;  %7503 = vmatprep.subr.bf16.mxu0 %v7334_v17  ;;  %v7368_v17 = vpack.c.bf16 %v5972_v57, %v5970_v56  ;;  %v10045_v56 = vpack.c.bf16 %v1798_v14, %v1796_v9 }
 0x18b   :  { %592 = vrot.lane.b32.xlu0 %v587_v13, %s8701_s4 }
 0x18d   :  { %7337 = vmatpush1.bf16.msra.mxu1 %v7336_v4  ;;  %7505 = vmatpush1.bf16.msra.mxu0 %v7336_v4  ;;  %v7372_v4 = vpack.c.bf16 %v5976_v41, %v5974_v34  ;;  %v1807_v34 = vld [vmem:[%s12685_s27 + $0xd8] sm:$0xff] }
 0x18e   :  { %7339 = vmatprep.subr.bf16.mxu1 %v7338_v21  ;;  %7507 = vmatprep.subr.bf16.mxu0 %v7338_v21  ;;  %v1781_v21 = vld [vmem:[%s12685_s27 + $0x8] sm:$0xff] }
 0x18f   :  { %v7374_v32 = vpack.c.bf16 %v1783_v27, %v1781_v21 }
 0x191   :  { %7341 = vmatpush1.bf16.msra.mxu1 %v7340_v54  ;;  %7509 = vmatpush1.bf16.msra.mxu0 %v7340_v54 }
 0x192   :  { %7343 = vmatprep.subr.bf16.mxu1 %v7342_v61  ;;  %7511 = vmatprep.subr.bf16.mxu0 %v7342_v61  ;;  %v9932_v61 = vld [vmem:[%s12683_s14] sm:$0x3] }
 0x193   :  { %v1517_v62 = vrot.slane %v9932_v61, %v9626_v40 }
 0x195   :  { %7345 = vmatpush1.bf16.msra.mxu1 %v7344_v8  ;;  %7513 = vmatpush1.bf16.msra.mxu0 %v7344_v8  ;;  %v1787_v8 = vld [vmem:[%s12685_s27 + $0x38] sm:$0xff] }
 0x196   :  { %7347 = vmatprep.subr.bf16.mxu1 %v7346_v26  ;;  %7515 = vmatprep.subr.bf16.mxu0 %v7346_v26 }
 0x1c2   :  { %v806_v45 = vpop.f32.mrb[2].mxu0 }
 0x1c3   :  { %v823_v58 = vadd.f32 %v816_v15, %v806_v45  ;;  %v808_v59 = vpop.f32.mrb[3].mxu0  ;;  %v5952_v45 = vld [vmem:[%s12685_s27 + $0x2b0] sm:$0xff] }
 0x1c4   :  { %v9704_v1 = vadd.f32 %v820_v33, %v808_v59  ;;  %v9706_v2 = vpop.f32.mrb[2].mxu1  ;;  %v5950_v33 = vld [vmem:[%s12685_s27 + $0x2a0] sm:$0xff] }
 0x1c5   :  { %v825_v10 = vmax.f32 %v823_v58, 0.0  ;;  %v1047_v11 = vpop.f32.mrb[3].mxu1  ;;  %v1062_v15 = vadd.f32 %v1055_v60, %v9706_v2  ;;  %v5957_v58 = vld [vmem:[%s12685_s27 + $0x2d8] sm:$0xff]  ;;  %v7348_v2 = vpack.c.bf16 %v5952_v45, %v5950_v33 }
 0x1c6   :  { %v9708_v18 = vadd.f32 %v1059_v55, %v1047_v11  ;;  %v5955_v55 = vld [vmem:[%s12685_s27 + $0x2c8] sm:$0xff]  ;;  %v826_v51 = vmax.f32 %v9704_v1, 0.0  ;;  %v1780_v1 = vld [vmem:[%s12685_s27] sm:$0xff] }
 0x1c7   :  { %829 = vrot.lane.b32.xlu1 %v825_v10, %s8702_s22  ;;  %v1064_v10 = vmax.f32 %v1062_v15, 0.0  ;;  %v7350_v11 = vpack.c.bf16 %v5957_v58, %v5955_v55  ;;  %7349 = vmatpush1.bf16.msra.mxu1 %v7348_v2  ;;  %v9950_v33 = vpack.c.bf16 %v1782_v7, %v1780_v1  ;;  %v1784_v58 = vld [vmem:[%s12685_s27 + $0x20] sm:$0xff] }
 0x1c8   :  { %7517 = vmatpush1.bf16.msra.mxu0 %v7348_v2  ;;  %v1786_v2 = vld [vmem:[%s12685_s27 + $0x30] sm:$0xff] }
 0x1c9   :  { %7351 = vmatprep.subr.bf16.mxu1 %v7350_v11  ;;  %7519 = vmatprep.subr.bf16.mxu0 %v7350_v11  ;;  %v1789_v11 = vld [vmem:[%s12685_s27 + $0x48] sm:$0xff]  ;;  %v9972_v29 = vpack.c.bf16 %v1786_v2, %v1784_v58  ;;  %v1810_v58 = vld [vmem:[%s12685_s27 + $0xf0] sm:$0xff] }
 0x1ca   :  { %v1813_v2 = vld [vmem:[%s12685_s27 + $0x108] sm:$0xff] }
 0x1cb   :  { %7353 = vmatpush1.bf16.msra.mxu1 %v7352_v37 }
 0x1cc   :  { %7521 = vmatpush1.bf16.msra.mxu0 %v7352_v37  ;;  %7355 = vmatprep.subr.bf16.mxu1 %v7354_v16 }
 0x1cd   :  { %7523 = vmatprep.subr.bf16.mxu0 %v7354_v16  ;;  %v9981_v16 = vpack.c.bf16 %v1791_v19, %v1789_v11  ;;  %v1812_v19 = vld [vmem:[%s12685_s27 + $0x100] sm:$0xff] }
 0x1cf   :  { %7357 = vmatpush1.bf16.msra.mxu1 %v7356_v31 }
 0x1d0   :  { %7525 = vmatpush1.bf16.msra.mxu0 %v7356_v31  ;;  %7359 = vmatprep.subr.bf16.mxu1 %v7358_v35  ;;  %v10000_v31 = vpack.c.bf16 %v1790_v24, %v1788_v22  ;;  %v1817_v22 = vld [vmem:[%s12685_s27 + $0x128] sm:$0xff]  ;;  %v1819_v24 = vld [vmem:[%s12685_s27 + $0x138] sm:$0xff] }
 0x1d1   :  { %7527 = vmatprep.subr.bf16.mxu0 %v7358_v35  ;;  %v10003_v35 = vpack.c.bf16 %v1795_v30, %v1793_v25  ;;  %v1521_v25 = vrot.slane %v9932_v61, %v9640_v52  ;;  %v1821_v61 = vld [vmem:[%s12685_s27 + $0x148] sm:$0xff] }
 0x1d2   :  { %v10166_v14 = vpack.c.bf16 %v1823_v43, %v1821_v61  ;;  %v5989_v61 = vld [vmem:[%s12685_s27 + $0x3c8] sm:$0xff]  ;;  %v5991_v43 = vld [vmem:[%s12685_s27 + $0x3d8] sm:$0xff] }
 0x1d3   :  { %7361 = vmatpush1.bf16.msra.mxu1 %v7360_v53 }
 0x1d4   :  { %7529 = vmatpush1.bf16.msra.mxu0 %v7360_v53  ;;  %7363 = vmatprep.subr.bf16.mxu1 %v7362_v48  ;;  %v10020_v53 = vpack.c.bf16 %v1794_v42, %v1792_v47  ;;  %v1816_v47 = vld [vmem:[%s12685_s27 + $0x120] sm:$0xff]  ;;  %v1818_v42 = vld [vmem:[%s12685_s27 + $0x130] sm:$0xff] }
 0x1d5   :  { %7531 = vmatprep.subr.bf16.mxu0 %v7362_v48  ;;  %v10163_v9 = vpack.c.bf16 %v1818_v42, %v1816_v47  ;;  %v5986_v47 = vld [vmem:[%s12685_s27 + $0x3b0] sm:$0xff]  ;;  %v1778_v42 = vld [vmem:[#allocation2] sm:$0xff] }
 0x1d7   :  { %7365 = vmatpush1.bf16.msra.mxu1 %v7364_v39 }
 0x1d8   :  { %7533 = vmatpush1.bf16.msra.mxu0 %v7364_v39  ;;  %7367 = vmatprep.subr.bf16.mxu1 %v7366_v46  ;;  %v1803_v39 = vld [vmem:[%s12685_s27 + $0xb8] sm:$0xff] }
 0x1d9   :  { %7535 = vmatprep.subr.bf16.mxu0 %v7366_v46  ;;  %v1065_v46 = vmax.f32 %v9708_v18, 0.0  ;;  %v10048_v3 = vpack.c.bf16 %v1803_v39, %v1801_v38  ;;  %v1805_v18 = vld [vmem:[%s12685_s27 + $0xc8] sm:$0xff]  ;;  %v1820_v38 = vld [vmem:[%s12685_s27 + $0x140] sm:$0xff]  ;;  %v1822_v39 = vld [vmem:[%s12685_s27 + $0x150] sm:$0xff] }
 0x1db   :  { %7369 = vmatpush1.bf16.msra.mxu1 %v7368_v17 }
 0x1dc   :  { %7537 = vmatpush1.bf16.msra.mxu0 %v7368_v17  ;;  %7371 = vmatprep.subr.bf16.mxu1 %v7370_v23  ;;  %v1802_v17 = vld [vmem:[%s12685_s27 + $0xb0] sm:$0xff] }
 0x1dd   :  { %7539 = vmatprep.subr.bf16.mxu0 %v7370_v23  ;;  %v10071_v21 = vpack.c.bf16 %v1802_v17, %v1800_v6  ;;  %v1824_v17 = vld [vmem:[%s12685_s27 + $0x160] sm:$0xff] }
 0x1df   :  { %7373 = vmatpush1.bf16.msra.mxu1 %v7372_v4 }
 0x1e0   :  { %7541 = vmatpush1.bf16.msra.mxu0 %v7372_v4  ;;  %7375 = vmatprep.subr.bf16.mxu1 %v7374_v32  ;;  %v1286_v4 = vld [vmem:[%s12683_s14] sm:$0x3] }
 0x1e1   :  { %7543 = vmatprep.subr.bf16.mxu0 %v7374_v32  ;;  %v1291_v27 = vrot.slane %v1286_v4, %v9626_v40  ;;  %v1295_v32 = vrot.slane %v1286_v4, %v9640_v52 }
 0x1f9   :  { %v591_v50 = vpop.permute.xlu0 %590 }
 0x1fa   :  { %599 = vst.msk [vmem:[#allocation2 + $0x8] sm:$0xff] %vm598_vm1, %v591_v50 }
 0x1fd   :  { %v593_v12 = vpop.permute.xlu0 %592 }
 0x1fe   :  { %v9825_v13 = vsel %vm362_vm0, %v591_v50, %v593_v12  ;;  %602 = vst.msk [vmem:[#allocation2 + $0x18] sm:$0xff] %vm601_vm2, %v593_v12  ;;  %v1785_v12 = vld [vmem:[%s12685_s27 + $0x28] sm:$0xff] }
 0x1ff   :  { %1900 = vrot.lane.b32.xlu1 %v9825_v13, %s8703_s19  ;;  %v9953_v55 = vpack.c.bf16 %v1787_v8, %v1785_v12 }
 0x201   :  { %v9843_v59 = vld [vmem:[#allocation2 + $0x8] sm:$0xff] }
 0x202   :  { %v1281_v57 = vpop.f32.mrb[4].mxu0 }
 0x203   :  { %1898 = vrot.lane.b32.xlu1 %v9843_v59, %s8703_s19  ;;  %v1283_v23 = vpop.f32.mrb[5].mxu0  ;;  %v1298_v1 = vadd.f32 %v1291_v27, %v1281_v57  ;;  %v10183_v57 = vpack.c.bf16 %v1822_v39, %v1820_v38  ;;  %v1828_v27 = vld [vmem:[%s12685_s27 + $0x180] sm:$0xff]  ;;  %v10279_v38 = vpack.c.bf16 %v5991_v43, %v5989_v61  ;;  %v6005_v61 = vld [vmem:[%s12685_s27 + $0x448] sm:$0xff]  ;;  %v6007_v43 = vld [vmem:[%s12685_s27 + $0x458] sm:$0xff] }
 0x204   :  { %v1507_v54 = vpop.f32.mrb[4].mxu1  ;;  %v1299_v7 = vadd.f32 %v1295_v32, %v1283_v23  ;;  %v1826_v23 = vld [vmem:[%s12685_s27 + $0x170] sm:$0xff]  ;;  %v5988_v39 = vld [vmem:[%s12685_s27 + $0x3c0] sm:$0xff] }
 0x205   :  { %v9927_v60 = vpop.f32.mrb[5].mxu1  ;;  %v9936_v63 = vadd.f32 %v1517_v62, %v1507_v54  ;;  %v1806_v54 = vld [vmem:[%s12685_s27 + $0xd0] sm:$0xff]  ;;  %v1809_v62 = vld [vmem:[%s12685_s27 + $0xe8] sm:$0xff]  ;;  %v1300_v8 = vmax.f32 %v1298_v1, 0.0  ;;  %v1832_v1 = vld [vmem:[%s12685_s27 + $0x1a0] sm:$0xff] }
 0x206   :  { %v1525_v49 = vadd.f32 %v1521_v25, %v9927_v60  ;;  %v1825_v60 = vld [vmem:[%s12685_s27 + $0x168] sm:$0xff]  ;;  %v1830_v32 = vld [vmem:[%s12685_s27 + $0x190] sm:$0xff]  ;;  %v5984_v25 = vld [vmem:[%s12685_s27 + $0x3a0] sm:$0xff] }
 0x207   :  { %1068 = vrot.lane.b32.xlu1 %v1064_v10, %s8703_s19  ;;  %1302 = vst [vmem:[#allocation2 + $0x38] sm:$0xff] %v1300_v8  ;;  %v5981_v8 = vld [vmem:[%s12685_s27 + $0x388] sm:$0xff] }
 0x239   :  { %v830_v44 = vpop.permute.xlu1 %829 }
 0x23a   :  { %838 = vst.msk [vmem:[#allocation2 + $0x18] sm:$0xff] %vm837_vm3, %v830_v44 }
 0x241   :  { %v9921_v50 = vld [vmem:[#allocation2 + $0x18] sm:$0xff] }
 0x242   :  { %1902 = vrot.lane.b32.xlu0 %v9921_v50, %s8703_s19  ;;  %v10065_v41 = vpop.f32.mrb[6].mxu0 }
 0x246   :  { %831 = vrot.lane.b32.xlu0 %v826_v51, %s8702_s22  ;;  %v1804_v51 = vld [vmem:[%s12685_s27 + $0xc0] sm:$0xff] }
 0x247   :  { %v10095_v12 = vpack.c.bf16 %v1806_v54, %v1804_v51  ;;  %v1833_v51 = vld [vmem:[%s12685_s27 + $0x1a8] sm:$0xff]  ;;  %v1835_v54 = vld [vmem:[%s12685_s27 + $0x1b8] sm:$0xff] }
 0x271   :  { %v1901_v5 = vpop.permute.xlu1 %1900 }
 0x275   :  { %v1899_v15 = vpop.permute.xlu1 %1898 }
 0x276   :  { %v1904_v10 = vsel %vm840_vm4, %v1899_v15, %v1901_v5  ;;  %v1301_v15 = vmax.f32 %v1299_v7, 0.0  ;;  %v1834_v7 = vld [vmem:[%s12685_s27 + $0x1b0] sm:$0xff] }
 0x278   :  { %1303 = vst.msk [vmem:[#allocation2 + $0x40] sm:$0xff] %vm362_vm0, %v1301_v15  ;;  %v5983_v15 = vld [vmem:[%s12685_s27 + $0x398] sm:$0xff] }
 0x279   :  { %v9974_v36 = vpop.permute.xlu1 %1068 }
 0x2b4   :  { %v1903_v26 = vpop.permute.xlu0 %1902 }
 0x2b5   :  { %v1905_v45 = vsel %vm840_vm4, %v1901_v5, %v1903_v26  ;;  %v1811_v5 = vld [vmem:[%s12685_s27 + $0xf8] sm:$0xff] }
 0x2b6   :  { %5978 = vmatprep.mubr.msk.f32.mxu1 %vm362_vm0, %v1905_v45  ;;  %v10098_v26 = vpack.c.bf16 %v1811_v5, %v1809_v62  ;;  %v1808_v45 = vld [vmem:[%s12685_s27 + $0xe0] sm:$0xff]  ;;  %v10222_v62 = vpack.c.bf16 %v1830_v32, %v1828_v27  ;;  %v10225_v5 = vpack.c.bf16 %v1835_v54, %v1833_v51  ;;  %v5997_v27 = vld [vmem:[%s12685_s27 + $0x408] sm:$0xff]  ;;  %v5999_v32 = vld [vmem:[%s12685_s27 + $0x418] sm:$0xff] }
 0x2b7   :  { %1974 = vmatmul.mubr.f32.vlgmr.msra.gmra.mrb[6].mxu1 %v1904_v10  ;;  %v1815_v10 = vld [vmem:[%s12685_s27 + $0x118] sm:$0xff]  ;;  %v10118_v11 = vpack.c.bf16 %v1810_v58, %v1808_v45  ;;  %v10240_v45 = vpack.c.bf16 %v1834_v7, %v1832_v1  ;;  %v10243_v58 = vpack.c.bf16 %v5983_v15, %v5981_v8  ;;  %v10315_v54 = vpack.c.bf16 %v5999_v32, %v5997_v27  ;;  %v5996_v1 = vld [vmem:[%s12685_s27 + $0x400] sm:$0xff]  ;;  %v5998_v7 = vld [vmem:[%s12685_s27 + $0x410] sm:$0xff] }
 0x2b8   :  { %7377 = vmatpush1.bf16.msra.mxu1 %v9950_v33  ;;  %v832_v28 = vpop.permute.xlu0 %831  ;;  %5979 = vmatprep.mubr.msk.f32.mxu1 %vm362_vm0, %v9843_v59  ;;  %v6001_v8 = vld [vmem:[%s12685_s27 + $0x428] sm:$0xff]  ;;  %v6003_v15 = vld [vmem:[%s12685_s27 + $0x438] sm:$0xff] }
 0x2b9   :  { %v9977_v37 = vsel %vm601_vm2, %v830_v44, %v832_v28  ;;  %841 = vst.msk [vmem:[#allocation2 + $0x28] sm:$0xff] %vm840_vm4, %v832_v28  ;;  %7379 = vmatprep.subr.bf16.mxu1 %v9953_v55  ;;  %v10076_v44 = vpack.c.bf16 %v1807_v34, %v1805_v18  ;;  %v1814_v28 = vld [vmem:[%s12685_s27 + $0x110] sm:$0xff]  ;;  %v1831_v18 = vld [vmem:[%s12685_s27 + $0x198] sm:$0xff]  ;;  %v10202_v34 = vpack.c.bf16 %v1826_v23, %v1824_v17 }
 0x2ba   :  { %1076 = vst.msk [vmem:[#allocation2 + $0x28] sm:$0xff] %vm1075_vm5, %v9974_v36  ;;  %2340 = vrot.lane.b32.xlu0 %v9977_v37, %s8702_s22  ;;  %v10142_v30 = vpack.c.bf16 %v1814_v28, %v1812_v19  ;;  %v5985_v19 = vld [vmem:[%s12685_s27 + $0x3a8] sm:$0xff]  ;;  %v5987_v28 = vld [vmem:[%s12685_s27 + $0x3b8] sm:$0xff] }
 0x2bb   :  { %v6011_v27 = vld [vmem:[%s12685_s27 + $0x478] sm:$0xff] }
 0x2bc   :  { %7381 = vmatpush1.bf16.msra.mxu1 %v9972_v29 }
 0x2bd   :  { %7383 = vmatprep.subr.bf16.mxu1 %v9981_v16 }
 0x2be   :  { %2338 = vrot.lane.b32.xlu0 %v9921_v50, %s8702_s22 }
 0x2c0   :  { %7385 = vmatpush1.bf16.msra.mxu1 %v10000_v31 }
 0x2c1   :  { %7387 = vmatprep.subr.bf16.mxu1 %v10003_v35  ;;  %v10023_v48 = vld [vmem:[#allocation2 + $0x28] sm:$0xff] }
 0x2c2   :  { %2342 = vrot.lane.b32.xlu1 %v10023_v48, %s8702_s22  ;;  %2118 = vrot.lane.b32.xlu0 %v9977_v37, %s8702_s22 }
 0x2c4   :  { %7389 = vmatpush1.bf16.msra.mxu1 %v10020_v53 }
 0x2c5   :  { %7391 = vmatprep.subr.bf16.mxu1 %v10025_v20 }
 0x2c6   :  { %1070 = vrot.lane.b32.xlu1 %v1065_v46, %s8703_s19  ;;  %2116 = vrot.lane.b32.xlu0 %v9921_v50, %s8702_s22  ;;  %v1527_v46 = vmax.f32 %v1525_v49, 0.0  ;;  %v10276_v49 = vpack.c.bf16 %v5986_v47, %v5984_v25  ;;  %v10340_v25 = vpack.c.bf16 %v6003_v15, %v6001_v8  ;;  %v6000_v47 = vld [vmem:[%s12685_s27 + $0x420] sm:$0xff]  ;;  %v6010_v8 = vld [vmem:[%s12685_s27 + $0x470] sm:$0xff] }
 0x2c7   :  { %v6013_v15 = vld [vmem:[%s12685_s27 + $0x488] sm:$0xff] }
 0x2c8   :  { %7393 = vmatpush1.bf16.msra.mxu1 %v10045_v56 }
 0x2c9   :  { %7395 = vmatprep.subr.bf16.mxu1 %v10048_v3 }
 0x2ca   :  { %2120 = vrot.lane.b32.xlu1 %v10023_v48, %s8702_s22  ;;  %2426 = vrot.lane.b32.xlu0 %v9921_v50, %s8703_s19 }
 0x2cc   :  { %7397 = vmatpush1.bf16.msra.mxu1 %v10071_v21 }
 0x2cd   :  { %7399 = vmatprep.subr.bf16.mxu1 %v10076_v44 }
 0x2ce   :  { %2424 = vrot.lane.b32.xlu1 %v9825_v13, %s8703_s19  ;;  %2790 = vrot.lane.b32.xlu0 %v10023_v48, %s8701_s4  ;;  %v10121_v13 = vpack.c.bf16 %v1815_v10, %v1813_v2  ;;  %v5980_v2 = vld [vmem:[%s12685_s27 + $0x380] sm:$0xff]  ;;  %v5982_v10 = vld [vmem:[%s12685_s27 + $0x390] sm:$0xff] }
 0x2d0   :  { %7401 = vmatpush1.bf16.msra.mxu1 %v10095_v12 }
 0x2d1   :  { %7403 = vmatprep.subr.bf16.mxu1 %v10098_v26 }
 0x2d2   :  { %2422 = vrot.lane.b32.xlu1 %v9843_v59, %s8703_s19  ;;  %2564 = vrot.lane.b32.xlu0 %v10023_v48, %s8701_s4  ;;  %v10145_v59 = vpack.c.bf16 %v1819_v24, %v1817_v22  ;;  %v10258_v22 = vpack.c.bf16 %v5982_v10, %v5980_v2  ;;  %v10261_v24 = vpack.c.bf16 %v5987_v28, %v5985_v19  ;;  %v10332_v2 = vld [vmem:[%s12683_s14] sm:$0x3]  ;;  %v1746_v19 = vpop.f32.mrb[7].mxu0 }
 0x2d3   :  { %v10335_v10 = vpack.c.bf16 %v5998_v7, %v5996_v1  ;;  %v1758_v28 = vrot.slane %v10332_v2, %v9640_v52  ;;  %v6008_v7 = vld [vmem:[%s12685_s27 + $0x460] sm:$0xff]  ;;  %v6029_v52 = vld [vmem:[%s12685_s27 + $0x508] sm:$0xff] }
 0x2d4   :  { %7405 = vmatpush1.bf16.msra.mxu1 %v10118_v11 }
 0x2d5   :  { %7407 = vmatprep.subr.bf16.mxu1 %v10121_v13 }
 0x2d6   :  { %2873 = vrot.lane.b32.xlu0 %v9977_v37, %s8702_s22  ;;  %v1827_v37 = vld [vmem:[%s12685_s27 + $0x178] sm:$0xff] }
 0x2d7   :  { %v10186_v6 = vpack.c.bf16 %v1827_v37, %v1825_v60  ;;  %v5993_v60 = vld [vmem:[%s12685_s27 + $0x3e8] sm:$0xff]  ;;  %v5995_v37 = vld [vmem:[%s12685_s27 + $0x3f8] sm:$0xff] }
 0x2d8   :  { %7409 = vmatpush1.bf16.msra.mxu1 %v10142_v30  ;;  %v10297_v23 = vpack.c.bf16 %v5995_v37, %v5993_v60  ;;  %v10360_v60 = vpack.c.bf16 %v6007_v43, %v6005_v61  ;;  %v6004_v37 = vld [vmem:[%s12685_s27 + $0x440] sm:$0xff]  ;;  %v6014_v61 = vld [vmem:[%s12685_s27 + $0x490] sm:$0xff]  ;;  %v6017_v43 = vld [vmem:[%s12685_s27 + $0x4a8] sm:$0xff] }
 0x2d9   :  { %7411 = vmatprep.subr.bf16.mxu1 %v10145_v59 }
 0x2da   :  { %2871 = vrot.lane.b32.xlu0 %v9921_v50, %s8702_s22  ;;  %v1829_v50 = vld [vmem:[%s12685_s27 + $0x188] sm:$0xff] }
 0x2db   :  { %v10205_v4 = vpack.c.bf16 %v1831_v18, %v1829_v50  ;;  %v5992_v50 = vld [vmem:[%s12685_s27 + $0x3e0] sm:$0xff]  ;;  %v5994_v18 = vld [vmem:[%s12685_s27 + $0x3f0] sm:$0xff] }
 0x2dc   :  { %7413 = vmatpush1.bf16.msra.mxu1 %v10163_v9  ;;  %v10312_v51 = vpack.c.bf16 %v5994_v18, %v5992_v50  ;;  %v6006_v50 = vld [vmem:[%s12685_s27 + $0x450] sm:$0xff]  ;;  %v6009_v18 = vld [vmem:[%s12685_s27 + $0x468] sm:$0xff] }
 0x2dd   :  { %7415 = vmatprep.subr.bf16.mxu1 %v10166_v14  ;;  %v10375_v32 = vpack.c.bf16 %v6006_v50, %v6004_v37  ;;  %v10378_v1 = vpack.c.bf16 %v6011_v27, %v6009_v18  ;;  %v6019_v37 = vld [vmem:[%s12685_s27 + $0x4b8] sm:$0xff]  ;;  %v6016_v27 = vld [vmem:[%s12685_s27 + $0x4a0] sm:$0xff] }
 0x2de   :  { %1532 = vrot.lane.b32.xlu0 %v1527_v46, %s8701_s4  ;;  %v5990_v46 = vld [vmem:[%s12685_s27 + $0x3d0] sm:$0xff]  ;;  %v10414_v18 = vpack.c.bf16 %v6019_v37, %v6017_v43  ;;  %v6025_v37 = vld [vmem:[%s12685_s27 + $0x4e8] sm:$0xff] }
 0x2df   :  { %v10294_v17 = vpack.c.bf16 %v5990_v46, %v5988_v39  ;;  %v10354_v39 = vadd.f32 %v1758_v28, %v1746_v19  ;;  %v6015_v19 = vld [vmem:[%s12685_s27 + $0x498] sm:$0xff]  ;;  %v10393_v28 = vpack.c.bf16 %v6010_v8, %v6008_v7  ;;  %v6018_v7 = vld [vmem:[%s12685_s27 + $0x4b0] sm:$0xff]  ;;  %v6021_v8 = vld [vmem:[%s12685_s27 + $0x4c8] sm:$0xff] }
 0x2e0   :  { %7417 = vmatpush1.bf16.msra.mxu1 %v10183_v57  ;;  %12687 = vst [vmem:[#allocation19_spill] sm:$0xff] %v10414_v18  ;;  %v6022_v43 = vld [vmem:[%s12685_s27 + $0x4d0] sm:$0xff] }
 0x2e1   :  { %7419 = vmatprep.subr.bf16.mxu1 %v10186_v6  ;;  %12686 = vst [vmem:[#allocation18_spill] sm:$0xff] %v10354_v39  ;;  %v6030_v39 = vld [vmem:[%s12685_s27 + $0x510] sm:$0xff] }
 0x2e2   :  { %3306 = vrot.lane.b32.xlu0 %v10023_v48, %s8701_s4 }
 0x2e4   :  { %7421 = vmatpush1.bf16.msra.mxu1 %v10202_v34 }
 0x2e5   :  { %7423 = vmatprep.subr.bf16.mxu1 %v10205_v4 }
 0x2e8   :  { %7425 = vmatpush1.bf16.msra.mxu1 %v10222_v62 }
 0x2e9   :  { %7427 = vmatprep.subr.bf16.mxu1 %v10225_v5 }
 0x2ec   :  { %7429 = vmatpush1.bf16.msra.mxu1 %v10240_v45 }
 0x2ed   :  { %7431 = vmatprep.subr.bf16.mxu1 %v10243_v58 }
 0x2ef   :  { %2047 = vmatmul.mubr.f32.vlgmr.msra.gmra.mrb[6].mxu1 %v1778_v42  ;;  %v6002_v42 = vld [vmem:[%s12685_s27 + $0x430] sm:$0xff] }
 0x2f0   :  { %7433 = vmatpush1.bf16.msra.mxu1 %v10258_v22  ;;  %v10357_v46 = vpack.c.bf16 %v6002_v42, %v6000_v47  ;;  %v10396_v47 = vpack.c.bf16 %v6015_v19, %v6013_v15  ;;  %v6012_v42 = vld [vmem:[%s12685_s27 + $0x480] sm:$0xff]  ;;  %v6023_v15 = vld [vmem:[%s12685_s27 + $0x4d8] sm:$0xff]  ;;  %v10429_v19 = vpack.c.bf16 %v6018_v7, %v6016_v27 }
 0x2f1   :  { %7435 = vmatprep.subr.bf16.mxu1 %v10261_v24  ;;  %v10411_v50 = vpack.c.bf16 %v6014_v61, %v6012_v42  ;;  %v10432_v42 = vpack.c.bf16 %v6023_v15, %v6021_v8  ;;  %v6020_v61 = vld [vmem:[%s12685_s27 + $0x4c0] sm:$0xff]  ;;  %v6027_v27 = vld [vmem:[%s12685_s27 + $0x4f8] sm:$0xff] }
 0x2f2   :  { %12688 = vst [vmem:[#allocation20_spill] sm:$0xff] %v10429_v19  ;;  %v10447_v7 = vpack.c.bf16 %v6022_v43, %v6020_v61  ;;  %v10450_v8 = vpack.c.bf16 %v6027_v27, %v6025_v37  ;;  %v6024_v15 = vld [vmem:[%s12685_s27 + $0x4e0] sm:$0xff]  ;;  %v6031_v61 = vld [vmem:[%s12685_s27 + $0x518] sm:$0xff] }
 0x2f3   :  { %12689 = vst [vmem:[#allocation21_spill] sm:$0xff] %v10432_v42  ;;  %v10465_v43 = vpack.c.bf16 %v6026_v0, %v6024_v15  ;;  %v10468_v37 = vpack.c.bf16 %v6031_v61, %v6029_v52  ;;  %v6028_v27 = vld [vmem:[%s12685_s27 + $0x500] sm:$0xff]  ;;  %v6035_v0 = vld [vmem:[%s12685_s27 + $0x538] sm:$0xff] }
 0x2f4   :  { %7437 = vmatpush1.bf16.msra.mxu1 %v10276_v49  ;;  %12690 = vst [vmem:[#allocation22_spill] sm:$0xff] %v10447_v7  ;;  %12691 = vst [vmem:[#allocation23_spill] sm:$0xff] %v10450_v8  ;;  %v10483_v52 = vpack.c.bf16 %v6030_v39, %v6028_v27  ;;  %v6032_v61 = vld [vmem:[%s12685_s27 + $0x520] sm:$0xff]  ;;  %v6155_v39 = vld [vmem:[%s12685_s27 + $0x1d8] sm:$0xff] }
 0x2f5   :  { %7439 = vmatprep.subr.bf16.mxu1 %v10279_v38  ;;  %12692 = vst [vmem:[#allocation24_spill] sm:$0xff] %v10465_v43  ;;  %12693 = vst [vmem:[#allocation25_spill] sm:$0xff] %v10468_v37 }
 0x2f6   :  { %12694 = vst [vmem:[#allocation26_spill] sm:$0xff] %v10483_v52 }
 0x2f8   :  { %7441 = vmatpush1.bf16.msra.mxu1 %v10294_v17 }
 0x2f9   :  { %7443 = vmatprep.subr.bf16.mxu1 %v10297_v23 }
 0x2fc   :  { %7445 = vmatpush1.bf16.msra.mxu1 %v10312_v51 }
 0x2fd   :  { %7447 = vmatprep.subr.bf16.mxu1 %v10315_v54 }
 0x300   :  { %7449 = vmatpush1.bf16.msra.mxu1 %v10335_v10 }
 0x301   :  { %7451 = vmatprep.subr.bf16.mxu1 %v10340_v25 }
 0x304   :  { %7453 = vmatpush1.bf16.msra.mxu1 %v10357_v46 }
 0x305   :  { %7455 = vmatprep.subr.bf16.mxu1 %v10360_v60 }
 0x308   :  { %7457 = vmatpush1.bf16.msra.mxu1 %v10375_v32 }
 0x309   :  { %7459 = vmatprep.subr.bf16.mxu1 %v10378_v1 }
 0x30c   :  { %7461 = vmatpush1.bf16.msra.mxu1 %v10393_v28 }
 0x30d   :  { %7463 = vmatprep.subr.bf16.mxu1 %v10396_v47 }
 0x310   :  { %7465 = vmatpush1.bf16.msra.mxu1 %v10411_v50 }
 0x311   :  { %7467 = vmatprep.subr.bf16.mxu1 %v10414_v18 }
 0x314   :  { %7469 = vmatpush1.bf16.msra.mxu1 %v10429_v19 }
 0x315   :  { %7471 = vmatprep.subr.bf16.mxu1 %v10432_v42  ;;  %v6033_v42 = vld [vmem:[%s12685_s27 + $0x528] sm:$0xff] }
 0x316   :  { %v10486_v15 = vpack.c.bf16 %v6035_v0, %v6033_v42 }
 0x318   :  { %7473 = vmatpush1.bf16.msra.mxu1 %v10447_v7  ;;  %v6153_v7 = vld [vmem:[%s12685_s27 + $0x1c8] sm:$0xff] }
 0x319   :  { %7475 = vmatprep.subr.bf16.mxu1 %v10450_v8  ;;  %v6034_v8 = vld [vmem:[%s12685_s27 + $0x530] sm:$0xff]  ;;  %v10504_v27 = vpack.c.bf16 %v6155_v39, %v6153_v7  ;;  %v6152_v39 = vld [vmem:[%s12685_s27 + $0x1c0] sm:$0xff] }
 0x31a   :  { %v10501_v42 = vpack.c.bf16 %v6034_v8, %v6032_v61 }
 0x31b   :  { %12695 = vst [vmem:[#allocation27_spill] sm:$0xff] %v10504_v27 }
 0x31c   :  { %7477 = vmatpush1.bf16.msra.mxu1 %v10465_v43 }
 0x31d   :  { %7479 = vmatprep.subr.bf16.mxu1 %v10468_v37 }
 0x320   :  { %7481 = vmatpush1.bf16.msra.mxu1 %v10483_v52 }
 0x321   :  { %7483 = vmatprep.subr.bf16.mxu1 %v10486_v15 }
 0x324   :  { %7485 = vmatpush1.bf16.msra.mxu1 %v10501_v42 }
 0x325   :  { %7655 = vmatprep.subr.bf16.mxu1 %v10504_v27  ;;  %v6158_v27 = vld [vmem:[%s12685_s27 + $0x1f0] sm:$0xff] }
 0x32c   :  { %v2341_v0 = vpop.permute.xlu0 %2340 }
 0x330   :  { %v2339_v37 = vpop.permute.xlu0 %2338 }
 0x331   :  { %v2344_v52 = vsel %vm601_vm2, %v2339_v37, %v2341_v0 }
 0x334   :  { %v2343_v43 = vpop.permute.xlu1 %2342  ;;  %v2119_v19 = vpop.permute.xlu0 %2118 }
 0x335   :  { %v2345_v18 = vsel %vm601_vm2, %v2341_v0, %v2343_v43 }
 0x336   :  { %6093 = vmatprep.mubr.msk.f32.mxu0 %vm362_vm0, %v2345_v18  ;;  %v6154_v18 = vld [vmem:[%s12685_s27 + $0x1d0] sm:$0xff] }
 0x337   :  { %2414 = vmatmul.mubr.f32.vlgmr.msra.gmra.mrb[8].mxu0 %v2344_v52  ;;  %v10532_v37 = vpack.c.bf16 %v6154_v18, %v6152_v39  ;;  %v6161_v39 = vld [vmem:[%s12685_s27 + $0x208] sm:$0xff]  ;;  %v6163_v18 = vld [vmem:[%s12685_s27 + $0x218] sm:$0xff] }
 0x338   :  { %v1071_v8 = vpop.permute.xlu1 %1070  ;;  %7545 = vmatpush1.bf16.msra.mxu0 %v9950_v33  ;;  %v2117_v7 = vpop.permute.xlu0 %2116  ;;  %v6157_v33 = vld [vmem:[%s12685_s27 + $0x1e8] sm:$0xff] }
 0x339   :  { %v10514_v61 = vsel %vm840_vm4, %v9974_v36, %v1071_v8  ;;  %7547 = vmatprep.subr.bf16.mxu0 %v9953_v55  ;;  %v6159_v36 = vld [vmem:[%s12685_s27 + $0x1f8] sm:$0xff]  ;;  %v6156_v8 = vld [vmem:[%s12685_s27 + $0x1e0] sm:$0xff] }
 0x33a   :  { %2792 = vrot.lane.b32.xlu1 %v10514_v61, %s8701_s4  ;;  %v10536_v0 = vpack.c.bf16 %v6159_v36, %v6157_v33  ;;  %v10568_v36 = vpack.c.bf16 %v6163_v18, %v6161_v39 }
 0x33c   :  { %v2121_v55 = vpop.permute.xlu1 %2120  ;;  %7549 = vmatpush1.bf16.msra.mxu0 %v9972_v29  ;;  %v2427_v43 = vpop.permute.xlu0 %2426  ;;  %v2122_v29 = vsel %vm601_vm2, %v2117_v7, %v2119_v19  ;;  %v10562_v7 = vpack.c.bf16 %v6158_v27, %v6156_v8  ;;  %v1526_v27 = vmax.f32 %v9936_v63, 0.0 }
 0x33d   :  { %v2123_v52 = vsel %vm601_vm2, %v2119_v19, %v2121_v55  ;;  %7551 = vmatprep.subr.bf16.mxu0 %v9981_v16  ;;  %v1754_v16 = vrot.slane %v10332_v2, %v9626_v40  ;;  %v6160_v55 = vld [vmem:[%s12685_s27 + $0x200] sm:$0xff] }
 0x33e   :  { %6036 = vmatprep.mubr.msk.f32.mxu1 %vm362_vm0, %v2123_v52  ;;  %2566 = vrot.lane.b32.xlu1 %v10514_v61, %s8701_s4  ;;  %v6167_v52 = vld [vmem:[%s12685_s27 + $0x238] sm:$0xff] }
 0x33f   :  { %2192 = vmatmul.mubr.f32.vlgmr.msra.gmra.mrb[6].mxu1 %v2122_v29 }
 0x340   :  { %v10556_v33 = vpop.permute.xlu1 %2424  ;;  %7553 = vmatpush1.bf16.msra.mxu0 %v10000_v31  ;;  %v10559_v19 = vpop.permute.xlu0 %2790  ;;  %7657 = vmatpush1.bf16.msra.mxu1 %v10532_v37  ;;  %v6162_v31 = vld [vmem:[%s12685_s27 + $0x210] sm:$0xff] }
 0x341   :  { %v2429_v2 = vsel %vm840_vm4, %v10556_v33, %v2427_v43  ;;  %7555 = vmatprep.subr.bf16.mxu0 %v10003_v35  ;;  %7659 = vmatprep.subr.bf16.mxu1 %v10536_v0  ;;  %v1761_v35 = vadd.f32 %v1754_v16, %v10065_v41  ;;  %v6165_v43 = vld [vmem:[%s12685_s27 + $0x228] sm:$0xff]  ;;  %v10591_v63 = vpack.c.bf16 %v6162_v31, %v6160_v55  ;;  %v6164_v41 = vld [vmem:[%s12685_s27 + $0x220] sm:$0xff] }
 0x342   :  { %6094 = vmatprep.mubr.msk.f32.mxu0 %vm362_vm0, %v2429_v2  ;;  %2875 = vrot.lane.b32.xlu1 %v10023_v48, %s8702_s22  ;;  %v10595_v48 = vpack.c.bf16 %v6167_v52, %v6165_v43  ;;  %v6169_v16 = vld [vmem:[%s12685_s27 + $0x248] sm:$0xff]  ;;  %v6168_v55 = vld [vmem:[%s12685_s27 + $0x240] sm:$0xff] }
 0x343   :  { %v1763_v29 = vmax.f32 %v1761_v35, 0.0  ;;  %v6173_v31 = vld [vmem:[%s12685_s27 + $0x268] sm:$0xff]  ;;  %v6172_v52 = vld [vmem:[%s12685_s27 + $0x260] sm:$0xff] }
 0x344   :  { %7557 = vmatpush1.bf16.msra.mxu0 %v10020_v53  ;;  %v10588_v8 = vpop.permute.xlu0 %2564  ;;  %7661 = vmatpush1.bf16.msra.mxu1 %v10562_v7  ;;  %v6166_v53 = vld [vmem:[%s12685_s27 + $0x230] sm:$0xff] }
 0x345   :  { %7559 = vmatprep.subr.bf16.mxu0 %v10025_v20  ;;  %7663 = vmatprep.subr.bf16.mxu1 %v10568_v36  ;;  %v6171_v20 = vld [vmem:[%s12685_s27 + $0x258] sm:$0xff]  ;;  %v10614_v18 = vpack.c.bf16 %v6166_v53, %v6164_v41  ;;  %v6177_v41 = vld [vmem:[%s12685_s27 + $0x288] sm:$0xff] }
 0x346   :  { %1530 = vrot.lane.b32.xlu1 %v1526_v27, %s8701_s4  ;;  %v10618_v2 = vpack.c.bf16 %v6171_v20, %v6169_v16  ;;  %v6176_v16 = vld [vmem:[%s12685_s27 + $0x280] sm:$0xff]  ;;  %v6181_v20 = vld [vmem:[%s12685_s27 + $0x2a8] sm:$0xff] }
 0x348   :  { %7561 = vmatpush1.bf16.msra.mxu0 %v10045_v56  ;;  %v10611_v39 = vpop.permute.xlu0 %2873  ;;  %7665 = vmatpush1.bf16.msra.mxu1 %v10591_v63  ;;  %v6170_v56 = vld [vmem:[%s12685_s27 + $0x250] sm:$0xff] }
 0x349   :  { %7563 = vmatprep.subr.bf16.mxu0 %v10048_v3  ;;  %7667 = vmatprep.subr.bf16.mxu1 %v10595_v48  ;;  %v6175_v3 = vld [vmem:[%s12685_s27 + $0x278] sm:$0xff]  ;;  %v10637_v35 = vpack.c.bf16 %v6170_v56, %v6168_v55 }
 0x34a   :  { %1767 = vrot.lane.b32.xlu1 %v1763_v29, %s8702_s22  ;;  %v10641_v43 = vpack.c.bf16 %v6175_v3, %v6173_v31  ;;  %v6180_v31 = vld [vmem:[%s12685_s27 + $0x2a0] sm:$0xff]  ;;  %v6182_v3 = vld [vmem:[%s12685_s27 + $0x2b0] sm:$0xff] }
 0x34c   :  { %7565 = vmatpush1.bf16.msra.mxu0 %v10071_v21  ;;  %v10634_v27 = vpop.permute.xlu0 %2871  ;;  %7669 = vmatpush1.bf16.msra.mxu1 %v10614_v18  ;;  %v6174_v21 = vld [vmem:[%s12685_s27 + $0x270] sm:$0xff] }
 0x34d   :  { %7567 = vmatprep.subr.bf16.mxu0 %v10076_v44  ;;  %7671 = vmatprep.subr.bf16.mxu1 %v10618_v2  ;;  %v6179_v44 = vld [vmem:[%s12685_s27 + $0x298] sm:$0xff]  ;;  %v10661_v29 = vpack.c.bf16 %v6174_v21, %v6172_v52  ;;  %v10703_v52 = vpack.c.bf16 %v6182_v3, %v6180_v31 }
 0x34e   :  { %3308 = vrot.lane.b32.xlu1 %v10514_v61, %s8701_s4  ;;  %v10667_v61 = vpack.c.bf16 %v6179_v44, %v6177_v41  ;;  %v6184_v41 = vld [vmem:[%s12685_s27 + $0x2c0] sm:$0xff]  ;;  %v6186_v44 = vld [vmem:[%s12685_s27 + $0x2d0] sm:$0xff] }
 0x350   :  { %7569 = vmatpush1.bf16.msra.mxu0 %v10095_v12  ;;  %v10658_v53 = vpop.permute.xlu0 %1532  ;;  %7673 = vmatpush1.bf16.msra.mxu1 %v10637_v35  ;;  %v6178_v12 = vld [vmem:[%s12685_s27 + $0x290] sm:$0xff] }
 0x351   :  { %7571 = vmatprep.subr.bf16.mxu0 %v10098_v26  ;;  %1540 = vst.msk [vmem:[#allocation2 + $0x50] sm:$0xff] %vm601_vm2, %v10658_v53  ;;  %7675 = vmatprep.subr.bf16.mxu1 %v10641_v43  ;;  %v6183_v26 = vld [vmem:[%s12685_s27 + $0x2b8] sm:$0xff]  ;;  %v10683_v55 = vpack.c.bf16 %v6178_v12, %v6176_v16  ;;  %v10723_v16 = vpack.c.bf16 %v6186_v44, %v6184_v41 }
 0x352   :  { %v10687_v56 = vpack.c.bf16 %v6183_v26, %v6181_v20  ;;  %v6188_v20 = vld [vmem:[%s12685_s27 + $0x2e0] sm:$0xff]  ;;  %v6190_v26 = vld [vmem:[%s12685_s27 + $0x2f0] sm:$0xff] }
 0x353   :  { %v10743_v31 = vpack.c.bf16 %v6190_v26, %v6188_v20 }
 0x354   :  { %7573 = vmatpush1.bf16.msra.mxu0 %v10118_v11  ;;  %7677 = vmatpush1.bf16.msra.mxu1 %v10661_v29  ;;  %v6185_v11 = vld [vmem:[%s12685_s27 + $0x2c8] sm:$0xff] }
 0x355   :  { %7575 = vmatprep.subr.bf16.mxu0 %v10121_v13  ;;  %7679 = vmatprep.subr.bf16.mxu1 %v10667_v61  ;;  %v6187_v13 = vld [vmem:[%s12685_s27 + $0x2d8] sm:$0xff] }
 0x356   :  { %v10707_v21 = vpack.c.bf16 %v6187_v13, %v6185_v11  ;;  %v6192_v11 = vld [vmem:[%s12685_s27 + $0x300] sm:$0xff]  ;;  %v6194_v13 = vld [vmem:[%s12685_s27 + $0x310] sm:$0xff] }
 0x357   :  { %v10763_v41 = vpack.c.bf16 %v6194_v13, %v6192_v11  ;;  %v2423_v11 = vpop.permute.xlu1 %2422 }
 0x358   :  { %7577 = vmatpush1.bf16.msra.mxu0 %v10142_v30  ;;  %7681 = vmatpush1.bf16.msra.mxu1 %v10683_v55  ;;  %v6189_v30 = vld [vmem:[%s12685_s27 + $0x2e8] sm:$0xff] }
 0x359   :  { %7579 = vmatprep.subr.bf16.mxu0 %v10145_v59  ;;  %7683 = vmatprep.subr.bf16.mxu1 %v10687_v56  ;;  %v6191_v59 = vld [vmem:[%s12685_s27 + $0x2f8] sm:$0xff] }
 0x35a   :  { %v10727_v12 = vpack.c.bf16 %v6191_v59, %v6189_v30  ;;  %v6196_v30 = vld [vmem:[%s12685_s27 + $0x320] sm:$0xff]  ;;  %v6198_v59 = vld [vmem:[%s12685_s27 + $0x330] sm:$0xff] }
 0x35b   :  { %v10783_v20 = vpack.c.bf16 %v6198_v59, %v6196_v30  ;;  %v6206_v30 = vld [vmem:[%s12685_s27 + $0x370] sm:$0xff]  ;;  %v2676_v59 = vld [vmem:[%s12685_s27 + $0x8] sm:$0xff] }
 0x35c   :  { %7581 = vmatpush1.bf16.msra.mxu0 %v10163_v9  ;;  %7685 = vmatpush1.bf16.msra.mxu1 %v10703_v52  ;;  %v6193_v9 = vld [vmem:[%s12685_s27 + $0x308] sm:$0xff] }
 0x35d   :  { %7583 = vmatprep.subr.bf16.mxu0 %v10166_v14  ;;  %7687 = vmatprep.subr.bf16.mxu1 %v10707_v21  ;;  %v6195_v14 = vld [vmem:[%s12685_s27 + $0x318] sm:$0xff] }
 0x35e   :  { %v10747_v3 = vpack.c.bf16 %v6195_v14, %v6193_v9  ;;  %v6200_v9 = vld [vmem:[%s12685_s27 + $0x340] sm:$0xff]  ;;  %v6202_v14 = vld [vmem:[%s12685_s27 + $0x350] sm:$0xff] }
 0x35f   :  { %v10803_v13 = vpack.c.bf16 %v6202_v14, %v6200_v9  ;;  %v2686_v9 = vld [vmem:[%s12685_s27 + $0x58] sm:$0xff] }
 0x360   :  { %7585 = vmatpush1.bf16.msra.mxu0 %v10183_v57  ;;  %7689 = vmatpush1.bf16.msra.mxu1 %v10723_v16  ;;  %v6197_v57 = vld [vmem:[%s12685_s27 + $0x328] sm:$0xff] }
 0x361   :  { %7587 = vmatprep.subr.bf16.mxu0 %v10186_v6  ;;  %7691 = vmatprep.subr.bf16.mxu1 %v10727_v12  ;;  %v6199_v6 = vld [vmem:[%s12685_s27 + $0x338] sm:$0xff] }
 0x362   :  { %v10767_v44 = vpack.c.bf16 %v6199_v6, %v6197_v57  ;;  %v6204_v6 = vld [vmem:[%s12685_s27 + $0x360] sm:$0xff] }
 0x364   :  { %7589 = vmatpush1.bf16.msra.mxu0 %v10202_v34  ;;  %7693 = vmatpush1.bf16.msra.mxu1 %v10743_v31  ;;  %v6201_v34 = vld [vmem:[%s12685_s27 + $0x348] sm:$0xff] }
 0x365   :  { %7591 = vmatprep.subr.bf16.mxu0 %v10205_v4  ;;  %7695 = vmatprep.subr.bf16.mxu1 %v10747_v3  ;;  %v6203_v4 = vld [vmem:[%s12685_s27 + $0x358] sm:$0xff] }
 0x366   :  { %v10787_v26 = vpack.c.bf16 %v6203_v4, %v6201_v34  ;;  %v10825_v34 = vpack.c.bf16 %v6206_v30, %v6204_v6  ;;  %v2684_v4 = vld [vmem:[%s12685_s27 + $0x48] sm:$0xff] }
 0x367   :  { %v2688_v30 = vld [vmem:[%s12685_s27 + $0x68] sm:$0xff] }
 0x368   :  { %7593 = vmatpush1.bf16.msra.mxu0 %v10222_v62  ;;  %7697 = vmatpush1.bf16.msra.mxu1 %v10763_v41  ;;  %v6205_v62 = vld [vmem:[%s12685_s27 + $0x368] sm:$0xff] }
 0x369   :  { %7595 = vmatprep.subr.bf16.mxu0 %v10225_v5  ;;  %7699 = vmatprep.subr.bf16.mxu1 %v10767_v44  ;;  %v6207_v5 = vld [vmem:[%s12685_s27 + $0x378] sm:$0xff] }
 0x36a   :  { %v10807_v57 = vpack.c.bf16 %v6207_v5, %v6205_v62  ;;  %v10894_v5 = vpack.c.bf16 %v2686_v9, %v2684_v4 }
 0x36c   :  { %7597 = vmatpush1.bf16.msra.mxu0 %v10240_v45  ;;  %7701 = vmatpush1.bf16.msra.mxu1 %v10783_v20  ;;  %v2428_v45 = vsel %vm840_vm4, %v2423_v11, %v10556_v33  ;;  %v2685_v11 = vld [vmem:[%s12685_s27 + $0x50] sm:$0xff] }
 0x36d   :  { %7599 = vmatprep.subr.bf16.mxu0 %v10243_v58  ;;  %7703 = vmatprep.subr.bf16.mxu1 %v10787_v26  ;;  %v2678_v58 = vld [vmem:[%s12685_s27 + $0x18] sm:$0xff] }
 0x36e   :  { %v10829_v33 = vpack.c.bf16 %v2678_v58, %v2676_v59 }
 0x36f   :  { %2498 = vmatmul.mubr.f32.vlgmr.msra.gmra.mrb[8].mxu0 %v2428_v45  ;;  %v2690_v45 = vld [vmem:[%s12685_s27 + $0x78] sm:$0xff] }
 0x370   :  { %7601 = vmatpush1.bf16.msra.mxu0 %v10258_v22  ;;  %7705 = vmatpush1.bf16.msra.mxu1 %v10803_v13  ;;  %v12696_v22 = vld [vmem:[#allocation19_spill] sm:$0xff] }
 0x371   :  { %7603 = vmatprep.subr.bf16.mxu0 %v10261_v24  ;;  %7707 = vmatprep.subr.bf16.mxu1 %v10807_v57  ;;  %v12697_v24 = vld [vmem:[#allocation20_spill] sm:$0xff] }
 0x374   :  { %7605 = vmatpush1.bf16.msra.mxu0 %v10276_v49  ;;  %7709 = vmatpush1.bf16.msra.mxu1 %v10825_v34  ;;  %v12698_v49 = vld [vmem:[#allocation21_spill] sm:$0xff] }
 0x375   :  { %7607 = vmatprep.subr.bf16.mxu0 %v10279_v38  ;;  %7711 = vmatprep.subr.bf16.mxu1 %v10829_v33  ;;  %v12699_v38 = vld [vmem:[#allocation22_spill] sm:$0xff] }
 0x378   :  { %7609 = vmatpush1.bf16.msra.mxu0 %v10294_v17  ;;  %v12700_v17 = vld [vmem:[#allocation23_spill] sm:$0xff] }
 0x379   :  { %7611 = vmatprep.subr.bf16.mxu0 %v10297_v23  ;;  %v12701_v23 = vld [vmem:[#allocation24_spill] sm:$0xff] }
 0x37c   :  { %7613 = vmatpush1.bf16.msra.mxu0 %v10312_v51  ;;  %v12702_v51 = vld [vmem:[#allocation25_spill] sm:$0xff] }
 0x37d   :  { %7615 = vmatprep.subr.bf16.mxu0 %v10315_v54  ;;  %v12703_v54 = vld [vmem:[#allocation26_spill] sm:$0xff] }
 0x380   :  { %7617 = vmatpush1.bf16.msra.mxu0 %v10335_v10  ;;  %v12704_v10 = vld [vmem:[#allocation27_spill] sm:$0xff] }
 0x381   :  { %7619 = vmatprep.subr.bf16.mxu0 %v10340_v25  ;;  %v2675_v25 = vld [vmem:[%s12685_s27] sm:$0xff] }
 0x384   :  { %7621 = vmatpush1.bf16.msra.mxu0 %v10357_v46  ;;  %v2677_v46 = vld [vmem:[%s12685_s27 + $0x10] sm:$0xff] }
 0x385   :  { %7623 = vmatprep.subr.bf16.mxu0 %v10360_v60  ;;  %v2680_v60 = vld [vmem:[%s12685_s27 + $0x28] sm:$0xff] }
 0x388   :  { %7625 = vmatpush1.bf16.msra.mxu0 %v10375_v32  ;;  %v2682_v32 = vld [vmem:[%s12685_s27 + $0x38] sm:$0xff] }
 0x389   :  { %7627 = vmatprep.subr.bf16.mxu0 %v10378_v1  ;;  %v10871_v1 = vpack.c.bf16 %v2677_v46, %v2675_v25 }
 0x38c   :  { %7629 = vmatpush1.bf16.msra.mxu0 %v10393_v28 }
 0x38d   :  { %7631 = vmatprep.subr.bf16.mxu0 %v10396_v47  ;;  %v10873_v47 = vpack.c.bf16 %v2682_v32, %v2680_v60  ;;  %v2695_v60 = vld [vmem:[%s12685_s27 + $0xa0] sm:$0xff]  ;;  %v2697_v32 = vld [vmem:[%s12685_s27 + $0xb0] sm:$0xff] }
 0x390   :  { %7633 = vmatpush1.bf16.msra.mxu0 %v10411_v50  ;;  %v2679_v50 = vld [vmem:[%s12685_s27 + $0x20] sm:$0xff] }
 0x391   :  { %7635 = vmatprep.subr.bf16.mxu0 %v12696_v22  ;;  %v2687_v22 = vld [vmem:[%s12685_s27 + $0x60] sm:$0xff] }
 0x394   :  { %7637 = vmatpush1.bf16.msra.mxu0 %v12697_v24  ;;  %v2689_v24 = vld [vmem:[%s12685_s27 + $0x70] sm:$0xff] }
 0x395   :  { %7639 = vmatprep.subr.bf16.mxu0 %v12698_v49  ;;  %v2692_v49 = vld [vmem:[%s12685_s27 + $0x88] sm:$0xff] }
 0x398   :  { %7641 = vmatpush1.bf16.msra.mxu0 %v12699_v38  ;;  %v10936_v38 = vpack.c.bf16 %v2689_v24, %v2687_v22  ;;  %v2707_v24 = vld [vmem:[%s12685_s27 + $0x100] sm:$0xff] }
 0x399   :  { %7643 = vmatprep.subr.bf16.mxu0 %v12700_v17 }
 0x39c   :  { %7645 = vmatpush1.bf16.msra.mxu0 %v12701_v23 }
 0x39d   :  { %7647 = vmatprep.subr.bf16.mxu0 %v12702_v51  ;;  %v2691_v51 = vld [vmem:[%s12685_s27 + $0x80] sm:$0xff] }
 0x3a0   :  { %7649 = vmatpush1.bf16.msra.mxu0 %v12703_v54  ;;  %v2693_v54 = vld [vmem:[%s12685_s27 + $0x90] sm:$0xff] }
 0x3a1   :  { %7651 = vmatprep.subr.bf16.mxu0 %v10486_v15  ;;  %v2681_v15 = vld [vmem:[%s12685_s27 + $0x30] sm:$0xff]  ;;  %v10960_v25 = vpack.c.bf16 %v2693_v54, %v2691_v51  ;;  %v2718_v54 = vld [vmem:[%s12685_s27 + $0x158] sm:$0xff] }
 0x3a2   :  { %v10891_v14 = vpack.c.bf16 %v2681_v15, %v2679_v50  ;;  %v2699_v15 = vld [vmem:[%s12685_s27 + $0xc0] sm:$0xff]  ;;  %v2713_v51 = vld [vmem:[%s12685_s27 + $0x130] sm:$0xff] }
 0x3a4   :  { %7653 = vmatpush1.bf16.msra.mxu0 %v10501_v42 }
 0x3a5   :  { %7823 = vmatprep.subr.bf16.mxu0 %v12704_v10  ;;  %v2696_v10 = vld [vmem:[%s12685_s27 + $0xa8] sm:$0xff] }
 0x3ac   :  { %v2793_v28 = vpop.permute.xlu1 %2792 }
 0x3ad   :  { %v2794_v42 = vsel %vm362_vm0, %v10559_v19, %v2793_v28  ;;  %6208 = vmatprep.mubr.msk.f32.mxu1 %vm362_vm0, %v2793_v28  ;;  %v2683_v19 = vld [vmem:[%s12685_s27 + $0x40] sm:$0xff]  ;;  %v10984_v28 = vpack.c.bf16 %v2697_v32, %v2695_v60  ;;  %v2722_v60 = vld [vmem:[%s12685_s27 + $0x178] sm:$0xff] }
 0x3ae   :  { %2863 = vmatmul.mubr.f32.vlgmr.msra.gmra.mrb[8].mxu1 %v2794_v42  ;;  %v10913_v59 = vpack.c.bf16 %v2685_v11, %v2683_v19  ;;  %v2701_v42 = vld [vmem:[%s12685_s27 + $0xd0] sm:$0xff]  ;;  %v2703_v19 = vld [vmem:[%s12685_s27 + $0xe0] sm:$0xff] }
 0x3af   :  { %7713 = vmatpush1.bf16.msra.mxu1 %v10871_v1  ;;  %v11010_v9 = vpack.c.bf16 %v2701_v42, %v2699_v15  ;;  %v2705_v11 = vld [vmem:[%s12685_s27 + $0xf0] sm:$0xff]  ;;  %v2726_v15 = vld [vmem:[%s12685_s27 + $0x198] sm:$0xff] }
 0x3b0   :  { %v2567_v62 = vpop.permute.xlu1 %2566  ;;  %7715 = vmatprep.subr.bf16.mxu1 %v10873_v47 }
 0x3b1   :  { %v2568_v6 = vsel %vm362_vm0, %v10588_v8, %v2567_v62  ;;  %6151 = vmatprep.mubr.msk.f32.mxu0 %vm362_vm0, %v2567_v62  ;;  %v10917_v8 = vpack.c.bf16 %v2690_v45, %v2688_v30  ;;  %v12705_v30 = vld [vmem:[#allocation18_spill] sm:$0xff] }
 0x3b2   :  { %2637 = vmatmul.mubr.f32.vlgmr.msra.gmra.mrb[8].mxu0 %v2568_v6  ;;  %v1764_v45 = vmax.f32 %v12705_v30, 0.0 }
 0x3b3   :  { %7717 = vmatpush1.bf16.msra.mxu1 %v10891_v14  ;;  %7825 = vmatpush1.bf16.msra.mxu0 %v10532_v37 }
 0x3b4   :  { %v2876_v58 = vpop.permute.xlu1 %2875  ;;  %7719 = vmatprep.subr.bf16.mxu1 %v10894_v5  ;;  %7827 = vmatprep.subr.bf16.mxu0 %v10536_v0  ;;  %v2694_v0 = vld [vmem:[%s12685_s27 + $0x98] sm:$0xff] }
 0x3b5   :  { %v2878_v37 = vsel %vm601_vm2, %v10611_v39, %v2876_v58  ;;  %v10940_v23 = vpack.c.bf16 %v2694_v0, %v2692_v49  ;;  %v11033_v58 = vpack.c.bf16 %v2705_v11, %v2703_v19  ;;  %v2730_v19 = vld [vmem:[%s12685_s27 + $0x1b8] sm:$0xff] }
 0x3b6   :  { %6209 = vmatprep.mubr.msk.f32.mxu1 %vm362_vm0, %v2878_v37  ;;  %v2709_v37 = vld [vmem:[%s12685_s27 + $0x110] sm:$0xff] }
 0x3b7   :  { %7721 = vmatpush1.bf16.msra.mxu1 %v10913_v59  ;;  %7829 = vmatpush1.bf16.msra.mxu0 %v10562_v7  ;;  %v11055_v49 = vpack.c.bf16 %v2709_v37, %v2707_v24  ;;  %v6212_v24 = vld [vmem:[%s12685_s27 + $0x390] sm:$0xff]  ;;  %v6217_v37 = vld [vmem:[%s12685_s27 + $0x3b8] sm:$0xff] }
 0x3b8   :  { %v1531_v17 = vpop.permute.xlu1 %1530  ;;  %7723 = vmatprep.subr.bf16.mxu1 %v10917_v8  ;;  %7831 = vmatprep.subr.bf16.mxu0 %v10568_v36  ;;  %v2698_v36 = vld [vmem:[%s12685_s27 + $0xb8] sm:$0xff] }
 0x3b9   :  { %v1534_v7 = vsel %vm362_vm0, %v1531_v17, %v10658_v53  ;;  %1538 = vst.msk [vmem:[#allocation2 + $0x40] sm:$0xff] %vm598_vm1, %v1531_v17  ;;  %v10966_v53 = vpack.c.bf16 %v2698_v36, %v2696_v10  ;;  %v2711_v17 = vld [vmem:[%s12685_s27 + $0x120] sm:$0xff]  ;;  %v2717_v36 = vld [vmem:[%s12685_s27 + $0x150] sm:$0xff] }
 0x3ba   :  { %3449 = vrot.lane.b32.xlu0 %v1534_v7, %s8703_s19  ;;  %v2715_v10 = vld [vmem:[%s12685_s27 + $0x140] sm:$0xff] }
 0x3bb   :  { %7725 = vmatpush1.bf16.msra.mxu1 %v10936_v38  ;;  %7833 = vmatpush1.bf16.msra.mxu0 %v10591_v63  ;;  %v2700_v63 = vld [vmem:[%s12685_s27 + $0xc8] sm:$0xff] }
 0x3bc   :  { %v10962_v46 = vpop.permute.xlu1 %1767  ;;  %7727 = vmatprep.subr.bf16.mxu1 %v10940_v23  ;;  %7835 = vmatprep.subr.bf16.mxu0 %v10595_v48  ;;  %v2702_v48 = vld [vmem:[%s12685_s27 + $0xd8] sm:$0xff] }
 0x3bd   :  { %1775 = vst.msk [vmem:[#allocation2 + $0x50] sm:$0xff] %vm837_vm3, %v10962_v46  ;;  %v10988_v50 = vpack.c.bf16 %v2702_v48, %v2700_v63  ;;  %v2719_v63 = vld [vmem:[%s12685_s27 + $0x160] sm:$0xff]  ;;  %v2721_v48 = vld [vmem:[%s12685_s27 + $0x170] sm:$0xff] }
 0x3bf   :  { %7729 = vmatpush1.bf16.msra.mxu1 %v10960_v25  ;;  %7837 = vmatpush1.bf16.msra.mxu0 %v10614_v18  ;;  %v2704_v18 = vld [vmem:[%s12685_s27 + $0xe8] sm:$0xff] }
 0x3c0   :  { %7731 = vmatprep.subr.bf16.mxu1 %v10966_v53  ;;  %7839 = vmatprep.subr.bf16.mxu0 %v10618_v2  ;;  %v10996_v4 = vld [vmem:[#allocation2 + $0x40] sm:$0xff]  ;;  %v2706_v2 = vld [vmem:[%s12685_s27 + $0xf8] sm:$0xff] }
 0x3c1   :  { %3447 = vrot.lane.b32.xlu0 %v10996_v4, %s8703_s19  ;;  %6323 = vmatprep.mubr.msk.f32.mxu0 %vm362_vm0, %v10996_v4  ;;  %v11014_v62 = vpack.c.bf16 %v2706_v2, %v2704_v18  ;;  %v2723_v18 = vld [vmem:[%s12685_s27 + $0x180] sm:$0xff]  ;;  %v2725_v2 = vld [vmem:[%s12685_s27 + $0x190] sm:$0xff] }
 0x3c3   :  { %7733 = vmatpush1.bf16.msra.mxu1 %v10984_v28  ;;  %7841 = vmatpush1.bf16.msra.mxu0 %v10637_v35  ;;  %v2708_v35 = vld [vmem:[%s12685_s27 + $0x108] sm:$0xff] }
 0x3c4   :  { %7735 = vmatprep.subr.bf16.mxu1 %v10988_v50  ;;  %7843 = vmatprep.subr.bf16.mxu0 %v10641_v43  ;;  %v3617_v6 = vld [vmem:[#allocation2 + $0x50] sm:$0xff]  ;;  %v2710_v43 = vld [vmem:[%s12685_s27 + $0x118] sm:$0xff] }
 0x3c5   :  { %3681 = vrot.lane.b32.xlu0 %v3617_v6, %s8703_s19  ;;  %3451 = vrot.lane.b32.xlu1 %v3617_v6, %s8703_s19  ;;  %v11037_v22 = vpack.c.bf16 %v2710_v43, %v2708_v35  ;;  %v2727_v6 = vld [vmem:[%s12685_s27 + $0x1a0] sm:$0xff]  ;;  %v2729_v35 = vld [vmem:[%s12685_s27 + $0x1b0] sm:$0xff] }
 0x3c6   :  { %v6213_v43 = vld [vmem:[%s12685_s27 + $0x398] sm:$0xff] }
 0x3c7   :  { %7737 = vmatpush1.bf16.msra.mxu1 %v11010_v9  ;;  %7845 = vmatpush1.bf16.msra.mxu0 %v10661_v29  ;;  %v2712_v29 = vld [vmem:[%s12685_s27 + $0x128] sm:$0xff] }
 0x3c8   :  { %7739 = vmatprep.subr.bf16.mxu1 %v11014_v62  ;;  %7847 = vmatprep.subr.bf16.mxu0 %v10667_v61  ;;  %v2714_v61 = vld [vmem:[%s12685_s27 + $0x138] sm:$0xff] }
 0x3c9   :  { %1769 = vrot.lane.b32.xlu0 %v1764_v45, %s8702_s22  ;;  %3679 = vrot.lane.b32.xlu1 %v1534_v7, %s8703_s19  ;;  %v11059_v0 = vpack.c.bf16 %v2714_v61, %v2712_v29  ;;  %v6210_v45 = vld [vmem:[%s12685_s27 + $0x380] sm:$0xff] }
 0x3ca   :  { %v6214_v61 = vld [vmem:[%s12685_s27 + $0x3a0] sm:$0xff] }
 0x3cb   :  { %7741 = vmatpush1.bf16.msra.mxu1 %v11033_v58  ;;  %7849 = vmatpush1.bf16.msra.mxu0 %v10683_v55  ;;  %v2716_v55 = vld [vmem:[%s12685_s27 + $0x148] sm:$0xff] }
 0x3cc   :  { %7743 = vmatprep.subr.bf16.mxu1 %v11037_v22  ;;  %7851 = vmatprep.subr.bf16.mxu0 %v10687_v56  ;;  %v11077_v56 = vpack.c.bf16 %v2713_v51, %v2711_v17  ;;  %v11081_v7 = vpack.c.bf16 %v2718_v54, %v2716_v55  ;;  %v6216_v17 = vld [vmem:[%s12685_s27 + $0x3b0] sm:$0xff]  ;;  %v6219_v51 = vld [vmem:[%s12685_s27 + $0x3c8] sm:$0xff] }
 0x3cd   :  { %3677 = vrot.lane.b32.xlu1 %v10996_v4, %s8703_s19  ;;  %v11200_v55 = vpack.c.bf16 %v6216_v17, %v6214_v61  ;;  %v6220_v54 = vld [vmem:[%s12685_s27 + $0x3d0] sm:$0xff]  ;;  %v6238_v61 = vld [vmem:[%s12685_s27 + $0x460] sm:$0xff] }
 0x3ce   :  { %v6240_v17 = vld [vmem:[%s12685_s27 + $0x470] sm:$0xff] }
 0x3cf   :  { %7745 = vmatpush1.bf16.msra.mxu1 %v11055_v49  ;;  %7853 = vmatpush1.bf16.msra.mxu0 %v10703_v52  ;;  %v2720_v52 = vld [vmem:[%s12685_s27 + $0x168] sm:$0xff] }
 0x3d0   :  { %7747 = vmatprep.subr.bf16.mxu1 %v11059_v0  ;;  %7855 = vmatprep.subr.bf16.mxu0 %v10707_v21  ;;  %v11097_v21 = vpack.c.bf16 %v2717_v36, %v2715_v10  ;;  %v11101_v32 = vpack.c.bf16 %v2722_v60, %v2720_v52  ;;  %v11212_v10 = vld [vmem:[#allocation2 + $0x38] sm:$0xff]  ;;  %v11223_v36 = vpop.permute.xlu1 %3308 }
 0x3d3   :  { %7749 = vmatpush1.bf16.msra.mxu1 %v11077_v56  ;;  %7857 = vmatpush1.bf16.msra.mxu0 %v10723_v16  ;;  %v2724_v16 = vld [vmem:[%s12685_s27 + $0x188] sm:$0xff] }
 0x3d4   :  { %7751 = vmatprep.subr.bf16.mxu1 %v11081_v7  ;;  %7859 = vmatprep.subr.bf16.mxu0 %v10727_v12  ;;  %v11117_v12 = vpack.c.bf16 %v2721_v48, %v2719_v63  ;;  %v11121_v42 = vpack.c.bf16 %v2726_v15, %v2724_v16  ;;  %v6222_v63 = vld [vmem:[%s12685_s27 + $0x3e0] sm:$0xff]  ;;  %v6224_v48 = vld [vmem:[%s12685_s27 + $0x3f0] sm:$0xff]  ;;  %v6229_v16 = vld [vmem:[%s12685_s27 + $0x418] sm:$0xff] }
 0x3d5   :  { %v11249_v15 = vpack.c.bf16 %v6224_v48, %v6222_v63  ;;  %v6248_v63 = vld [vmem:[%s12685_s27 + $0x4b0] sm:$0xff]  ;;  %v6253_v48 = vld [vmem:[%s12685_s27 + $0x4d8] sm:$0xff] }
 0x3d7   :  { %7753 = vmatpush1.bf16.msra.mxu1 %v11097_v21  ;;  %7861 = vmatpush1.bf16.msra.mxu0 %v10743_v31  ;;  %v2728_v31 = vld [vmem:[%s12685_s27 + $0x1a8] sm:$0xff] }
 0x3d8   :  { %7755 = vmatprep.subr.bf16.mxu1 %v11101_v32  ;;  %7863 = vmatprep.subr.bf16.mxu0 %v10747_v3  ;;  %v11137_v3 = vpack.c.bf16 %v2725_v2, %v2723_v18  ;;  %v11141_v11 = vpack.c.bf16 %v2730_v19, %v2728_v31  ;;  %v6228_v2 = vld [vmem:[%s12685_s27 + $0x410] sm:$0xff]  ;;  %v6233_v31 = vld [vmem:[%s12685_s27 + $0x438] sm:$0xff] }
 0x3db   :  { %7757 = vmatpush1.bf16.msra.mxu1 %v11117_v12  ;;  %7865 = vmatpush1.bf16.msra.mxu0 %v10763_v41  ;;  %v6211_v41 = vld [vmem:[%s12685_s27 + $0x388] sm:$0xff] }
 0x3dc   :  { %7759 = vmatprep.subr.bf16.mxu1 %v11121_v42  ;;  %7867 = vmatprep.subr.bf16.mxu0 %v10767_v44  ;;  %v11157_v44 = vpack.c.bf16 %v2729_v35, %v2727_v6  ;;  %v11161_v30 = vpack.c.bf16 %v6213_v43, %v6211_v41  ;;  %v6230_v6 = vld [vmem:[%s12685_s27 + $0x420] sm:$0xff]  ;;  %v6232_v35 = vld [vmem:[%s12685_s27 + $0x430] sm:$0xff]  ;;  %v6237_v41 = vld [vmem:[%s12685_s27 + $0x458] sm:$0xff] }
 0x3df   :  { %7761 = vmatpush1.bf16.msra.mxu1 %v11137_v3  ;;  %7869 = vmatpush1.bf16.msra.mxu0 %v10783_v20  ;;  %v6215_v20 = vld [vmem:[%s12685_s27 + $0x3a8] sm:$0xff] }
 0x3e0   :  { %7763 = vmatprep.subr.bf16.mxu1 %v11141_v11  ;;  %7871 = vmatprep.subr.bf16.mxu0 %v10787_v26  ;;  %v11177_v26 = vpack.c.bf16 %v6212_v24, %v6210_v45  ;;  %v11181_v29 = vpack.c.bf16 %v6217_v37, %v6215_v20  ;;  %v6234_v45 = vld [vmem:[%s12685_s27 + $0x440] sm:$0xff]  ;;  %v6236_v24 = vld [vmem:[%s12685_s27 + $0x450] sm:$0xff]  ;;  %v6241_v20 = vld [vmem:[%s12685_s27 + $0x478] sm:$0xff] }
 0x3e3   :  { %7765 = vmatpush1.bf16.msra.mxu1 %v11157_v44  ;;  %7873 = vmatpush1.bf16.msra.mxu0 %v10803_v13  ;;  %v2877_v13 = vsel %vm601_vm2, %v10634_v27, %v10611_v39  ;;  %v6218_v27 = vld [vmem:[%s12685_s27 + $0x3c0] sm:$0xff] }
 0x3e4   :  { %7767 = vmatprep.subr.bf16.mxu1 %v11161_v30  ;;  %7875 = vmatprep.subr.bf16.mxu0 %v10807_v57  ;;  %v6221_v57 = vld [vmem:[%s12685_s27 + $0x3d8] sm:$0xff]  ;;  %v11227_v52 = vpack.c.bf16 %v6220_v54, %v6218_v27  ;;  %v6244_v27 = vld [vmem:[%s12685_s27 + $0x490] sm:$0xff] }
 0x3e5   :  { %v11204_v39 = vpack.c.bf16 %v6221_v57, %v6219_v51  ;;  %v6242_v57 = vld [vmem:[%s12685_s27 + $0x480] sm:$0xff]  ;;  %v6249_v54 = vld [vmem:[%s12685_s27 + $0x4b8] sm:$0xff] }
 0x3e6   :  { %2947 = vmatmul.mubr.f32.vlgmr.msra.gmra.mrb[8].mxu1 %v2877_v13  ;;  %v6245_v13 = vld [vmem:[%s12685_s27 + $0x498] sm:$0xff] }
 0x3e7   :  { %7769 = vmatpush1.bf16.msra.mxu1 %v11177_v26  ;;  %7877 = vmatpush1.bf16.msra.mxu0 %v10825_v34  ;;  %v6223_v34 = vld [vmem:[%s12685_s27 + $0x3e8] sm:$0xff] }
 0x3e8   :  { %7771 = vmatprep.subr.bf16.mxu1 %v11181_v29  ;;  %7879 = vmatprep.subr.bf16.mxu0 %v10829_v33  ;;  %v6225_v33 = vld [vmem:[%s12685_s27 + $0x3f8] sm:$0xff] }
 0x3e9   :  { %6266 = vmatprep.mubr.msk.f32.mxu1 %vm362_vm0, %v10996_v4  ;;  %v11232_v60 = vpack.c.bf16 %v6225_v33, %v6223_v34  ;;  %v6246_v33 = vld [vmem:[%s12685_s27 + $0x4a0] sm:$0xff] }
 0x3ea   :  { %3298 = vmatmul.mubr.f32.vlgmr.msra.gmra.mrb[10].mxu0 %v11212_v10 }
 0x3eb   :  { %7773 = vmatpush1.bf16.msra.mxu1 %v11200_v55  ;;  %7881 = vmatpush1.bf16.msra.mxu0 %v10871_v1  ;;  %v6227_v1 = vld [vmem:[%s12685_s27 + $0x408] sm:$0xff] }
 0x3ec   :  { %6324 = vmatprep.mubr.msk.f32.mxu0 %vm362_vm0, %v11223_v36  ;;  %7775 = vmatprep.subr.bf16.mxu1 %v11204_v39  ;;  %v11253_v18 = vpack.c.bf16 %v6229_v16, %v6227_v1  ;;  %v6250_v16 = vld [vmem:[%s12685_s27 + $0x4c0] sm:$0xff] }
 0x3ed   :  { %7883 = vmatprep.subr.bf16.mxu0 %v10873_v47  ;;  %v6226_v47 = vld [vmem:[%s12685_s27 + $0x400] sm:$0xff] }
 0x3ef   :  { %7777 = vmatpush1.bf16.msra.mxu1 %v11227_v52  ;;  %7885 = vmatpush1.bf16.msra.mxu0 %v10891_v14  ;;  %v6231_v14 = vld [vmem:[%s12685_s27 + $0x428] sm:$0xff] }
 0x3f0   :  { %7779 = vmatprep.subr.bf16.mxu1 %v11232_v60  ;;  %7887 = vmatprep.subr.bf16.mxu0 %v10894_v5  ;;  %v11269_v5 = vpack.c.bf16 %v6228_v2, %v6226_v47  ;;  %v11273_v19 = vpack.c.bf16 %v6233_v31, %v6231_v14  ;;  %v6252_v47 = vld [vmem:[%s12685_s27 + $0x4d0] sm:$0xff]  ;;  %v6257_v2 = vld [vmem:[%s12685_s27 + $0x4f8] sm:$0xff]  ;;  %v2200_v14 = vld [vmem:[%s12638_s6] sm:$0x3] }
 0x3f3   :  { %7781 = vmatpush1.bf16.msra.mxu1 %v11249_v15  ;;  %7889 = vmatpush1.bf16.msra.mxu0 %v10913_v59  ;;  %v6235_v59 = vld [vmem:[%s12685_s27 + $0x448] sm:$0xff] }
 0x3f4   :  { %7783 = vmatprep.subr.bf16.mxu1 %v11253_v18  ;;  %7891 = vmatprep.subr.bf16.mxu0 %v10917_v8  ;;  %v11289_v8 = vpack.c.bf16 %v6232_v35, %v6230_v6  ;;  %v11293_v43 = vpack.c.bf16 %v6237_v41, %v6235_v59  ;;  %v6254_v6 = vld [vmem:[%s12685_s27 + $0x4e0] sm:$0xff]  ;;  %v6259_v35 = vld [vmem:[%s12685_s27 + $0x508] sm:$0xff]  ;;  %v6261_v59 = vld [vmem:[%s12685_s27 + $0x518] sm:$0xff] }
 0x3f7   :  { %7785 = vmatpush1.bf16.msra.mxu1 %v11269_v5  ;;  %7893 = vmatpush1.bf16.msra.mxu0 %v10936_v38  ;;  %v6239_v38 = vld [vmem:[%s12685_s27 + $0x468] sm:$0xff] }
 0x3f8   :  { %7787 = vmatprep.subr.bf16.mxu1 %v11273_v19  ;;  %7895 = vmatprep.subr.bf16.mxu0 %v10940_v23  ;;  %v11309_v23 = vpack.c.bf16 %v6236_v24, %v6234_v45  ;;  %v11313_v37 = vpack.c.bf16 %v6241_v20, %v6239_v38  ;;  %v12706_v45 = vld [vmem:[#allocation17_spill] sm:$0xff]  ;;  %v11418_v38 = vpack.c.bf16 %v6261_v59, %v6259_v35  ;;  %v6258_v20 = vld [vmem:[%s12685_s27 + $0x500] sm:$0xff]  ;;  %v6391_v35 = vld [vmem:[%s12685_s27 + $0x208] sm:$0xff]  ;;  %v3307_v59 = vpop.permute.xlu0 %3306 }
 0x3f9   :  { %v2209_v24 = vrot.slane %v2200_v14, %v12706_v45 }
 0x3fb   :  { %7789 = vmatpush1.bf16.msra.mxu1 %v11289_v8  ;;  %7897 = vmatpush1.bf16.msra.mxu0 %v10960_v25  ;;  %v6243_v25 = vld [vmem:[%s12685_s27 + $0x488] sm:$0xff] }
 0x3fc   :  { %7791 = vmatprep.subr.bf16.mxu1 %v11293_v43  ;;  %7899 = vmatprep.subr.bf16.mxu0 %v10966_v53  ;;  %v11329_v53 = vpack.c.bf16 %v6240_v17, %v6238_v61  ;;  %v11333_v51 = vpack.c.bf16 %v6245_v13, %v6243_v25  ;;  %v6260_v61 = vld [vmem:[%s12685_s27 + $0x510] sm:$0xff]  ;;  %v6265_v17 = vld [vmem:[%s12685_s27 + $0x538] sm:$0xff] }
 0x3ff   :  { %7793 = vmatpush1.bf16.msra.mxu1 %v11309_v23  ;;  %7901 = vmatpush1.bf16.msra.mxu0 %v10984_v28  ;;  %v6247_v28 = vld [vmem:[%s12685_s27 + $0x4a8] sm:$0xff] }
 0x400   :  { %7795 = vmatprep.subr.bf16.mxu1 %v11313_v37  ;;  %7903 = vmatprep.subr.bf16.mxu0 %v10988_v50  ;;  %v11349_v50 = vpack.c.bf16 %v6244_v27, %v6242_v57  ;;  %v11353_v34 = vpack.c.bf16 %v6249_v54, %v6247_v28  ;;  %v11434_v57 = vpack.c.bf16 %v6260_v61, %v6258_v20  ;;  %v6262_v54 = vld [vmem:[%s12685_s27 + $0x520] sm:$0xff]  ;;  %v6392_v20 = vld [vmem:[%s12685_s27 + $0x210] sm:$0xff] }
 0x403   :  { %7797 = vmatpush1.bf16.msra.mxu1 %v11329_v53  ;;  %7905 = vmatpush1.bf16.msra.mxu0 %v11010_v9  ;;  %v6251_v9 = vld [vmem:[%s12685_s27 + $0x4c8] sm:$0xff] }
 0x404   :  { %7799 = vmatprep.subr.bf16.mxu1 %v11333_v51  ;;  %7907 = vmatprep.subr.bf16.mxu0 %v11014_v62  ;;  %v11369_v62 = vpack.c.bf16 %v6248_v63, %v6246_v33  ;;  %v11373_v1 = vpack.c.bf16 %v6253_v48, %v6251_v9  ;;  %v6264_v33 = vld [vmem:[%s12685_s27 + $0x530] sm:$0xff]  ;;  %v6385_v9 = vld [vmem:[%s12685_s27 + $0x1d8] sm:$0xff] }
 0x405   :  { %v11454_v48 = vpack.c.bf16 %v6264_v33, %v6262_v54  ;;  %v6403_v54 = vld [vmem:[%s12685_s27 + $0x268] sm:$0xff] }
 0x407   :  { %7801 = vmatpush1.bf16.msra.mxu1 %v11349_v50  ;;  %7909 = vmatpush1.bf16.msra.mxu0 %v11033_v58  ;;  %v6255_v58 = vld [vmem:[%s12685_s27 + $0x4e8] sm:$0xff] }
 0x408   :  { %7803 = vmatprep.subr.bf16.mxu1 %v11353_v34  ;;  %7911 = vmatprep.subr.bf16.mxu0 %v11037_v22  ;;  %v11389_v22 = vpack.c.bf16 %v6252_v47, %v6250_v16  ;;  %v11396_v31 = vpack.c.bf16 %v6257_v2, %v6255_v58  ;;  %v6382_v47 = vld [vmem:[%s12685_s27 + $0x1c0] sm:$0xff]  ;;  %v6384_v58 = vld [vmem:[%s12685_s27 + $0x1d0] sm:$0xff]  ;;  %v6389_v2 = vld [vmem:[%s12685_s27 + $0x1f8] sm:$0xff] }
 0x40b   :  { %7805 = vmatpush1.bf16.msra.mxu1 %v11369_v62  ;;  %7913 = vmatpush1.bf16.msra.mxu0 %v11055_v49  ;;  %v6256_v49 = vld [vmem:[%s12685_s27 + $0x4f0] sm:$0xff] }
 0x40c   :  { %7807 = vmatprep.subr.bf16.mxu1 %v11373_v1  ;;  %7915 = vmatprep.subr.bf16.mxu0 %v11059_v0  ;;  %v2205_v0 = vrot.slane %v2200_v14, %v9626_v40  ;;  %v11413_v41 = vpack.c.bf16 %v6256_v49, %v6254_v6  ;;  %v6386_v6 = vld [vmem:[%s12685_s27 + $0x1e0] sm:$0xff]  ;;  %v6388_v49 = vld [vmem:[%s12685_s27 + $0x1f0] sm:$0xff] }
 0x40f   :  { %7809 = vmatpush1.bf16.msra.mxu1 %v11389_v22  ;;  %7917 = vmatpush1.bf16.msra.mxu0 %v11077_v56  ;;  %v6263_v56 = vld [vmem:[%s12685_s27 + $0x528] sm:$0xff] }
 0x410   :  { %7811 = vmatprep.subr.bf16.mxu1 %v11396_v31  ;;  %7919 = vmatprep.subr.bf16.mxu0 %v11081_v7  ;;  %v11438_v28 = vpack.c.bf16 %v6265_v17, %v6263_v56  ;;  %v6396_v17 = vld [vmem:[%s12685_s27 + $0x230] sm:$0xff] }
 0x412   :  { %v2193_v25 = vpop.f32.mrb[6].mxu1 }
 0x413   :  { %v2212_v7 = vadd.f32 %v2205_v0, %v2193_v25  ;;  %v2195_v13 = vpop.f32.mrb[7].mxu1  ;;  %7813 = vmatpush1.bf16.msra.mxu1 %v11413_v41  ;;  %7921 = vmatpush1.bf16.msra.mxu0 %v11097_v21  ;;  %v6383_v21 = vld [vmem:[%s12685_s27 + $0x1c8] sm:$0xff] }
 0x414   :  { %v2213_v27 = vadd.f32 %v2209_v24, %v2195_v13  ;;  %7815 = vmatprep.subr.bf16.mxu1 %v11418_v38  ;;  %7923 = vmatprep.subr.bf16.mxu0 %v11101_v32  ;;  %v7990_v16 = vpack.c.bf16 %v6385_v9, %v6383_v21  ;;  %v6390_v24 = vld [vmem:[%s12685_s27 + $0x200] sm:$0xff]  ;;  %v6399_v25 = vld [vmem:[%s12685_s27 + $0x248] sm:$0xff]  ;;  %v6404_v21 = vld [vmem:[%s12685_s27 + $0x270] sm:$0xff] }
 0x415   :  { %v2214_v63 = vmax.f32 %v2212_v7, 0.0  ;;  %v8000_v61 = vpack.c.bf16 %v6392_v20, %v6390_v24  ;;  %v6398_v13 = vld [vmem:[%s12685_s27 + $0x240] sm:$0xff] }
 0x416   :  { %v2215_v32 = vmax.f32 %v2213_v27, 0.0  ;;  %v6400_v27 = vld [vmem:[%s12685_s27 + $0x250] sm:$0xff] }
 0x417   :  { %2216 = vst [vmem:[#allocation3] sm:$0xff] %v2214_v63  ;;  %7817 = vmatpush1.bf16.msra.mxu1 %v11434_v57  ;;  %7925 = vmatpush1.bf16.msra.mxu0 %v11117_v12  ;;  %v6387_v12 = vld [vmem:[%s12685_s27 + $0x1e8] sm:$0xff]  ;;  %v6402_v63 = vld [vmem:[%s12685_s27 + $0x260] sm:$0xff] }
 0x418   :  { %2217 = vst.msk [vmem:[#allocation3 + $0x8] sm:$0xff] %vm840_vm4, %v2215_v32  ;;  %7819 = vmatprep.subr.bf16.mxu1 %v11438_v28  ;;  %7927 = vmatprep.subr.bf16.mxu0 %v11121_v42  ;;  %v7992_v42 = vpack.c.bf16 %v6384_v58, %v6382_v47  ;;  %v7994_v14 = vpack.c.bf16 %v6389_v2, %v6387_v12  ;;  %v6406_v47 = vld [vmem:[%s12685_s27 + $0x280] sm:$0xff]  ;;  %v6408_v58 = vld [vmem:[%s12685_s27 + $0x290] sm:$0xff]  ;;  %v6411_v12 = vld [vmem:[%s12685_s27 + $0x2a8] sm:$0xff] }
 0x419   :  { %v8012_v32 = vpack.c.bf16 %v6404_v21, %v6402_v63  ;;  %v6432_v63 = vld [vmem:[%s12685_s27 + $0x350] sm:$0xff]  ;;  %v6435_v21 = vld [vmem:[%s12685_s27 + $0x368] sm:$0xff] }
 0x41b   :  { %7821 = vmatpush1.bf16.msra.mxu1 %v11454_v48  ;;  %7929 = vmatpush1.bf16.msra.mxu0 %v11137_v3  ;;  %v6393_v3 = vld [vmem:[%s12685_s27 + $0x218] sm:$0xff] }
 0x41c   :  { %7931 = vmatprep.subr.bf16.mxu0 %v11141_v11  ;;  %7991 = vmatprep.subr.bf16.mxu1 %v7990_v16  ;;  %v7996_v11 = vpack.c.bf16 %v6388_v49, %v6386_v6  ;;  %v7998_v0 = vpack.c.bf16 %v6393_v3, %v6391_v35  ;;  %v6412_v6 = vld [vmem:[%s12685_s27 + $0x2b0] sm:$0xff]  ;;  %v6417_v49 = vld [vmem:[%s12685_s27 + $0x2d8] sm:$0xff] }
 0x41e   :  { %3079 = vmatmul.mubr.f32.vlgmr.msra.gmra.mrb[8].mxu1 %v11212_v10  ;;  %v3310_v10 = vsel %vm362_vm0, %v3307_v59, %v11223_v36  ;;  %v6394_v36 = vld [vmem:[%s12685_s27 + $0x220] sm:$0xff] }
 0x41f   :  { %7933 = vmatpush1.bf16.msra.mxu0 %v11157_v44  ;;  %7993 = vmatpush1.bf16.msra.mxu1 %v7992_v42  ;;  %v6395_v44 = vld [vmem:[%s12685_s27 + $0x228] sm:$0xff]  ;;  %v6414_v59 = vld [vmem:[%s12685_s27 + $0x2c0] sm:$0xff] }
 0x420   :  { %7935 = vmatprep.subr.bf16.mxu0 %v11161_v30  ;;  %7995 = vmatprep.subr.bf16.mxu1 %v7994_v14  ;;  %v6397_v30 = vld [vmem:[%s12685_s27 + $0x238] sm:$0xff]  ;;  %v6410_v14 = vld [vmem:[%s12685_s27 + $0x2a0] sm:$0xff] }
 0x421   :  { %v8002_v56 = vpack.c.bf16 %v6397_v30, %v6395_v44 }
 0x422   :  { %3379 = vmatmul.mubr.f32.vlgmr.msra.gmra.mrb[10].mxu0 %v3310_v10 }
 0x423   :  { %7937 = vmatpush1.bf16.msra.mxu0 %v11177_v26  ;;  %7997 = vmatpush1.bf16.msra.mxu1 %v7996_v11  ;;  %v6401_v26 = vld [vmem:[%s12685_s27 + $0x258] sm:$0xff] }
 0x424   :  { %7939 = vmatprep.subr.bf16.mxu0 %v11181_v29  ;;  %7999 = vmatprep.subr.bf16.mxu1 %v7998_v0  ;;  %v8004_v29 = vpack.c.bf16 %v6396_v17, %v6394_v36  ;;  %v8006_v7 = vpack.c.bf16 %v6401_v26, %v6399_v25  ;;  %v6416_v0 = vld [vmem:[%s12685_s27 + $0x2d0] sm:$0xff]  ;;  %v6422_v26 = vld [vmem:[%s12685_s27 + $0x300] sm:$0xff] }
 0x425   :  { %v8024_v20 = vpack.c.bf16 %v6416_v0, %v6414_v59  ;;  %v3572_v59 = vld [vmem:[%s12685_s27 + $0x60] sm:$0xff]  ;;  %v3574_v0 = vld [vmem:[%s12685_s27 + $0x70] sm:$0xff] }
 0x427   :  { %7941 = vmatpush1.bf16.msra.mxu0 %v11200_v55  ;;  %8001 = vmatpush1.bf16.msra.mxu1 %v8000_v61  ;;  %v6405_v55 = vld [vmem:[%s12685_s27 + $0x278] sm:$0xff] }
 0x428   :  { %7943 = vmatprep.subr.bf16.mxu0 %v11204_v39  ;;  %8003 = vmatprep.subr.bf16.mxu1 %v8002_v56  ;;  %v8008_v39 = vpack.c.bf16 %v6400_v27, %v6398_v13  ;;  %v8010_v33 = vpack.c.bf16 %v6405_v55, %v6403_v54  ;;  %v6418_v56 = vld [vmem:[%s12685_s27 + $0x2e0] sm:$0xff]  ;;  %v6428_v54 = vld [vmem:[%s12685_s27 + $0x330] sm:$0xff]  ;;  %v6431_v55 = vld [vmem:[%s12685_s27 + $0x348] sm:$0xff] }
 0x429   :  { %v6426_v27 = vld [vmem:[%s12685_s27 + $0x320] sm:$0xff] }
 0x42b   :  { %7945 = vmatpush1.bf16.msra.mxu0 %v11227_v52  ;;  %8005 = vmatpush1.bf16.msra.mxu1 %v8004_v29  ;;  %v6407_v52 = vld [vmem:[%s12685_s27 + $0x288] sm:$0xff]  ;;  %v6424_v29 = vld [vmem:[%s12685_s27 + $0x310] sm:$0xff] }
 0x42c   :  { %7947 = vmatprep.subr.bf16.mxu0 %v11232_v60  ;;  %8007 = vmatprep.subr.bf16.mxu1 %v8006_v7  ;;  %v11539_v9 = vpop.permute.xlu0 %3449  ;;  %v6409_v60 = vld [vmem:[%s12685_s27 + $0x298] sm:$0xff]  ;;  %v6427_v7 = vld [vmem:[%s12685_s27 + $0x328] sm:$0xff] }
 0x42d   :  { %v8014_v16 = vpack.c.bf16 %v6409_v60, %v6407_v52  ;;  %v6434_v60 = vld [vmem:[%s12685_s27 + $0x360] sm:$0xff] }
 0x42f   :  { %7949 = vmatpush1.bf16.msra.mxu0 %v11249_v15  ;;  %8009 = vmatpush1.bf16.msra.mxu1 %v8008_v39  ;;  %v6413_v15 = vld [vmem:[%s12685_s27 + $0x2b8] sm:$0xff] }
 0x430   :  { %7951 = vmatprep.subr.bf16.mxu0 %v11253_v18  ;;  %8011 = vmatprep.subr.bf16.mxu1 %v8010_v33  ;;  %v8016_v18 = vpack.c.bf16 %v6408_v58, %v6406_v47  ;;  %v8018_v42 = vpack.c.bf16 %v6413_v15, %v6411_v12  ;;  %v6430_v33 = vld [vmem:[%s12685_s27 + $0x340] sm:$0xff]  ;;  %v3562_v15 = vld [vmem:[%s12685_s27 + $0x10] sm:$0xff] }
 0x431   :  { %v3560_v12 = vld [vmem:[%s12685_s27] sm:$0xff] }
 0x433   :  { %7953 = vmatpush1.bf16.msra.mxu0 %v11269_v5  ;;  %8013 = vmatpush1.bf16.msra.mxu1 %v8012_v32  ;;  %v11562_v2 = vpop.permute.xlu0 %3447  ;;  %v6415_v5 = vld [vmem:[%s12685_s27 + $0x2c8] sm:$0xff]  ;;  %v6436_v32 = vld [vmem:[%s12685_s27 + $0x370] sm:$0xff] }
 0x434   :  { %7955 = vmatprep.subr.bf16.mxu0 %v11273_v19  ;;  %8015 = vmatprep.subr.bf16.mxu1 %v8014_v16  ;;  %v8020_v19 = vpack.c.bf16 %v6412_v6, %v6410_v14  ;;  %v8022_v11 = vpack.c.bf16 %v6417_v49, %v6415_v5  ;;  %v3561_v16 = vld [vmem:[%s12685_s27 + $0x8] sm:$0xff]  ;;  %v3564_v6 = vld [vmem:[%s12685_s27 + $0x20] sm:$0xff]  ;;  %v3566_v5 = vld [vmem:[%s12685_s27 + $0x30] sm:$0xff] }
 0x435   :  { %v3571_v49 = vld [vmem:[%s12685_s27 + $0x58] sm:$0xff] }
 0x437   :  { %7957 = vmatpush1.bf16.msra.mxu0 %v11289_v8  ;;  %8017 = vmatpush1.bf16.msra.mxu1 %v8016_v18  ;;  %v3682_v35 = vpop.permute.xlu0 %3681  ;;  %v3452_v3 = vpop.permute.xlu1 %3451  ;;  %v6419_v8 = vld [vmem:[%s12685_s27 + $0x2e8] sm:$0xff] }
 0x438   :  { %7959 = vmatprep.subr.bf16.mxu0 %v11293_v43  ;;  %8019 = vmatprep.subr.bf16.mxu1 %v8018_v42  ;;  %v3454_v24 = vsel %vm840_vm4, %v11539_v9, %v3452_v3  ;;  %v6421_v43 = vld [vmem:[%s12685_s27 + $0x2f8] sm:$0xff]  ;;  %v3565_v18 = vld [vmem:[%s12685_s27 + $0x28] sm:$0xff]  ;;  %v8048_v42 = vpack.c.bf16 %v3562_v15, %v3560_v12  ;;  %v3568_v3 = vld [vmem:[%s12685_s27 + $0x40] sm:$0xff] }
 0x439   :  { %6381 = vmatprep.mubr.msk.f32.mxu0 %vm362_vm0, %v3454_v24  ;;  %v8026_v61 = vpack.c.bf16 %v6421_v43, %v6419_v8  ;;  %v3577_v24 = vld [vmem:[%s12685_s27 + $0x88] sm:$0xff]  ;;  %v3579_v8 = vld [vmem:[%s12685_s27 + $0x98] sm:$0xff]  ;;  %v8060_v43 = vpack.c.bf16 %v3574_v0, %v3572_v59  ;;  %v3600_v15 = vld [vmem:[%s12685_s27 + $0x140] sm:$0xff] }
 0x43b   :  { %7961 = vmatpush1.bf16.msra.mxu0 %v11309_v23  ;;  %8021 = vmatpush1.bf16.msra.mxu1 %v8020_v19  ;;  %v1770_v10 = vpop.permute.xlu0 %1769  ;;  %v11595_v44 = vpop.permute.xlu1 %3679  ;;  %v6420_v23 = vld [vmem:[%s12685_s27 + $0x2f0] sm:$0xff]  ;;  %v8052_v19 = vpack.c.bf16 %v3566_v5, %v3564_v6  ;;  %v3604_v6 = vld [vmem:[%s12685_s27 + $0x160] sm:$0xff] }
 0x43c   :  { %7963 = vmatprep.subr.bf16.mxu0 %v11313_v37  ;;  %8023 = vmatprep.subr.bf16.mxu1 %v8022_v11  ;;  %v11600_v30 = vsel %vm601_vm2, %v10962_v46, %v1770_v10  ;;  %1777 = vst.msk [vmem:[#allocation2 + $0x60] sm:$0xff] %vm840_vm4, %v1770_v10  ;;  %v3684_v36 = vsel %vm840_vm4, %v11595_v44, %v3682_v35  ;;  %v6423_v37 = vld [vmem:[%s12685_s27 + $0x308] sm:$0xff]  ;;  %v6425_v46 = vld [vmem:[%s12685_s27 + $0x318] sm:$0xff]  ;;  %v3570_v11 = vld [vmem:[%s12685_s27 + $0x50] sm:$0xff] }
 0x43d   :  { %6438 = vmatprep.mubr.msk.f32.mxu1 %vm362_vm0, %v3684_v36  ;;  %v8028_v17 = vpack.c.bf16 %v6420_v23, %v6418_v56  ;;  %v8030_v25 = vpack.c.bf16 %v6425_v46, %v6423_v37  ;;  %v3576_v10 = vld [vmem:[%s12685_s27 + $0x80] sm:$0xff]  ;;  %v3583_v56 = vld [vmem:[%s12685_s27 + $0xb8] sm:$0xff]  ;;  %v3582_v46 = vld [vmem:[%s12685_s27 + $0xb0] sm:$0xff] }
 0x43e   :  { %v3580_v37 = vld [vmem:[%s12685_s27 + $0xa0] sm:$0xff]  ;;  %v3606_v5 = vld [vmem:[%s12685_s27 + $0x170] sm:$0xff] }
 0x43f   :  { %7965 = vmatpush1.bf16.msra.mxu0 %v11329_v53  ;;  %8025 = vmatpush1.bf16.msra.mxu1 %v8024_v20  ;;  %v6429_v53 = vld [vmem:[%s12685_s27 + $0x338] sm:$0xff]  ;;  %v3678_v47 = vpop.permute.xlu1 %3677  ;;  %v8062_v20 = vpack.c.bf16 %v3579_v8, %v3577_v24  ;;  %v3612_v24 = vld [vmem:[%s12685_s27 + $0x1a0] sm:$0xff]  ;;  %v3614_v8 = vld [vmem:[%s12685_s27 + $0x1b0] sm:$0xff] }
 0x440   :  { %7967 = vmatprep.subr.bf16.mxu0 %v11333_v51  ;;  %8027 = vmatprep.subr.bf16.mxu1 %v8026_v61  ;;  %v8032_v51 = vpack.c.bf16 %v6424_v29, %v6422_v26  ;;  %v8034_v13 = vpack.c.bf16 %v6429_v53, %v6427_v7  ;;  %v3581_v61 = vld [vmem:[%s12685_s27 + $0xa8] sm:$0xff]  ;;  %v8068_v26 = vpack.c.bf16 %v3582_v46, %v3580_v37  ;;  %v3584_v7 = vld [vmem:[%s12685_s27 + $0xc0] sm:$0xff]  ;;  %v3586_v53 = vld [vmem:[%s12685_s27 + $0xd0] sm:$0xff] }
 0x441   :  { %v8066_v36 = vpack.c.bf16 %v3583_v56, %v3581_v61  ;;  %v8100_v61 = vpack.c.bf16 %v3614_v8, %v3612_v24  ;;  %v3832_v37 = vld [vmem:[#allocation2 + $0x50] sm:$0xff]  ;;  %v6441_v46 = vld [vmem:[%s12685_s27 + $0x388] sm:$0xff]  ;;  %v6472_v24 = vld [vmem:[%s12685_s27 + $0x480] sm:$0xff] }
 0x442   :  { %v6474_v8 = vld [vmem:[%s12685_s27 + $0x490] sm:$0xff] }
 0x443   :  { %7969 = vmatpush1.bf16.msra.mxu0 %v11349_v50  ;;  %8029 = vmatpush1.bf16.msra.mxu1 %v8028_v17  ;;  %v6433_v50 = vld [vmem:[%s12685_s27 + $0x358] sm:$0xff]  ;;  %v3585_v17 = vld [vmem:[%s12685_s27 + $0xc8] sm:$0xff] }
 0x444   :  { %7971 = vmatprep.subr.bf16.mxu0 %v11353_v34  ;;  %8031 = vmatprep.subr.bf16.mxu1 %v8030_v25  ;;  %v8036_v34 = vpack.c.bf16 %v6428_v54, %v6426_v27  ;;  %v8038_v39 = vpack.c.bf16 %v6433_v50, %v6431_v55  ;;  %v3587_v25 = vld [vmem:[%s12685_s27 + $0xd8] sm:$0xff]  ;;  %v8072_v27 = vpack.c.bf16 %v3586_v53, %v3584_v7  ;;  %v3588_v55 = vld [vmem:[%s12685_s27 + $0xe0] sm:$0xff]  ;;  %v3590_v50 = vld [vmem:[%s12685_s27 + $0xf0] sm:$0xff] }
 0x445   :  { %v8070_v29 = vpack.c.bf16 %v3587_v25, %v3585_v17  ;;  %v6443_v17 = vld [vmem:[%s12685_s27 + $0x398] sm:$0xff]  ;;  %v6440_v25 = vld [vmem:[%s12685_s27 + $0x380] sm:$0xff] }
 0x446   :  { %v6447_v7 = vld [vmem:[%s12685_s27 + $0x3b8] sm:$0xff] }
 0x447   :  { %7973 = vmatpush1.bf16.msra.mxu0 %v11369_v62  ;;  %8033 = vmatpush1.bf16.msra.mxu1 %v8032_v51  ;;  %v6437_v62 = vld [vmem:[%s12685_s27 + $0x378] sm:$0xff]  ;;  %v3589_v51 = vld [vmem:[%s12685_s27 + $0xe8] sm:$0xff] }
 0x448   :  { %7975 = vmatprep.subr.bf16.mxu0 %v11373_v1  ;;  %8035 = vmatprep.subr.bf16.mxu1 %v8034_v13  ;;  %v8040_v1 = vpack.c.bf16 %v6432_v63, %v6430_v33  ;;  %v8042_v52 = vpack.c.bf16 %v6437_v62, %v6435_v21  ;;  %v3591_v13 = vld [vmem:[%s12685_s27 + $0xf8] sm:$0xff]  ;;  %v8076_v33 = vpack.c.bf16 %v3590_v50, %v3588_v55  ;;  %v3592_v21 = vld [vmem:[%s12685_s27 + $0x100] sm:$0xff]  ;;  %v3594_v62 = vld [vmem:[%s12685_s27 + $0x110] sm:$0xff] }
 0x449   :  { %v8074_v54 = vpack.c.bf16 %v3591_v13, %v3589_v51  ;;  %v6444_v13 = vld [vmem:[%s12685_s27 + $0x3a0] sm:$0xff]  ;;  %v6451_v55 = vld [vmem:[%s12685_s27 + $0x3d8] sm:$0xff] }
 0x44b   :  { %7977 = vmatpush1.bf16.msra.mxu0 %v11389_v22  ;;  %8037 = vmatpush1.bf16.msra.mxu1 %v8036_v34  ;;  %v3563_v22 = vld [vmem:[%s12685_s27 + $0x18] sm:$0xff]  ;;  %v3593_v34 = vld [vmem:[%s12685_s27 + $0x108] sm:$0xff] }
 0x44c   :  { %7979 = vmatprep.subr.bf16.mxu0 %v11396_v31  ;;  %8039 = vmatprep.subr.bf16.mxu1 %v8038_v39  ;;  %v8044_v31 = vpack.c.bf16 %v6436_v32, %v6434_v60  ;;  %v8046_v58 = vpack.c.bf16 %v3563_v22, %v3561_v16  ;;  %v3595_v39 = vld [vmem:[%s12685_s27 + $0x118] sm:$0xff]  ;;  %v8080_v60 = vpack.c.bf16 %v3594_v62, %v3592_v21  ;;  %v3596_v16 = vld [vmem:[%s12685_s27 + $0x120] sm:$0xff]  ;;  %v3598_v22 = vld [vmem:[%s12685_s27 + $0x130] sm:$0xff] }
 0x44d   :  { %v8078_v63 = vpack.c.bf16 %v3595_v39, %v3593_v34  ;;  %v6448_v39 = vld [vmem:[%s12685_s27 + $0x3c0] sm:$0xff]  ;;  %v6455_v21 = vld [vmem:[%s12685_s27 + $0x3f8] sm:$0xff] }
 0x44f   :  { %7981 = vmatpush1.bf16.msra.mxu0 %v11413_v41  ;;  %8041 = vmatpush1.bf16.msra.mxu1 %v8040_v1  ;;  %v3567_v41 = vld [vmem:[%s12685_s27 + $0x38] sm:$0xff]  ;;  %v3597_v1 = vld [vmem:[%s12685_s27 + $0x128] sm:$0xff] }
 0x450   :  { %7983 = vmatprep.subr.bf16.mxu0 %v11418_v38  ;;  %8043 = vmatprep.subr.bf16.mxu1 %v8042_v52  ;;  %v3683_v38 = vsel %vm840_vm4, %v3678_v47, %v11595_v44  ;;  %v8050_v14 = vpack.c.bf16 %v3567_v41, %v3565_v18  ;;  %v3578_v44 = vld [vmem:[%s12685_s27 + $0x90] sm:$0xff]  ;;  %v3599_v52 = vld [vmem:[%s12685_s27 + $0x138] sm:$0xff]  ;;  %v3605_v41 = vld [vmem:[%s12685_s27 + $0x168] sm:$0xff] }
 0x451   :  { %v8064_v23 = vpack.c.bf16 %v3578_v44, %v3576_v10  ;;  %v8082_v32 = vpack.c.bf16 %v3599_v52, %v3597_v1  ;;  %v3603_v47 = vld [vmem:[%s12685_s27 + $0x158] sm:$0xff]  ;;  %v3602_v18 = vld [vmem:[%s12685_s27 + $0x150] sm:$0xff]  ;;  %v6452_v52 = vld [vmem:[%s12685_s27 + $0x3e0] sm:$0xff] }
 0x453   :  { %7985 = vmatpush1.bf16.msra.mxu0 %v11434_v57  ;;  %8045 = vmatpush1.bf16.msra.mxu1 %v8044_v31  ;;  %v3569_v57 = vld [vmem:[%s12685_s27 + $0x48] sm:$0xff] }
 0x454   :  { %7987 = vmatprep.subr.bf16.mxu0 %v11438_v28  ;;  %8047 = vmatprep.subr.bf16.mxu1 %v8046_v58  ;;  %v3453_v28 = vsel %vm840_vm4, %v11562_v2, %v11539_v9  ;;  %v8054_v35 = vpack.c.bf16 %v3571_v49, %v3569_v57  ;;  %v3573_v9 = vld [vmem:[%s12685_s27 + $0x68] sm:$0xff]  ;;  %v8084_v58 = vpack.c.bf16 %v3598_v22, %v3596_v16  ;;  %v3611_v49 = vld [vmem:[%s12685_s27 + $0x198] sm:$0xff] }
 0x455   :  { %v3601_v31 = vld [vmem:[%s12685_s27 + $0x148] sm:$0xff]  ;;  %v6459_v16 = vld [vmem:[%s12685_s27 + $0x418] sm:$0xff] }
 0x456   :  { %3753 = vmatmul.mubr.f32.vlgmr.msra.gmra.mrb[10].mxu1 %v3683_v38  ;;  %v8086_v12 = vpack.c.bf16 %v3603_v47, %v3601_v31  ;;  %v3607_v38 = vld [vmem:[%s12685_s27 + $0x178] sm:$0xff]  ;;  %v3609_v57 = vld [vmem:[%s12685_s27 + $0x188] sm:$0xff]  ;;  %v6456_v47 = vld [vmem:[%s12685_s27 + $0x400] sm:$0xff] }
 0x457   :  { %7989 = vmatpush1.bf16.msra.mxu0 %v11454_v48  ;;  %8049 = vmatpush1.bf16.msra.mxu1 %v8048_v42  ;;  %v3575_v48 = vld [vmem:[%s12685_s27 + $0x78] sm:$0xff]  ;;  %v8088_v42 = vpack.c.bf16 %v3602_v18, %v3600_v15 }
 0x458   :  { %6439 = vmatprep.mubr.msk.f32.mxu1 %vm362_vm0, %v10996_v4  ;;  %8051 = vmatprep.subr.bf16.mxu1 %v8050_v14  ;;  %v8056_v4 = vpack.c.bf16 %v3570_v11, %v3568_v3  ;;  %v8058_v2 = vpack.c.bf16 %v3575_v48, %v3573_v9  ;;  %v8090_v14 = vpack.c.bf16 %v3607_v38, %v3605_v41  ;;  %v3608_v3 = vld [vmem:[%s12685_s27 + $0x180] sm:$0xff]  ;;  %v3610_v11 = vld [vmem:[%s12685_s27 + $0x190] sm:$0xff]  ;;  %v3613_v9 = vld [vmem:[%s12685_s27 + $0x1a8] sm:$0xff] }
 0x459   :  { %v3615_v48 = vld [vmem:[%s12685_s27 + $0x1b8] sm:$0xff]  ;;  %v8096_v59 = vpack.c.bf16 %v3610_v11, %v3608_v3  ;;  %v6460_v38 = vld [vmem:[%s12685_s27 + $0x420] sm:$0xff] }
 0x45a   :  { %3523 = vmatmul.mubr.f32.vlgmr.msra.gmra.mrb[10].mxu0 %v3453_v28  ;;  %v8092_v28 = vpack.c.bf16 %v3606_v5, %v3604_v6  ;;  %v8098_v0 = vpack.c.bf16 %v3615_v48, %v3613_v9  ;;  %v6463_v15 = vld [vmem:[%s12685_s27 + $0x438] sm:$0xff]  ;;  %v6468_v9 = vld [vmem:[%s12685_s27 + $0x460] sm:$0xff]  ;;  %v6470_v48 = vld [vmem:[%s12685_s27 + $0x470] sm:$0xff] }
 0x45b   :  { %8053 = vmatpush1.bf16.msra.mxu1 %v8052_v19  ;;  %v2645_v19 = vld [vmem:[%s12638_s6] sm:$0x3]  ;;  %v6467_v6 = vld [vmem:[%s12685_s27 + $0x458] sm:$0xff] }
 0x45c   :  { %8055 = vmatprep.subr.bf16.mxu1 %v8054_v35  ;;  %v8094_v35 = vpack.c.bf16 %v3611_v49, %v3609_v57  ;;  %v6464_v49 = vld [vmem:[%s12685_s27 + $0x440] sm:$0xff] }
 0x45f   :  { %8057 = vmatpush1.bf16.msra.mxu1 %v8056_v4  ;;  %v2650_v4 = vrot.slane %v2645_v19, %v9626_v40 }
 0x460   :  { %8059 = vmatprep.subr.bf16.mxu1 %v8058_v2  ;;  %v2654_v2 = vrot.slane %v2645_v19, %v12706_v45  ;;  %v6469_v19 = vld [vmem:[%s12685_s27 + $0x468] sm:$0xff] }
 0x463   :  { %8061 = vmatpush1.bf16.msra.mxu1 %v8060_v43 }
 0x464   :  { %8063 = vmatprep.subr.bf16.mxu1 %v8062_v20 }
 0x467   :  { %8065 = vmatpush1.bf16.msra.mxu1 %v8064_v23 }
 0x468   :  { %8067 = vmatprep.subr.bf16.mxu1 %v8066_v36  ;;  %v3558_v36 = vld [vmem:[#allocation2 + $0x38] sm:$0xff] }
 0x46b   :  { %8069 = vmatpush1.bf16.msra.mxu1 %v8068_v26  ;;  %v8102_v26 = vpack.c.bf16 %v6443_v17, %v6441_v46  ;;  %v6480_v17 = vld [vmem:[%s12685_s27 + $0x4c0] sm:$0xff] }
 0x46c   :  { %8071 = vmatprep.subr.bf16.mxu1 %v8070_v29  ;;  %v6445_v29 = vld [vmem:[%s12685_s27 + $0x3a8] sm:$0xff] }
 0x46d   :  { %v8106_v51 = vpack.c.bf16 %v6447_v7, %v6445_v29 }
 0x46f   :  { %8073 = vmatpush1.bf16.msra.mxu1 %v8072_v27  ;;  %v6446_v27 = vld [vmem:[%s12685_s27 + $0x3b0] sm:$0xff] }
 0x470   :  { %8075 = vmatprep.subr.bf16.mxu1 %v8074_v54  ;;  %v6449_v54 = vld [vmem:[%s12685_s27 + $0x3c8] sm:$0xff]  ;;  %v8108_v50 = vpack.c.bf16 %v6446_v27, %v6444_v13  ;;  %v6491_v27 = vld [vmem:[%s12685_s27 + $0x518] sm:$0xff] }
 0x471   :  { %v8110_v34 = vpack.c.bf16 %v6451_v55, %v6449_v54  ;;  %v6489_v13 = vld [vmem:[%s12685_s27 + $0x508] sm:$0xff] }
 0x472   :  { %v8150_v55 = vpack.c.bf16 %v6491_v27, %v6489_v13 }
 0x473   :  { %8077 = vmatpush1.bf16.msra.mxu1 %v8076_v33  ;;  %v6450_v33 = vld [vmem:[%s12685_s27 + $0x3d0] sm:$0xff] }
 0x474   :  { %8079 = vmatprep.subr.bf16.mxu1 %v8078_v63  ;;  %v6453_v63 = vld [vmem:[%s12685_s27 + $0x3e8] sm:$0xff]  ;;  %v8112_v62 = vpack.c.bf16 %v6450_v33, %v6448_v39 }
 0x475   :  { %v8114_v1 = vpack.c.bf16 %v6455_v21, %v6453_v63  ;;  %v6493_v33 = vld [vmem:[%s12685_s27 + $0x528] sm:$0xff]  ;;  %v6495_v63 = vld [vmem:[%s12685_s27 + $0x538] sm:$0xff]  ;;  %v6492_v21 = vld [vmem:[%s12685_s27 + $0x520] sm:$0xff] }
 0x477   :  { %8081 = vmatpush1.bf16.msra.mxu1 %v8080_v60  ;;  %v6454_v60 = vld [vmem:[%s12685_s27 + $0x3f0] sm:$0xff] }
 0x478   :  { %8083 = vmatprep.subr.bf16.mxu1 %v8082_v32  ;;  %v6457_v32 = vld [vmem:[%s12685_s27 + $0x408] sm:$0xff]  ;;  %v8116_v22 = vpack.c.bf16 %v6454_v60, %v6452_v52  ;;  %v3087_v52 = vld [vmem:[%s12638_s6] sm:$0x3] }
 0x479   :  { %v8118_v31 = vpack.c.bf16 %v6459_v16, %v6457_v32  ;;  %v3092_v32 = vrot.slane %v3087_v52, %v9626_v40 }
 0x47b   :  { %8085 = vmatpush1.bf16.msra.mxu1 %v8084_v58  ;;  %v6458_v58 = vld [vmem:[%s12685_s27 + $0x410] sm:$0xff] }
 0x47c   :  { %8087 = vmatprep.subr.bf16.mxu1 %v8086_v12  ;;  %v6461_v12 = vld [vmem:[%s12685_s27 + $0x428] sm:$0xff]  ;;  %v8120_v18 = vpack.c.bf16 %v6458_v58, %v6456_v47  ;;  %v3834_v58 = vld [vmem:[#allocation2 + $0x60] sm:$0xff] }
 0x47d   :  { %v8122_v41 = vpack.c.bf16 %v6463_v15, %v6461_v12 }
 0x47f   :  { %8089 = vmatpush1.bf16.msra.mxu1 %v8088_v42  ;;  %v6462_v42 = vld [vmem:[%s12685_s27 + $0x430] sm:$0xff] }
 0x480   :  { %8091 = vmatprep.subr.bf16.mxu1 %v8090_v14  ;;  %v6465_v14 = vld [vmem:[%s12685_s27 + $0x448] sm:$0xff]  ;;  %v8124_v5 = vpack.c.bf16 %v6462_v42, %v6460_v38  ;;  %v6499_v38 = vld [vmem:[%s12707_s29 + $0xb0] sm:$0xff] }
 0x481   :  { %v8126_v57 = vpack.c.bf16 %v6467_v6, %v6465_v14  ;;  %v8704_v14 = vmov 0.0|0.0  }
 0x482   :  { %8158 = vmatprep.subr.bf16.mxu0 %v8704_v14 }
 0x483   :  { %8093 = vmatpush1.bf16.msra.mxu1 %v8092_v28  ;;  %v6466_v28 = vld [vmem:[%s12685_s27 + $0x450] sm:$0xff] }
 0x484   :  { %8095 = vmatprep.subr.bf16.mxu1 %v8094_v35  ;;  %v6471_v35 = vld [vmem:[%s12685_s27 + $0x478] sm:$0xff]  ;;  %v8128_v3 = vpack.c.bf16 %v6466_v28, %v6464_v49  ;;  %v6501_v28 = vld [vmem:[%s12707_s29 + $0xc0] sm:$0xff] }
 0x485   :  { %v2638_v43 = vpop.f32.mrb[8].mxu0  ;;  %v8130_v11 = vpack.c.bf16 %v6471_v35, %v6469_v19  ;;  %v6502_v19 = vld [vmem:[%s12707_s29 + $0xc8] sm:$0xff] }
 0x486   :  { %v2657_v20 = vadd.f32 %v2650_v4, %v2638_v43  ;;  %v2640_v10 = vpop.f32.mrb[9].mxu0  ;;  %v6473_v4 = vld [vmem:[%s12685_s27 + $0x488] sm:$0xff] }
 0x487   :  { %v2658_v44 = vadd.f32 %v2654_v2, %v2640_v10  ;;  %8097 = vmatpush1.bf16.msra.mxu1 %v8096_v59  ;;  %v6475_v2 = vld [vmem:[%s12685_s27 + $0x498] sm:$0xff]  ;;  %v8132_v59 = vpack.c.bf16 %v6470_v48, %v6468_v9  ;;  %v6477_v43 = vld [vmem:[%s12685_s27 + $0x4a8] sm:$0xff]  ;;  %v8136_v10 = vpack.c.bf16 %v6474_v8, %v6472_v24  ;;  %v6503_v9 = vld [vmem:[%s12707_s29 + $0xd0] sm:$0xff] }
 0x488   :  { %v2659_v56 = vmax.f32 %v2657_v20, 0.0  ;;  %8099 = vmatprep.subr.bf16.mxu1 %v8098_v0  ;;  %v8134_v0 = vpack.c.bf16 %v6475_v2, %v6473_v4  ;;  %v6479_v20 = vld [vmem:[%s12685_s27 + $0x4b8] sm:$0xff]  ;;  %v6507_v8 = vld [vmem:[%s12707_s29 + $0xf0] sm:$0xff] }
 0x489   :  { %v2660_v23 = vmax.f32 %v2658_v44, 0.0  ;;  %v8138_v44 = vpack.c.bf16 %v6479_v20, %v6477_v43  ;;  %v6504_v48 = vld [vmem:[%s12707_s29 + $0xd8] sm:$0xff] }
 0x48a   :  { %2663 = vrot.lane.b32.xlu1 %v2659_v56, %s8703_s19  ;;  %v6478_v56 = vld [vmem:[%s12685_s27 + $0x4b0] sm:$0xff]  ;;  %v12077_v2 = vpack.c.bf16 %v6504_v48, %v6503_v9  ;;  %v6508_v43 = vld [vmem:[%s12707_s29 + $0xf8] sm:$0xff] }
 0x48b   :  { %8101 = vmatpush1.bf16.msra.mxu1 %v8100_v61  ;;  %2665 = vrot.lane.b32.xlu0 %v2660_v23, %s8703_s19  ;;  %v6476_v61 = vld [vmem:[%s12685_s27 + $0x4a0] sm:$0xff]  ;;  %v6481_v23 = vld [vmem:[%s12685_s27 + $0x4c8] sm:$0xff]  ;;  %v12098_v20 = vpack.c.bf16 %v6508_v43, %v6507_v8  ;;  %v4005_v9 = vld [vmem:[%s12707_s29 + $0x38] sm:$0xff] }
 0x48c   :  { %8103 = vmatprep.subr.bf16.mxu1 %v8102_v26  ;;  %v6485_v26 = vld [vmem:[%s12685_s27 + $0x4e8] sm:$0xff]  ;;  %v4008_v43 = vld [vmem:[%s12707_s29 + $0x50] sm:$0xff] }
 0x48e   :  { %3826 = vmatmul.mubr.f32.vlgmr.msra.gmra.mrb[10].mxu1 %v3558_v36  ;;  %v6483_v36 = vld [vmem:[%s12685_s27 + $0x4d8] sm:$0xff] }
 0x48f   :  { %3896 = vrot.lane.b32.xlu0 %v11600_v30, %s8702_s22  ;;  %v6442_v30 = vld [vmem:[%s12685_s27 + $0x390] sm:$0xff]  ;;  %v8142_v46 = vpack.c.bf16 %v6483_v36, %v6481_v23  ;;  %v6512_v23 = vld [vmem:[%s12707_s29 + $0x118] sm:$0xff] }
 0x490   :  { %v8104_v53 = vpack.c.bf16 %v6442_v30, %v6440_v25  ;;  %v6482_v25 = vld [vmem:[%s12685_s27 + $0x4d0] sm:$0xff]  ;;  %v6487_v30 = vld [vmem:[%s12685_s27 + $0x4f8] sm:$0xff] }
 0x491   :  { %v8144_v29 = vpack.c.bf16 %v6482_v25, %v6480_v17  ;;  %v8146_v7 = vpack.c.bf16 %v6487_v30, %v6485_v26  ;;  %v6515_v25 = vld [vmem:[%s12707_s29 + $0x130] sm:$0xff]  ;;  %v6516_v26 = vld [vmem:[%s12707_s29 + $0x138] sm:$0xff] }
 0x492   :  { %8105 = vmatpush1.bf16.msra.mxu1 %v8104_v53  ;;  %v6484_v53 = vld [vmem:[%s12685_s27 + $0x4e0] sm:$0xff]  ;;  %v12138_v30 = vpack.c.bf16 %v6516_v26, %v6515_v25  ;;  %v4012_v25 = vld [vmem:[%s12707_s29 + $0x70] sm:$0xff]  ;;  %v4013_v26 = vld [vmem:[%s12707_s29 + $0x78] sm:$0xff] }
 0x493   :  { %3894 = vrot.lane.b32.xlu0 %v3832_v37, %s8702_s22  ;;  %8107 = vmatprep.subr.bf16.mxu1 %v8106_v51  ;;  %v8140_v37 = vpack.c.bf16 %v6478_v56, %v6476_v61  ;;  %v6486_v51 = vld [vmem:[%s12685_s27 + $0x4f0] sm:$0xff] }
 0x494   :  { %v8148_v54 = vpack.c.bf16 %v6486_v51, %v6484_v53  ;;  %v6511_v56 = vld [vmem:[%s12707_s29 + $0x110] sm:$0xff]  ;;  %v3531_v51 = vld [vmem:[%s12638_s6] sm:$0x3] }
 0x495   :  { %v12118_v36 = vpack.c.bf16 %v6512_v23, %v6511_v56  ;;  %v4010_v56 = vld [vmem:[%s12707_s29 + $0x60] sm:$0xff]  ;;  %v4011_v23 = vld [vmem:[%s12707_s29 + $0x68] sm:$0xff] }
 0x496   :  { %8109 = vmatpush1.bf16.msra.mxu1 %v8108_v50  ;;  %v6488_v50 = vld [vmem:[%s12685_s27 + $0x500] sm:$0xff] }
 0x497   :  { %8111 = vmatprep.subr.bf16.mxu1 %v8110_v34  ;;  %v6490_v34 = vld [vmem:[%s12685_s27 + $0x510] sm:$0xff] }
 0x498   :  { %v8152_v39 = vpack.c.bf16 %v6490_v34, %v6488_v50 }
 0x49a   :  { %8113 = vmatpush1.bf16.msra.mxu1 %v8112_v62  ;;  %v8154_v62 = vpack.c.bf16 %v6495_v63, %v6493_v33 }
 0x49b   :  { %8115 = vmatprep.subr.bf16.mxu1 %v8114_v1  ;;  %v6494_v1 = vld [vmem:[%s12685_s27 + $0x530] sm:$0xff] }
 0x49c   :  { %v8156_v60 = vpack.c.bf16 %v6494_v1, %v6492_v21 }
 0x49e   :  { %8117 = vmatpush1.bf16.msra.mxu1 %v8116_v22 }
 0x49f   :  { %8119 = vmatprep.subr.bf16.mxu1 %v8118_v31 }
 0x4a2   :  { %8121 = vmatpush1.bf16.msra.mxu1 %v8120_v18  ;;  %v6497_v18 = vld [vmem:[%s12707_s29 + $0xa0] sm:$0xff] }
 0x4a3   :  { %8123 = vmatprep.subr.bf16.mxu1 %v8122_v41  ;;  %v6498_v41 = vld [vmem:[%s12707_s29 + $0xa8] sm:$0xff] }
 0x4a4   :  { %v12044_v6 = vpack.c.bf16 %v6498_v41, %v6497_v18 }
 0x4a6   :  { %8125 = vmatpush1.bf16.msra.mxu1 %v8124_v5  ;;  %v6500_v5 = vld [vmem:[%s12707_s29 + $0xb8] sm:$0xff]  ;;  %8160 = vmatpush1.bf16.msra.mxu0 %v12044_v6 }
 0x4a7   :  { %8127 = vmatprep.subr.bf16.mxu1 %v8126_v57  ;;  %v3096_v57 = vrot.slane %v3087_v52, %v12706_v45  ;;  %v12053_v49 = vpack.c.bf16 %v6500_v5, %v6499_v38  ;;  %8161 = vmatprep.subr.bf16.mxu0 %v8704_v14  ;;  %v4002_v5 = vld [vmem:[%s12707_s29 + $0x20] sm:$0xff] }
 0x4aa   :  { %8129 = vmatpush1.bf16.msra.mxu1 %v8128_v3  ;;  %8163 = vmatpush1.bf16.msra.mxu0 %v12053_v49 }
 0x4ab   :  { %8131 = vmatprep.subr.bf16.mxu1 %v8130_v11  ;;  %v12065_v11 = vpack.c.bf16 %v6502_v19, %v6501_v28  ;;  %8164 = vmatprep.subr.bf16.mxu0 %v8704_v14 }
 0x4ae   :  { %8133 = vmatpush1.bf16.msra.mxu1 %v8132_v59  ;;  %8166 = vmatpush1.bf16.msra.mxu0 %v12065_v11  ;;  %v6505_v59 = vld [vmem:[%s12707_s29 + $0xe0] sm:$0xff] }
 0x4af   :  { %8135 = vmatprep.subr.bf16.mxu1 %v8134_v0  ;;  %8167 = vmatprep.subr.bf16.mxu0 %v8704_v14  ;;  %v6506_v0 = vld [vmem:[%s12707_s29 + $0xe8] sm:$0xff] }
 0x4b0   :  { %v12088_v24 = vpack.c.bf16 %v6506_v0, %v6505_v59  ;;  %v4006_v59 = vld [vmem:[%s12707_s29 + $0x40] sm:$0xff]  ;;  %v4007_v0 = vld [vmem:[%s12707_s29 + $0x48] sm:$0xff] }
 0x4b1   :  { %v12237_v8 = vpack.c.bf16 %v4007_v0, %v4006_v59  ;;  %v6537_v0 = vld [vmem:[%s12707_s29 + $0x1d0] sm:$0xff] }
 0x4b2   :  { %8137 = vmatpush1.bf16.msra.mxu1 %v8136_v10  ;;  %8169 = vmatpush1.bf16.msra.mxu0 %v12077_v2  ;;  %v6509_v10 = vld [vmem:[%s12707_s29 + $0x100] sm:$0xff] }
 0x4b3   :  { %8139 = vmatprep.subr.bf16.mxu1 %v8138_v44  ;;  %8170 = vmatprep.subr.bf16.mxu0 %v8704_v14  ;;  %v6510_v44 = vld [vmem:[%s12707_s29 + $0x108] sm:$0xff] }
 0x4b4   :  { %v12108_v61 = vpack.c.bf16 %v6510_v44, %v6509_v10  ;;  %v4009_v10 = vld [vmem:[%s12707_s29 + $0x58] sm:$0xff] }
 0x4b5   :  { %v12251_v44 = vpack.c.bf16 %v4009_v10, %v4008_v43  ;;  %v6538_v43 = vld [vmem:[%s12707_s29 + $0x1d8] sm:$0xff] }
 0x4b6   :  { %8141 = vmatpush1.bf16.msra.mxu1 %v8140_v37  ;;  %8172 = vmatpush1.bf16.msra.mxu0 %v12088_v24  ;;  %v6513_v37 = vld [vmem:[%s12707_s29 + $0x120] sm:$0xff]  ;;  %v12399_v10 = vpack.c.bf16 %v6538_v43, %v6537_v0 }
 0x4b7   :  { %8143 = vmatprep.subr.bf16.mxu1 %v8142_v46  ;;  %8173 = vmatprep.subr.bf16.mxu0 %v8704_v14  ;;  %v6514_v46 = vld [vmem:[%s12707_s29 + $0x128] sm:$0xff] }
 0x4b8   :  { %v12128_v17 = vpack.c.bf16 %v6514_v46, %v6513_v37  ;;  %v12264_v46 = vpack.c.bf16 %v4011_v23, %v4010_v56  ;;  %v3978_v56 = vld [vmem:[%s12638_s6] sm:$0x3] }
 0x4b9   :  { %v3983_v23 = vrot.slane %v3978_v56, %v9626_v40 }
 0x4ba   :  { %8145 = vmatpush1.bf16.msra.mxu1 %v8144_v29  ;;  %8175 = vmatpush1.bf16.msra.mxu0 %v12098_v20 }
 0x4bb   :  { %8147 = vmatprep.subr.bf16.mxu1 %v8146_v7  ;;  %8176 = vmatprep.subr.bf16.mxu0 %v8704_v14 }
 0x4be   :  { %8149 = vmatpush1.bf16.msra.mxu1 %v8148_v54  ;;  %8178 = vmatpush1.bf16.msra.mxu0 %v12108_v61  ;;  %v3536_v54 = vrot.slane %v3531_v51, %v9626_v40 }
 0x4bf   :  { %8151 = vmatprep.subr.bf16.mxu1 %v8150_v55  ;;  %8179 = vmatprep.subr.bf16.mxu0 %v8704_v14  ;;  %v3540_v55 = vrot.slane %v3531_v51, %v12706_v45  ;;  %v4016_v51 = vld [vmem:[%s12707_s29 + $0x90] sm:$0xff] }
 0x4c2   :  { %8153 = vmatpush1.bf16.msra.mxu1 %v8152_v39  ;;  %8181 = vmatpush1.bf16.msra.mxu0 %v12118_v36 }
 0x4c3   :  { %8155 = vmatprep.subr.bf16.mxu1 %v8154_v62  ;;  %8182 = vmatprep.subr.bf16.mxu0 %v8704_v14 }
 0x4c6   :  { %8157 = vmatpush1.bf16.msra.mxu1 %v8156_v60  ;;  %8184 = vmatpush1.bf16.msra.mxu0 %v12128_v17 }
 0x4c7   :  { %8248 = vmatprep.subr.bf16.mxu1 %v8704_v14  ;;  %8185 = vmatprep.subr.bf16.mxu0 %v8704_v14 }
 0x4ca   :  { %8187 = vmatpush1.bf16.msra.mxu0 %v12138_v30 }
 0x4cb   :  { %8188 = vmatprep.subr.bf16.mxu0 %v8704_v14 }
 0x4f1   :  { %v3080_v16 = vpop.f32.mrb[8].mxu1 }
 0x4f2   :  { %v3099_v22 = vadd.f32 %v3092_v32, %v3080_v16  ;;  %v3082_v31 = vpop.f32.mrb[9].mxu1  ;;  %v3998_v16 = vld [vmem:[%s12707_s29] sm:$0xff] }
 0x4f3   :  { %v3100_v35 = vadd.f32 %v3096_v57, %v3082_v31  ;;  %v4003_v57 = vld [vmem:[%s12707_s29 + $0x28] sm:$0xff] }
 0x4f4   :  { %v3101_v47 = vmax.f32 %v3099_v22, 0.0  ;;  %v3999_v22 = vld [vmem:[%s12707_s29 + $0x8] sm:$0xff]  ;;  %v12215_v19 = vpack.c.bf16 %v4003_v57, %v4002_v5  ;;  %v6533_v57 = vld [vmem:[%s12707_s29 + $0x1b0] sm:$0xff] }
 0x4f5   :  { %v3102_v4 = vmax.f32 %v3100_v35, 0.0  ;;  %v12188_v31 = vpack.c.bf16 %v3999_v22, %v3998_v16  ;;  %v4004_v35 = vld [vmem:[%s12707_s29 + $0x30] sm:$0xff]  ;;  %v6527_v16 = vld [vmem:[%s12707_s29 + $0x180] sm:$0xff]  ;;  %v6528_v22 = vld [vmem:[%s12707_s29 + $0x188] sm:$0xff] }
 0x4f6   :  { %3105 = vrot.lane.b32.xlu1 %v3101_v47, %s8702_s22  ;;  %v12225_v48 = vpack.c.bf16 %v4005_v9, %v4004_v35  ;;  %v6535_v9 = vld [vmem:[%s12707_s29 + $0x1c0] sm:$0xff] }
 0x4fa   :  { %3898 = vrot.lane.b32.xlu1 %v3834_v58, %s8702_s22 }
 0x4fc   :  { %v2664_v12 = vpop.permute.xlu1 %2663 }
 0x4fd   :  { %2670 = vst.msk [vmem:[#allocation3 + $0x8] sm:$0xff] %vm1075_vm5, %v2664_v12  ;;  %v2666_v15 = vpop.permute.xlu0 %2665 }
 0x4fe   :  { %v2667_v42 = vsel %vm840_vm4, %v2664_v12, %v2666_v15  ;;  %v4000_v12 = vld [vmem:[%s12707_s29 + $0x10] sm:$0xff]  ;;  %v4001_v15 = vld [vmem:[%s12707_s29 + $0x18] sm:$0xff] }
 0x4ff   :  { %2671 = vst.msk [vmem:[#allocation3 + $0x10] sm:$0xff] %vm601_vm2, %v2667_v42  ;;  %v12203_v41 = vpack.c.bf16 %v4001_v15, %v4000_v12  ;;  %v6529_v12 = vld [vmem:[%s12707_s29 + $0x190] sm:$0xff]  ;;  %v6530_v15 = vld [vmem:[%s12707_s29 + $0x198] sm:$0xff] }
 0x501   :  { %v3897_v53 = vpop.permute.xlu0 %3896 }
 0x504   :  { %v12062_v3 = vld [vmem:[#allocation3 + $0x8] sm:$0xff] }
 0x505   :  { %4042 = vrot.lane.b32.xlu1 %v12062_v3, %s8701_s4  ;;  %v3895_v27 = vpop.permute.xlu0 %3894 }
 0x506   :  { %v3900_v39 = vsel %vm601_vm2, %v3895_v27, %v3897_v53 }
 0x509   :  { %3107 = vrot.lane.b32.xlu1 %v3102_v4, %s8702_s22 }
 0x52d   :  { %v3524_v29 = vpop.f32.mrb[10].mxu0 }
 0x52e   :  { %v3526_v7 = vpop.f32.mrb[11].mxu0  ;;  %v3543_v33 = vadd.f32 %v3536_v54, %v3524_v29  ;;  %v4014_v29 = vld [vmem:[%s12707_s29 + $0x80] sm:$0xff] }
 0x52f   :  { %v3544_v63 = vadd.f32 %v3540_v55, %v3526_v7  ;;  %v4015_v7 = vld [vmem:[%s12707_s29 + $0x88] sm:$0xff]  ;;  %v6519_v54 = vld [vmem:[%s12707_s29 + $0x140] sm:$0xff] }
 0x530   :  { %v3545_v62 = vmax.f32 %v3543_v33, 0.0  ;;  %v6520_v55 = vld [vmem:[%s12707_s29 + $0x148] sm:$0xff] }
 0x531   :  { %v3546_v1 = vmax.f32 %v3544_v63, 0.0  ;;  %v3996_v33 = vld [vmem:[#allocation3] sm:$0xff] }
 0x568   :  { %v3106_v13 = vpop.permute.xlu1 %3105 }
 0x569   :  { %3112 = vst.msk [vmem:[#allocation3 + $0x10] sm:$0xff] %vm837_vm3, %v3106_v13 }
 0x56c   :  { %v3899_v50 = vpop.permute.xlu1 %3898 }
 0x56d   :  { %v3901_v34 = vsel %vm601_vm2, %v3897_v53, %v3899_v50  ;;  %v12288_v53 = vpack.c.bf16 %v4015_v7, %v4014_v29  ;;  %v12309_v50 = vpack.c.bf16 %v6520_v55, %v6519_v54 }
 0x56e   :  { %6496 = vmatprep.mubr.msk.f32.mxu1 %vm362_vm0, %v3901_v34  ;;  %v6521_v34 = vld [vmem:[%s12707_s29 + $0x150] sm:$0xff] }
 0x56f   :  { %3970 = vmatmul.mubr.f32.vlgmr.msra.gmra.mrb[10].mxu1 %v3900_v39  ;;  %v6522_v39 = vld [vmem:[%s12707_s29 + $0x158] sm:$0xff] }
 0x570   :  { %v12152_v21 = vld [vmem:[#allocation3 + $0x10] sm:$0xff]  ;;  %8250 = vmatpush1.bf16.msra.mxu1 %v12044_v6  ;;  %v12319_v63 = vpack.c.bf16 %v6522_v39, %v6521_v34 }
 0x571   :  { %4217 = vrot.lane.b32.xlu1 %v12152_v21, %s8702_s22  ;;  %4044 = vrot.lane.b32.xlu0 %v12152_v21, %s8701_s4 }
 0x572   :  { %8251 = vmatprep.subr.bf16.mxu1 %v8704_v14 }
 0x574   :  { %8253 = vmatpush1.bf16.msra.mxu1 %v12053_v49 }
 0x575   :  { %3551 = vrot.lane.b32.xlu1 %v3546_v1, %s8701_s4  ;;  %3549 = vrot.lane.b32.xlu0 %v3545_v62, %s8701_s4  ;;  %v6524_v62 = vld [vmem:[%s12707_s29 + $0x168] sm:$0xff] }
 0x576   :  { %8254 = vmatprep.subr.bf16.mxu1 %v8704_v14 }
 0x577   :  { %v4043_v52 = vpop.permute.xlu1 %4042 }
 0x578   :  { %8256 = vmatpush1.bf16.msra.mxu1 %v12065_v11 }
 0x579   :  { %8257 = vmatprep.subr.bf16.mxu1 %v8704_v14 }
 0x57b   :  { %v3108_v60 = vpop.permute.xlu1 %3107 }
 0x57c   :  { %v3109_v32 = vsel %vm601_vm2, %v3106_v13, %v3108_v60  ;;  %8259 = vmatpush1.bf16.msra.mxu1 %v12077_v2  ;;  %v4017_v13 = vld [vmem:[%s12707_s29 + $0x98] sm:$0xff] }
 0x57d   :  { %3113 = vst.msk [vmem:[#allocation3 + $0x18] sm:$0xff] %vm362_vm0, %v3109_v32  ;;  %8260 = vmatprep.subr.bf16.mxu1 %v8704_v14  ;;  %v12299_v27 = vpack.c.bf16 %v4017_v13, %v4016_v51  ;;  %v6526_v60 = vld [vmem:[%s12707_s29 + $0x178] sm:$0xff] }
 0x580   :  { %8262 = vmatpush1.bf16.msra.mxu1 %v12088_v24 }
 0x581   :  { %8263 = vmatprep.subr.bf16.mxu1 %v8704_v14 }
 0x584   :  { %8265 = vmatpush1.bf16.msra.mxu1 %v12098_v20 }
 0x585   :  { %8266 = vmatprep.subr.bf16.mxu1 %v8704_v14 }
 0x588   :  { %8268 = vmatpush1.bf16.msra.mxu1 %v12108_v61 }
 0x589   :  { %8269 = vmatprep.subr.bf16.mxu1 %v8704_v14 }
 0x58c   :  { %8271 = vmatpush1.bf16.msra.mxu1 %v12118_v36 }
 0x58d   :  { %8272 = vmatprep.subr.bf16.mxu1 %v8704_v14 }
 0x590   :  { %8274 = vmatpush1.bf16.msra.mxu1 %v12128_v17 }
 0x591   :  { %8275 = vmatprep.subr.bf16.mxu1 %v8704_v14 }
 0x594   :  { %8277 = vmatpush1.bf16.msra.mxu1 %v12138_v30 }
 0x595   :  { %8308 = vmatprep.subr.bf16.mxu1 %v8704_v14 }
 0x5e3   :  { %v4045_v47 = vpop.permute.xlu0 %4044  ;;  %v12190_v58 = vpop.permute.xlu1 %4217 }
 0x5e4   :  { %v4046_v18 = vsel %vm362_vm0, %v4043_v52, %v4045_v47  ;;  %6517 = vmatprep.mubr.msk.f32.mxu0 %vm840_vm4, %v4045_v47  ;;  %v6525_v52 = vld [vmem:[%s12707_s29 + $0x170] sm:$0xff]  ;;  %v12349_v47 = vpack.c.bf16 %v6528_v22, %v6527_v16 }
 0x5e5   :  { %4115 = vmatmul.mubr.f32.vlgmr.msra.gmra.mrb[12].mxu0 %v4046_v18  ;;  %v12339_v32 = vpack.c.bf16 %v6526_v60, %v6525_v52  ;;  %v12359_v18 = vpack.c.bf16 %v6530_v15, %v6529_v12 }
 0x5e6   :  { %8190 = vmatpush1.bf16.msra.mxu0 %v12188_v31  ;;  %6518 = vmatprep.mubr.msk.f32.mxu0 %vm840_vm4, %v12062_v3 }
 0x5e7   :  { %v3550_v38 = vpop.permute.xlu0 %3549  ;;  %v3552_v42 = vpop.permute.xlu1 %3551  ;;  %8191 = vmatprep.subr.bf16.mxu0 %v8704_v14 }
 0x5e8   :  { %3556 = vst.msk [vmem:[#allocation3 + $0x18] sm:$0xff] %vm598_vm1, %v3550_v38  ;;  %v3553_v28 = vsel %vm362_vm0, %v3550_v38, %v3552_v42  ;;  %v6531_v38 = vld [vmem:[%s12707_s29 + $0x1a0] sm:$0xff]  ;;  %v6532_v42 = vld [vmem:[%s12707_s29 + $0x1a8] sm:$0xff] }
 0x5e9   :  { %v12369_v5 = vpack.c.bf16 %v6532_v42, %v6531_v38  ;;  %v4947_v38 = vld [vmem:[#allocation6 + $0x38] sm:$0xff] }
 0x5ea   :  { %8193 = vmatpush1.bf16.msra.mxu0 %v12203_v41 }
 0x5eb   :  { %8194 = vmatprep.subr.bf16.mxu0 %v8704_v14 }
 0x5ee   :  { %8196 = vmatpush1.bf16.msra.mxu0 %v12215_v19 }
 0x5ef   :  { %8197 = vmatprep.subr.bf16.mxu0 %v8704_v14  ;;  %v4328_v4 = vld [vmem:[#allocation3 + $0x18] sm:$0xff] }
 0x5f0   :  { %4353 = vrot.lane.b32.xlu1 %v4328_v4, %s8702_s22  ;;  %4219 = vrot.lane.b32.xlu0 %v4328_v4, %s8702_s22  ;;  %v8568_v37 = vpack.i.bf16 %v4328_v4, %v4328_v4 }
 0x5f2   :  { %8199 = vmatpush1.bf16.msra.mxu0 %v12225_v48 }
 0x5f3   :  { %8200 = vmatprep.subr.bf16.mxu0 %v8704_v14 }
 0x5f4   :  { %4432 = vrot.lane.b32.xlu1 %v12152_v21, %s8701_s4  ;;  %4351 = vrot.lane.b32.xlu0 %v12152_v21, %s8702_s22 }
 0x5f6   :  { %8202 = vmatpush1.bf16.msra.mxu0 %v12237_v8 }
 0x5f7   :  { %8203 = vmatprep.subr.bf16.mxu0 %v8704_v14 }
 0x5f8   :  { %4430 = vrot.lane.b32.xlu0 %v12062_v3, %s8701_s4  ;;  %4534 = vrot.lane.b32.xlu1 %v3553_v28, %s8703_s19  ;;  %v12277_v3 = vpack.c.bf16 %v4013_v26, %v4012_v25 }
 0x5fa   :  { %8205 = vmatpush1.bf16.msra.mxu0 %v12251_v44 }
 0x5fb   :  { %8206 = vmatprep.subr.bf16.mxu0 %v8704_v14 }
 0x5fc   :  { %8569 = vrot.lane.b32.xlu0 %v8568_v37, %s8703_s19  ;;  %4750 = vrot.lane.b32.xlu1 %v12152_v21, %s8702_s22  ;;  %v6523_v21 = vld [vmem:[%s12707_s29 + $0x160] sm:$0xff]  ;;  %v3987_v37 = vrot.slane %v3978_v56, %v12706_v45 }
 0x5fd   :  { %v12329_v1 = vpack.c.bf16 %v6524_v62, %v6523_v21 }
 0x5fe   :  { %8208 = vmatpush1.bf16.msra.mxu0 %v12264_v46 }
 0x5ff   :  { %8209 = vmatprep.subr.bf16.mxu0 %v8704_v14 }
 0x600   :  { %4673 = vrot.lane.b32.xlu0 %v3553_v28, %s8703_s19  ;;  %v6534_v28 = vld [vmem:[%s12707_s29 + $0x1b8] sm:$0xff] }
 0x601   :  { %v12379_v35 = vpack.c.bf16 %v6534_v28, %v6533_v57  ;;  %v4949_v57 = vld [vmem:[#allocation6 + $0x48] sm:$0xff] }
 0x602   :  { %8211 = vmatpush1.bf16.msra.mxu0 %v12277_v3 }
 0x603   :  { %8212 = vmatprep.subr.bf16.mxu0 %v8704_v14 }
 0x604   :  { %4752 = vrot.lane.b32.xlu0 %v4328_v4, %s8702_s22  ;;  %v6536_v4 = vld [vmem:[%s12707_s29 + $0x1c8] sm:$0xff] }
 0x605   :  { %v12389_v59 = vpack.c.bf16 %v6536_v4, %v6535_v9  ;;  %v4951_v9 = vld [vmem:[#allocation6 + $0x58] sm:$0xff]  ;;  %v12708_v4 = vmov 0.0  }
 0x606   :  { %8214 = vmatpush1.bf16.msra.mxu0 %v12288_v53 }
 0x607   :  { %8215 = vmatprep.subr.bf16.mxu0 %v8704_v14 }
 0x60a   :  { %8217 = vmatpush1.bf16.msra.mxu0 %v12299_v27 }
 0x60b   :  { %8218 = vmatprep.subr.bf16.mxu0 %v8704_v14 }
 0x60d   :  { %4187 = vmatmul.mubr.f32.vlgmr.msra.gmra.mrb[14].mxu0 %v3996_v33 }
 0x60e   :  { %8220 = vmatpush1.bf16.msra.mxu0 %v12309_v50 }
 0x60f   :  { %8221 = vmatprep.subr.bf16.mxu0 %v8704_v14 }
 0x612   :  { %8223 = vmatpush1.bf16.msra.mxu0 %v12319_v63 }
 0x613   :  { %8224 = vmatprep.subr.bf16.mxu0 %v8704_v14 }
 0x616   :  { %8226 = vmatpush1.bf16.msra.mxu0 %v12329_v1 }
 0x617   :  { %8227 = vmatprep.subr.bf16.mxu0 %v8704_v14 }
 0x61a   :  { %8229 = vmatpush1.bf16.msra.mxu0 %v12339_v32 }
 0x61b   :  { %8230 = vmatprep.subr.bf16.mxu0 %v8704_v14 }
 0x61e   :  { %8232 = vmatpush1.bf16.msra.mxu0 %v12349_v47 }
 0x61f   :  { %8233 = vmatprep.subr.bf16.mxu0 %v8704_v14 }
 0x622   :  { %8235 = vmatpush1.bf16.msra.mxu0 %v12359_v18 }
 0x623   :  { %8236 = vmatprep.subr.bf16.mxu0 %v8704_v14 }
 0x626   :  { %8238 = vmatpush1.bf16.msra.mxu0 %v12369_v5 }
 0x627   :  { %8239 = vmatprep.subr.bf16.mxu0 %v8704_v14 }
 0x62a   :  { %8241 = vmatpush1.bf16.msra.mxu0 %v12379_v35 }
 0x62b   :  { %8242 = vmatprep.subr.bf16.mxu0 %v8704_v14 }
 0x62e   :  { %8244 = vmatpush1.bf16.msra.mxu0 %v12389_v59 }
 0x62f   :  { %8245 = vmatprep.subr.bf16.mxu0 %v8704_v14 }
 0x632   :  { %8247 = vmatpush1.bf16.msra.mxu0 %v12399_v10 }
 0x633   :  { %8278 = vmatprep.subr.bf16.mxu0 %v8704_v14 }
 0x642   :  { %v3971_v25 = vpop.f32.mrb[10].mxu1 }
 0x643   :  { %v12409_v26 = vadd.f32 %v3983_v23, %v3971_v25  ;;  %v3973_v29 = vpop.f32.mrb[11].mxu1 }
 0x644   :  { %v3991_v7 = vadd.f32 %v3987_v37, %v3973_v29 }
 0x645   :  { %v3992_v51 = vmax.f32 %v12409_v26, 0.0 }
 0x646   :  { %v3993_v13 = vmax.f32 %v3991_v7, 0.0 }
 0x648   :  { %3995 = vst.msk [vmem:[#allocation3 + $0x30] sm:$0xff] %vm840_vm4, %v3993_v13 }
 0x662   :  { %v4220_v54 = vpop.permute.xlu0 %4219  ;;  %v4354_v55 = vpop.permute.xlu1 %4353 }
 0x663   :  { %v4221_v34 = vsel %vm601_vm2, %v12190_v58, %v4220_v54  ;;  %6539 = vmatprep.mubr.msk.f32.mxu0 %vm840_vm4, %v4220_v54  ;;  %6561 = vmatprep.mubr.msk.f32.mxu1 %vm840_vm4, %v4354_v55 }
 0x664   :  { %4290 = vmatmul.mubr.f32.vlgmr.msra.gmra.mrb[16].mxu0 %v4221_v34 }
 0x665   :  { %8280 = vmatpush1.bf16.msra.mxu0 %v12188_v31 }
 0x666   :  { %v4352_v40 = vpop.permute.xlu0 %4351  ;;  %v4433_v45 = vpop.permute.xlu1 %4432  ;;  %8281 = vmatprep.subr.bf16.mxu0 %v8704_v14 }
 0x667   :  { %v4355_v39 = vsel %vm601_vm2, %v4352_v40, %v4354_v55  ;;  %6562 = vmatprep.mubr.msk.f32.mxu0 %vm840_vm4, %v4433_v45 }
 0x668   :  { %4424 = vmatmul.mubr.f32.vlgmr.msra.gmra.mrb[12].mxu1 %v4355_v39 }
 0x669   :  { %8283 = vmatpush1.bf16.msra.mxu0 %v12203_v41  ;;  %8310 = vmatpush1.bf16.msra.mxu1 %v12309_v50 }
 0x66a   :  { %v4535_v58 = vpop.permute.xlu1 %4534  ;;  %8284 = vmatprep.subr.bf16.mxu0 %v8704_v14  ;;  %8311 = vmatprep.subr.bf16.mxu1 %v8704_v14  ;;  %v4431_v33 = vpop.permute.xlu0 %4430 }
 0x66b   :  { %6583 = vmatprep.mubr.msk.f32.mxu1 %vm840_vm4, %v4535_v58  ;;  %v4434_v62 = vsel %vm362_vm0, %v4431_v33, %v4433_v45  ;;  %v4955_v33 = vld [vmem:[#allocation6 + $0x68] sm:$0xff] }
 0x66d   :  { %8286 = vmatpush1.bf16.msra.mxu0 %v12215_v19  ;;  %8313 = vmatpush1.bf16.msra.mxu1 %v12319_v63 }
 0x66e   :  { %8287 = vmatprep.subr.bf16.mxu0 %v8704_v14  ;;  %8314 = vmatprep.subr.bf16.mxu1 %v8704_v14  ;;  %v8570_v21 = vpop.permute.xlu0 %8569 }
 0x66f   :  { %v8571_v52 = vunpack.i.l.bf16 %v8570_v21 }
 0x671   :  { %8289 = vmatpush1.bf16.msra.mxu0 %v12225_v48  ;;  %8316 = vmatpush1.bf16.msra.mxu1 %v12329_v1  ;;  %v4536_v16 = vsel %vm840_vm4, %v8571_v52, %v4535_v58  ;;  %v4954_v58 = vld [vmem:[#allocation6 + $0x60] sm:$0xff]  ;;  %v4957_v52 = vld [vmem:[#allocation6 + $0x78] sm:$0xff] }
 0x672   :  { %8290 = vmatprep.subr.bf16.mxu0 %v8704_v14  ;;  %8317 = vmatprep.subr.bf16.mxu1 %v8704_v14  ;;  %v4674_v60 = vpop.permute.xlu0 %4673 }
 0x675   :  { %8292 = vmatpush1.bf16.msra.mxu0 %v12237_v8  ;;  %8319 = vmatpush1.bf16.msra.mxu1 %v12339_v32 }
 0x676   :  { %8293 = vmatprep.subr.bf16.mxu0 %v8704_v14  ;;  %8320 = vmatprep.subr.bf16.mxu1 %v8704_v14  ;;  %v4753_v22 = vpop.permute.xlu0 %4752 }
 0x679   :  { %8295 = vmatpush1.bf16.msra.mxu0 %v12251_v44  ;;  %8322 = vmatpush1.bf16.msra.mxu1 %v12349_v47 }
 0x67a   :  { %8296 = vmatprep.subr.bf16.mxu0 %v8704_v14  ;;  %8323 = vmatprep.subr.bf16.mxu1 %v8704_v14 }
 0x67d   :  { %8298 = vmatpush1.bf16.msra.mxu0 %v12264_v46  ;;  %8325 = vmatpush1.bf16.msra.mxu1 %v12359_v18 }
 0x67e   :  { %8299 = vmatprep.subr.bf16.mxu0 %v8704_v14  ;;  %8326 = vmatprep.subr.bf16.mxu1 %v8704_v14 }
 0x681   :  { %8301 = vmatpush1.bf16.msra.mxu0 %v12277_v3  ;;  %8328 = vmatpush1.bf16.msra.mxu1 %v12369_v5 }
 0x682   :  { %8302 = vmatprep.subr.bf16.mxu0 %v8704_v14  ;;  %8329 = vmatprep.subr.bf16.mxu1 %v8704_v14 }
 0x685   :  { %8304 = vmatpush1.bf16.msra.mxu0 %v12288_v53  ;;  %8331 = vmatpush1.bf16.msra.mxu1 %v12379_v35 }
 0x686   :  { %8305 = vmatprep.subr.bf16.mxu0 %v8704_v14  ;;  %8332 = vmatprep.subr.bf16.mxu1 %v8704_v14 }
 0x689   :  { %8307 = vmatpush1.bf16.msra.mxu0 %v12299_v27  ;;  %8334 = vmatpush1.bf16.msra.mxu1 %v12389_v59 }
 0x68a   :  { %8335 = vmatprep.subr.bf16.mxu1 %v8704_v14  ;;  %8338 = vmatprep.subr.bf16.mxu0 %v8704_v14 }
 0x68c   :  { %4503 = vmatmul.mubr.f32.vlgmr.msra.gmra.mrb[18].mxu0 %v4434_v62  ;;  %v8429_v62 = vpack.c.bf16 %v4955_v33, %v4954_v58 }
 0x68d   :  { %8337 = vmatpush1.bf16.msra.mxu1 %v12399_v10  ;;  %8340 = vmatpush1.bf16.msra.mxu0 %v12044_v6  ;;  %v8572_v6 = vunpack.i.h.bf16 %v8570_v21  ;;  %v4956_v21 = vld [vmem:[#allocation6 + $0x70] sm:$0xff] }
 0x68e   :  { %6605 = vmatprep.mubr.msk.f32.mxu0 %vm840_vm4, %v4674_v60  ;;  %8341 = vmatprep.subr.bf16.mxu0 %v8704_v14 }
 0x68f   :  { %8368 = vmatprep.subr.bf16.mxu1 %v8704_v14 }
 0x690   :  { %4605 = vmatmul.mubr.f32.vlgmr.msra.gmra.mrb[14].mxu1 %v4536_v16  ;;  %v4958_v16 = vld [vmem:[#allocation6 + $0x80] sm:$0xff] }
 0x691   :  { %8343 = vmatpush1.bf16.msra.mxu0 %v12053_v49  ;;  %8370 = vmatpush1.bf16.msra.mxu1 %v12188_v31  ;;  %v4675_v49 = vsel %vm840_vm4, %v8572_v6, %v4674_v60  ;;  %v4940_v31 = vld [vmem:[#allocation6] sm:$0xff]  ;;  %v8432_v60 = vpack.c.bf16 %v4957_v52, %v4956_v21 }
 0x692   :  { %6606 = vmatprep.mubr.msk.f32.mxu1 %vm840_vm4, %v4753_v22  ;;  %8344 = vmatprep.subr.bf16.mxu0 %v8704_v14 }
 0x693   :  { %8371 = vmatprep.subr.bf16.mxu1 %v8704_v14 }
 0x695   :  { %8346 = vmatpush1.bf16.msra.mxu0 %v12065_v11  ;;  %8373 = vmatpush1.bf16.msra.mxu1 %v12203_v41  ;;  %v4829_v11 = vld [vmem:[#allocation3 + $0x30] sm:$0xff]  ;;  %v4941_v41 = vld [vmem:[#allocation6 + $0x8] sm:$0xff] }
 0x696   :  { %8347 = vmatprep.subr.bf16.mxu0 %v8704_v14  ;;  %8374 = vmatprep.subr.bf16.mxu1 %v8704_v14 }
 0x699   :  { %8349 = vmatpush1.bf16.msra.mxu0 %v12077_v2  ;;  %8376 = vmatpush1.bf16.msra.mxu1 %v12215_v19  ;;  %v4751_v2 = vpop.permute.xlu1 %4750  ;;  %v4942_v19 = vld [vmem:[#allocation6 + $0x10] sm:$0xff] }
 0x69a   :  { %8350 = vmatprep.subr.bf16.mxu0 %v8704_v14  ;;  %8377 = vmatprep.subr.bf16.mxu1 %v8704_v14 }
 0x69d   :  { %8352 = vmatpush1.bf16.msra.mxu0 %v12088_v24  ;;  %8379 = vmatpush1.bf16.msra.mxu1 %v12225_v48  ;;  %v4754_v24 = vsel %vm601_vm2, %v4751_v2, %v4753_v22  ;;  %v4959_v22 = vld [vmem:[#allocation6 + $0x88] sm:$0xff]  ;;  %v4961_v2 = vld [vmem:[#allocation6 + $0x98] sm:$0xff] }
 0x69e   :  { %8353 = vmatprep.subr.bf16.mxu0 %v8704_v14  ;;  %8380 = vmatprep.subr.bf16.mxu1 %v8704_v14 }
 0x6a1   :  { %8355 = vmatpush1.bf16.msra.mxu0 %v12098_v20  ;;  %8382 = vmatpush1.bf16.msra.mxu1 %v12237_v8  ;;  %v6540_v8 = vld [vmem:[%s12639_s7] ss:$0 sm:$0xff] }
 0x6a2   :  { %8356 = vmatprep.subr.bf16.mxu0 %v8704_v14  ;;  %8383 = vmatprep.subr.bf16.mxu1 %v8704_v14 }
 0x6a5   :  { %8358 = vmatpush1.bf16.msra.mxu0 %v12108_v61  ;;  %8385 = vmatpush1.bf16.msra.mxu1 %v12251_v44  ;;  %v8447_v44 = vpack.c.bf16 %v4941_v41, %v4940_v31  ;;  %v4965_v31 = vld [vmem:[#allocation6 + $0xb8] sm:$0xff] }
 0x6a6   :  { %8359 = vmatprep.subr.bf16.mxu0 %v8704_v14  ;;  %8386 = vmatprep.subr.bf16.mxu1 %v8704_v14 }
 0x6a9   :  { %8361 = vmatpush1.bf16.msra.mxu0 %v12118_v36  ;;  %8388 = vmatpush1.bf16.msra.mxu1 %v12264_v46  ;;  %v4943_v46 = vld [vmem:[#allocation6 + $0x18] sm:$0xff] }
 0x6aa   :  { %8362 = vmatprep.subr.bf16.mxu0 %v8704_v14  ;;  %8389 = vmatprep.subr.bf16.mxu1 %v8704_v14 }
 0x6ad   :  { %8364 = vmatpush1.bf16.msra.mxu0 %v12128_v17  ;;  %8391 = vmatpush1.bf16.msra.mxu1 %v12277_v3 }
 0x6ae   :  { %8365 = vmatprep.subr.bf16.mxu0 %v8704_v14  ;;  %8392 = vmatprep.subr.bf16.mxu1 %v8704_v14 }
 0x6b1   :  { %8367 = vmatpush1.bf16.msra.mxu0 %v12138_v30  ;;  %8394 = vmatpush1.bf16.msra.mxu1 %v12288_v53 }
 0x6b2   :  { %8395 = vmatprep.subr.bf16.mxu1 %v8704_v14  ;;  %8398 = vmatprep.subr.bf16.mxu0 %v8704_v14 }
 0x6b4   :  { %4744 = vmatmul.mubr.f32.vlgmr.msra.gmra.mrb[20].mxu0 %v4675_v49  ;;  %v8435_v49 = vpack.c.bf16 %v4959_v22, %v4958_v16 }
 0x6b5   :  { %8397 = vmatpush1.bf16.msra.mxu1 %v12299_v27  ;;  %8400 = vmatpush1.bf16.msra.mxu0 %v12309_v50  ;;  %v8450_v27 = vpack.c.bf16 %v4943_v46, %v4942_v19  ;;  %v5121_v46 = vld [vmem:[#allocation6 + $0xc8] sm:$0xff] }
 0x6b6   :  { %6627 = vmatprep.mubr.msk.f32.mxu0 %vm840_vm4, %v4829_v11  ;;  %8401 = vmatprep.subr.bf16.mxu0 %v8704_v14  ;;  %v4960_v11 = vld [vmem:[#allocation6 + $0x90] sm:$0xff] }
 0x6b7   :  { %8428 = vmatprep.subr.bf16.mxu1 %v8704_v14 }
 0x6b8   :  { %4823 = vmatmul.mubr.f32.vlgmr.msra.gmra.mrb[16].mxu1 %v4754_v24  ;;  %v4116_v20 = vpop.f32.mrb[12].mxu0  ;;  %v8438_v24 = vpack.c.bf16 %v4961_v2, %v4960_v11 }
 0x6b9   :  { %8403 = vmatpush1.bf16.msra.mxu0 %v12319_v63  ;;  %v4118_v61 = vpop.f32.mrb[13].mxu0  ;;  %v4944_v63 = vld [vmem:[#allocation6 + $0x20] sm:$0xff]  ;;  %6742 = vmatprep.mubr.msk.f32.mxu1 %vm8705_vm6, %v12708_v4 }
 0x6ba   :  { %8404 = vmatprep.subr.bf16.mxu0 %v8704_v14  ;;  %8430 = vmatpush3.bf16.msra.mxu1 %v8429_v62  ;;  %v4963_v61 = vld [vmem:[#allocation6 + $0xa8] sm:$0xff]  ;;  %v6633_v62 = vld [vmem:[%s12642_s10] ss:$0 sm:$0xff] }
 0x6bb   :  { %8431 = vmatprep.subr.bf16.mxu1 %v8704_v14 }
 0x6bd   :  { %8406 = vmatpush1.bf16.msra.mxu0 %v12329_v1  ;;  %v4945_v1 = vld [vmem:[#allocation6 + $0x28] sm:$0xff] }
 0x6be   :  { %8407 = vmatprep.subr.bf16.mxu0 %v8704_v14  ;;  %v8453_v15 = vpack.c.bf16 %v4945_v1, %v4944_v63  ;;  %8433 = vmatpush3.bf16.msra.mxu1 %v8432_v60  ;;  %v5123_v63 = vld [vmem:[#allocation6 + $0xd8] sm:$0xff] }
 0x6bf   :  { %8434 = vmatprep.subr.bf16.mxu1 %v8704_v14 }
 0x6c1   :  { %8409 = vmatpush1.bf16.msra.mxu0 %v12339_v32 }
 0x6c2   :  { %8410 = vmatprep.subr.bf16.mxu0 %v8704_v14  ;;  %8436 = vmatpush3.bf16.msra.mxu1 %v8435_v49 }
 0x6c3   :  { %8437 = vmatprep.subr.bf16.mxu1 %v8704_v14 }
 0x6c5   :  { %8412 = vmatpush1.bf16.msra.mxu0 %v12349_v47 }
 0x6c6   :  { %8413 = vmatprep.subr.bf16.mxu0 %v8704_v14  ;;  %8439 = vmatpush3.bf16.msra.mxu1 %v8438_v24 }
 0x6c7   :  { %8440 = vmatprep.subr.bf16.mxu1 %v8704_v14 }
 0x6c9   :  { %8415 = vmatpush1.bf16.msra.mxu0 %v12359_v18  ;;  %v4946_v18 = vld [vmem:[#allocation6 + $0x30] sm:$0xff] }
 0x6ca   :  { %8416 = vmatprep.subr.bf16.mxu0 %v8704_v14  ;;  %v8456_v42 = vpack.c.bf16 %v4947_v38, %v4946_v18  ;;  %v5126_v18 = vld [vmem:[#allocation6 + $0xf0] sm:$0xff]  ;;  %v5127_v38 = vld [vmem:[#allocation6 + $0xf8] sm:$0xff] }
 0x6cd   :  { %8418 = vmatpush1.bf16.msra.mxu0 %v12369_v5  ;;  %v4948_v5 = vld [vmem:[#allocation6 + $0x40] sm:$0xff] }
 0x6ce   :  { %8419 = vmatprep.subr.bf16.mxu0 %v8704_v14  ;;  %v8459_v28 = vpack.c.bf16 %v4949_v57, %v4948_v5  ;;  %v5128_v5 = vld [vmem:[#allocation6 + $0x100] sm:$0xff]  ;;  %v5129_v57 = vld [vmem:[#allocation6 + $0x108] sm:$0xff] }
 0x6d1   :  { %8421 = vmatpush1.bf16.msra.mxu0 %v12379_v35  ;;  %v4950_v35 = vld [vmem:[#allocation6 + $0x50] sm:$0xff] }
 0x6d2   :  { %8422 = vmatprep.subr.bf16.mxu0 %v8704_v14  ;;  %v8462_v0 = vpack.c.bf16 %v4951_v9, %v4950_v35  ;;  %v5130_v35 = vld [vmem:[#allocation6 + $0x110] sm:$0xff]  ;;  %v5131_v9 = vld [vmem:[#allocation6 + $0x118] sm:$0xff] }
 0x6d5   :  { %8424 = vmatpush1.bf16.msra.mxu0 %v12389_v59 }
 0x6d6   :  { %8425 = vmatprep.subr.bf16.mxu0 %v8704_v14 }
 0x6d9   :  { %8427 = vmatpush1.bf16.msra.mxu0 %v12399_v10 }
 0x6da   :  { %8446 = vmatprep.subr.bf16.mxu0 %v8704_v14 }
 0x6dc   :  { %4918 = vmatmul.mubr.f32.vlgmr.msra.gmra.mrb[22].mxu0 %v3992_v51 }
 0x6dd   :  { %8448 = vmatpush3.bf16.msra.mxu0 %v8447_v44  ;;  %6769 = vmatprep.mubr.msk.f32.mxu0 %vm8705_vm6, %v12708_v4  ;;  %v5120_v44 = vld [vmem:[#allocation6 + $0xc0] sm:$0xff] }
 0x6de   :  { %8449 = vmatprep.subr.bf16.mxu0 %v8704_v14 }
 0x6e0   :  { %v4188_v36 = vpop.f32.mrb[14].mxu0 }
 0x6e1   :  { %v4189_v17 = vadd.f32 %v4188_v36, %v4116_v20  ;;  %v4190_v30 = vpop.f32.mrb[15].mxu0  ;;  %8451 = vmatpush3.bf16.msra.mxu0 %v8450_v27  ;;  %v4962_v20 = vld [vmem:[#allocation6 + $0xa0] sm:$0xff] }
 0x6e2   :  { %8452 = vmatprep.subr.bf16.mxu0 %v8704_v14  ;;  %v4964_v30 = vld [vmem:[#allocation6 + $0xb0] sm:$0xff] }
 0x6e3   :  { %v8444_v41 = vpack.c.bf16 %v4965_v31, %v4964_v30  ;;  %v5343_v30 = vld [vmem:[#allocation10 + $0x18] sm:$0xff] }
 0x6e5   :  { %8454 = vmatpush3.bf16.msra.mxu0 %v8453_v15 }
 0x6e6   :  { %8455 = vmatprep.subr.bf16.mxu0 %v8704_v14 }
 0x6e9   :  { %8457 = vmatpush3.bf16.msra.mxu0 %v8456_v42  ;;  %v8474_v42 = vpack.c.bf16 %v5127_v38, %v5126_v18  ;;  %v6635_v18 = vld [vmem:[%s12643_s11] ss:$0 sm:$0xff] }
 0x6ea   :  { %8458 = vmatprep.subr.bf16.mxu0 %v8704_v14 }
 0x6ed   :  { %8460 = vmatpush3.bf16.msra.mxu0 %v8459_v28  ;;  %v8477_v28 = vpack.c.bf16 %v5129_v57, %v5128_v5 }
 0x6ee   :  { %8461 = vmatprep.subr.bf16.mxu0 %v8704_v14 }
 0x6f1   :  { %8463 = vmatpush3.bf16.msra.mxu0 %v8462_v0 }
 0x6f2   :  { %8482 = vmatprep.subr.bf16.mxu0 %v8704_v14 }
 0x737   :  { %v4291_v48 = vpop.f32.mrb[16].mxu0 }
 0x738   :  { %v4295_v3 = vadd.f32 %v4291_v48, %v4189_v17  ;;  %v4293_v53 = vpop.f32.mrb[17].mxu0  ;;  %v8441_v17 = vpack.c.bf16 %v4963_v61, %v4962_v20  ;;  %v5340_v20 = vld [vmem:[#allocation10] sm:$0xff]  ;;  %v5341_v61 = vld [vmem:[#allocation10 + $0x8] sm:$0xff] }
 0x73a   :  { %v4303_v50 = vadd.f32 %v6540_v8, %v4295_v3  ;;  %8442 = vmatpush3.bf16.msra.mxu1 %v8441_v17  ;;  %v8465_v3 = vpack.c.bf16 %v5121_v46, %v5120_v44  ;;  %v5342_v17 = vld [vmem:[#allocation10 + $0x10] sm:$0xff] }
 0x73b   :  { %v4425_v32 = vpop.f32.mrb[12].mxu1  ;;  %8443 = vmatprep.subr.bf16.mxu1 %v8704_v14  ;;  %v8492_v31 = vpack.c.bf16 %v5343_v30, %v5342_v17  ;;  %v5346_v46 = vld [vmem:[#allocation10 + $0x30] sm:$0x3] }
 0x73c   :  { %v4304_v47 = vmax.f32 %v4303_v50, 0.0  ;;  %v4427_v12 = vpop.f32.mrb[13].mxu1  ;;  %v5122_v50 = vld [vmem:[#allocation6 + $0xd0] sm:$0xff] }
 0x73d   :  { %v5125_v12 = vld [vmem:[#allocation6 + $0xe8] sm:$0xff] }
 0x73e   :  { %4305 = vst.msk [vmem:[#allocation4] sm:$0xff] %vm362_vm0, %v4304_v47  ;;  %8445 = vmatpush3.bf16.msra.mxu1 %v8444_v41  ;;  %v5124_v47 = vld [vmem:[#allocation6 + $0xe0] sm:$0xff] }
 0x73f   :  { %8464 = vmatprep.subr.bf16.mxu1 %v8704_v14  ;;  %v8471_v15 = vpack.c.bf16 %v5125_v12, %v5124_v47  ;;  %v5344_v41 = vld [vmem:[#allocation10 + $0x20] sm:$0xff] }
 0x75f   :  { %v4504_v59 = vpop.f32.mrb[18].mxu0 }
 0x760   :  { %v4505_v43 = vadd.f32 %v4504_v59, %v4425_v32  ;;  %v4506_v10 = vpop.f32.mrb[19].mxu0  ;;  %v8468_v32 = vpack.c.bf16 %v5123_v63, %v5122_v50  ;;  %v8480_v59 = vpack.c.bf16 %v5131_v9, %v5130_v35  ;;  %v5515_v63 = vld [vmem:[#allocation11 + $0x18] sm:$0xff] }
 0x763   :  { %v4606_v56 = vpop.f32.mrb[14].mxu1 }
 0x764   :  { %v4610_v23 = vadd.f32 %v4606_v56, %v4505_v43  ;;  %v4608_v37 = vpop.f32.mrb[15].mxu1 }
 0x765   :  { %v5223_v37 = vld [vmem:[#allocation8] sm:$0xff] }
 0x766   :  { %v4618_v25 = vadd.f32 %v6540_v8, %v4610_v23 }
 0x768   :  { %v4619_v26 = vmax.f32 %v4618_v25, 0.0  ;;  %v5224_v25 = vld [vmem:[#allocation8 + $0x8] sm:$0xff] }
 0x76a   :  { %4621 = vrot.lane.b32.xlu1 %v4619_v26, %s8701_s4  ;;  %v8483_v26 = vpack.c.bf16 %v5224_v25, %v5223_v37  ;;  %v5601_v37 = vld [vmem:[#allocation13] sm:$0xff]  ;;  %v5602_v25 = vld [vmem:[#allocation13 + $0x8] sm:$0xff] }
 0x787   :  { %v4745_v29 = vpop.f32.mrb[20].mxu0 }
 0x788   :  { %v4747_v7 = vpop.f32.mrb[21].mxu0 }
 0x789   :  { %v5226_v7 = vld [vmem:[#allocation8 + $0x18] sm:$0xff] }
 0x78b   :  { %v4824_v51 = vpop.f32.mrb[16].mxu1 }
 0x78c   :  { %v4825_v13 = vadd.f32 %v4824_v51, %v4745_v29  ;;  %v4826_v54 = vpop.f32.mrb[17].mxu1  ;;  %v5225_v29 = vld [vmem:[#allocation8 + $0x10] sm:$0xff] }
 0x78d   :  { %v8486_v51 = vpack.c.bf16 %v5226_v7, %v5225_v29  ;;  %v8510_v29 = vpack.c.bf16 %v5602_v25, %v5601_v37  ;;  %v5604_v7 = vld [vmem:[#allocation13 + $0x18] sm:$0xff] }
 0x7af   :  { %v4919_v55 = vpop.f32.mrb[22].mxu0 }
 0x7b0   :  { %v4923_v34 = vadd.f32 %v4919_v55, %v4825_v13  ;;  %v4921_v40 = vpop.f32.mrb[23].mxu0 }
 0x7b1   :  { %v6632_v40 = vld [vmem:[%s12640_s8] ss:$0 sm:$0xff] }
 0x7b2   :  { %v4931_v45 = vadd.f32 %v6540_v8, %v4923_v34 }
 0x7b4   :  { %v4932_v39 = vmax.f32 %v4931_v45, 0.0 }
 0x7b6   :  { %4934 = vrot.lane.b32.xlu0 %v4932_v39, %s8702_s22 }
 0x7dc   :  { %v4622_v6 = vpop.permute.xlu1 %4621 }
 0x7dd   :  { %4624 = vst.msk [vmem:[#allocation4] sm:$0xff] %vm598_vm1, %v4622_v6 }
 0x7de   :  { %4625 = vst.msk [vmem:[#allocation4 + $0x8] sm:$0xff] %vm601_vm2, %v4622_v6 }
 0x7e4   :  { %v4939_v36 = vld [vmem:[#allocation4] sm:$0xff] }
 0x7e5   :  { %4968 = vrot.lane.b32.xlu1 %v4939_v36, %s8703_s19  ;;  %6770 = vmatmul.mubr.msk.f32.vlgmr.msra.gmra.mrb[24].mxu0 %vm362_vm0, %v4939_v36  ;;  %v8489_v36 = vpack.c.bf16 %v5341_v61, %v5340_v20 }
 0x7e6   :  { %6807 = vmatprep.mubr.msk.f32.mxu0 %vm8705_vm6, %v12708_v4  ;;  %8484 = vmatpush3.bf16.msra.mxu0 %v8483_v26  ;;  %v5603_v26 = vld [vmem:[#allocation13 + $0x10] sm:$0xff] }
 0x7e7   :  { %8485 = vmatprep.subr.bf16.mxu0 %v8704_v14 }
 0x7ea   :  { %8487 = vmatpush3.bf16.msra.mxu0 %v8486_v51  ;;  %v8513_v51 = vpack.c.bf16 %v5604_v7, %v5603_v26 }
 0x7eb   :  { %6810 = vmatprep.subr.mxu0 %v12708_v4 }
 0x828   :  { %v4935_v19 = vpop.permute.xlu0 %4934 }
 0x829   :  { %4937 = vst.msk [vmem:[#allocation4 + $0x8] sm:$0xff] %vm837_vm3, %v4935_v19 }
 0x82a   :  { %4938 = vst.msk [vmem:[#allocation4 + $0x10] sm:$0xff] %vm840_vm4, %v4935_v19  ;;  %v5345_v19 = vld [vmem:[#allocation10 + $0x28] sm:$0xff] }
 0x82b   :  { %v8495_v44 = vpack.c.bf16 %v5345_v19, %v5344_v41 }
 0x830   :  { %v4952_v48 = vld [vmem:[#allocation4 + $0x8] sm:$0xff] }
 0x831   :  { %4970 = vrot.lane.b32.xlu0 %v4952_v48, %s8703_s19  ;;  %5134 = vrot.lane.b32.xlu1 %v4952_v48, %s8702_s22  ;;  %v5118_v8 = vld [vmem:[#allocation4 + $0x10] sm:$0xff]  ;;  %v5347_v48 = vld [vmem:[%s12647_s15] sm:$0x3f] }
 0x835   :  { %5136 = vrot.lane.b32.xlu0 %v5118_v8, %s8702_s22  ;;  %v5339_v8 = vld [vmem:[%s12645_s13] sm:$0xff] }
 0x857   :  { %v4969_v53 = vpop.permute.xlu1 %4968 }
 0x8a3   :  { %v4971_v27 = vpop.permute.xlu0 %4970  ;;  %v5135_v56 = vpop.permute.xlu1 %5134 }
 0x8a4   :  { %v4972_v1 = vsel %vm840_vm4, %v4969_v53, %v4971_v27  ;;  %v5513_v53 = vld [vmem:[#allocation11 + $0x8] sm:$0xff]  ;;  %v5514_v27 = vld [vmem:[#allocation11 + $0x10] sm:$0xff] }
 0x8a5   :  { %6743 = vmatmul.mubr.msk.f32.vlgmr.msra.gmra.mrb[18].mxu1 %vm362_vm0, %v4972_v1  ;;  %v8501_v1 = vpack.c.bf16 %v5515_v63, %v5514_v27 }
 0x8a6   :  { %8466 = vmatpush3.bf16.msra.mxu1 %v8465_v3  ;;  %6796 = vmatprep.mubr.msk.f32.mxu1 %vm8705_vm6, %v12708_v4  ;;  %v5512_v3 = vld [vmem:[#allocation11] sm:$0xff] }
 0x8a7   :  { %8467 = vmatprep.subr.bf16.mxu1 %v8704_v14  ;;  %v5137_v43 = vpop.permute.xlu0 %5136  ;;  %v8498_v50 = vpack.c.bf16 %v5513_v53, %v5512_v3 }
 0x8a8   :  { %v5138_v23 = vsel %vm601_vm2, %v5135_v56, %v5137_v43  ;;  %v5519_v56 = vld [vmem:[#allocation11 + $0x38] sm:$0xff] }
 0x8aa   :  { %8469 = vmatpush3.bf16.msra.mxu1 %v8468_v32 }
 0x8ab   :  { %8470 = vmatprep.subr.bf16.mxu1 %v8704_v14 }
 0x8ae   :  { %8472 = vmatpush3.bf16.msra.mxu1 %v8471_v15 }
 0x8af   :  { %8473 = vmatprep.subr.bf16.mxu1 %v8704_v14 }
 0x8b2   :  { %8475 = vmatpush3.bf16.msra.mxu1 %v8474_v42  ;;  %v6636_v42 = vld [vmem:[%s12644_s12] ss:$0 sm:$0xff] }
 0x8b3   :  { %8476 = vmatprep.subr.bf16.mxu1 %v8704_v14 }
 0x8b6   :  { %8478 = vmatpush3.bf16.msra.mxu1 %v8477_v28 }
 0x8b7   :  { %8479 = vmatprep.subr.bf16.mxu1 %v8704_v14 }
 0x8b8   :  { %v5113_v0 = vpop.f32.mrb[24].mxu0 }
 0x8b9   :  { %v6771_v10 = vpop.f32.mrb[25].mxu0 }
 0x8ba   :  { %8481 = vmatpush3.bf16.msra.mxu1 %v8480_v59  ;;  %v5516_v59 = vld [vmem:[#allocation11 + $0x20] sm:$0xff]  ;;  %v5518_v10 = vld [vmem:[#allocation11 + $0x30] sm:$0xff] }
 0x8bb   :  { %8488 = vmatprep.subr.bf16.mxu1 %v8704_v14 }
 0x8bd   :  { %6797 = vmatmul.mubr.msk.f32.vlgmr.msra.gmra.mrb[20].mxu1 %vm362_vm0, %v5138_v23  ;;  %v8507_v23 = vpack.c.bf16 %v5519_v56, %v5518_v10 }
 0x8be   :  { %6829 = vmatprep.mubr.msk.f32.mxu1 %vm8705_vm6, %v12708_v4  ;;  %8490 = vmatpush3.bf16.msra.mxu1 %v8489_v36 }
 0x8bf   :  { %8491 = vmatprep.subr.bf16.mxu1 %v8704_v14 }
 0x8c2   :  { %8493 = vmatpush3.bf16.msra.mxu1 %v8492_v31 }
 0x8c3   :  { %8494 = vmatprep.subr.bf16.mxu1 %v8704_v14 }
 0x8c6   :  { %8496 = vmatpush3.bf16.msra.mxu1 %v8495_v44 }
 0x8c7   :  { %6827 = vmatprep.subr.mxu1 %v12708_v4 }
 0x8ca   :  { %6828 = vmatpush3.msk.msra.mxu1 %vm5429_vm10, %v5346_v46 }
 0x8cb   :  { %8509 = vmatprep.subr.bf16.mxu1 %v8704_v14 }
 0x978   :  { %v5041_v13 = vpop.f32.mrb[18].mxu1 }
 0x979   :  { %v5114_v54 = vadd.f32 %v5113_v0, %v5041_v13  ;;  %v6744_v55 = vpop.f32.mrb[19].mxu1  ;;  %v5517_v0 = vld [vmem:[#allocation11 + $0x28] sm:$0xff] }
 0x97a   :  { %v8504_v43 = vpack.c.bf16 %v5517_v0, %v5516_v59  ;;  %v5606_v13 = vld [vmem:[#allocation13 + $0x28] sm:$0xff] }
 0x990   :  { %v5207_v34 = vpop.f32.mrb[20].mxu1 }
 0x991   :  { %v5211_v45 = vadd.f32 %v5207_v34, %v5114_v54  ;;  %v6798_v39 = vpop.f32.mrb[21].mxu1  ;;  %v6641_v34 = vld [vmem:[%s12648_s16] ss:$0 sm:$0xff] }
 0x993   :  { %v5219_v58 = vadd.f32 %v6632_v40, %v5211_v45 }
 0x995   :  { %v5220_v33 = vmax.f32 %v5219_v58, 0.0 }
 0x997   :  { %5221 = vst.msk [vmem:[#allocation5] sm:$0xff] %vm840_vm4, %v5220_v33  ;;  %v5607_v33 = vld [vmem:[#allocation13 + $0x30] sm:$0xff] }
 0x99e   :  { %v5222_v21 = vld [vmem:[#allocation5] sm:$0xff] }
 0x99f   :  { %6808 = vmatmul.mubr.msk.f32.vlgmr.msra.gmra.mrb[26].mxu0 %vm840_vm4, %v5222_v21  ;;  %v5608_v21 = vld [vmem:[#allocation13 + $0x38] sm:$0xff] }
 0x9a0   :  { %6812 = vmatprep.mubr.msk.f32.mxu0 %vm8705_vm6, %v12708_v4  ;;  %6811 = vmatpush3.msk.msra.mxu0 %vm5352_vm8, %v5347_v48 }
 0x9a1   :  { %8497 = vmatprep.subr.bf16.mxu0 %v8704_v14 }
 0x9a3   :  { %6813 = vmatmul.mubr.msk.f32.vlgmr.msra.gmra.mrb[28].mxu0 %vm5348_vm9, %v5339_v8 }
 0x9a4   :  { %6848 = vmatprep.mubr.msk.f32.mxu0 %vm8705_vm6, %v12708_v4  ;;  %8499 = vmatpush3.bf16.msra.mxu0 %v8498_v50 }
 0x9a5   :  { %8500 = vmatprep.subr.bf16.mxu0 %v8704_v14 }
 0x9a8   :  { %8502 = vmatpush3.bf16.msra.mxu0 %v8501_v1 }
 0x9a9   :  { %8503 = vmatprep.subr.bf16.mxu0 %v8704_v14 }
 0x9ac   :  { %8505 = vmatpush3.bf16.msra.mxu0 %v8504_v43 }
 0x9ad   :  { %8506 = vmatprep.subr.bf16.mxu0 %v8704_v14 }
 0x9b0   :  { %8508 = vmatpush3.bf16.msra.mxu0 %v8507_v23 }
 0xa72   :  { %v5303_v52 = vpop.f32.mrb[26].mxu0 }
 0xa73   :  { %v5304_v60 = vadd.f32 %v6633_v62, %v5303_v52  ;;  %v6809_v16 = vpop.f32.mrb[27].mxu0  ;;  %v8519_v62 = vpack.c.bf16 %v5608_v21, %v5607_v33  ;;  %v6642_v52 = vld [vmem:[%s12650_s18] ss:$0 sm:$0xff] }
 0xa75   :  { %v5308_v22 = vsel %vm5307_vm7, %v5304_v60, 0.0 }
 0xa76   :  { %5309 = vadd.xlane.f32.xlu1 %v5308_v22  ;;  %v5422_v35 = vpop.f32.mrb[28].mxu0 }
 0xa77   :  { %v6814_v9 = vpop.f32.mrb[29].mxu0 }
 0xb03   :  { %v5310_v6 = vpop.xlane.xlu1 %5309 }
 0xb04   :  { %v5312_v49 = vmul.f32 0.02, %v5310_v6  ;;  %v6644_v6 = vld [vmem:[%s12652_s20] ss:$0 sm:$0xff] }
 0xb06   :  { %v5313_v11 = vsub.f32 %v5304_v60, %v5312_v49 }
 0xb08   :  { %v5314_v2 = vmul.f32 %v5313_v11, %v5313_v11 }
 0xb0a   :  { %v5315_v24 = vsel %vm5307_vm7, %v5314_v2, 0.0 }
 0xb0b   :  { %5316 = vadd.xlane.f32.xlu0 %v5315_v24 }
 0xb98   :  { %v5317_v32 = vpop.xlane.xlu0 %5316 }
 0xb99   :  { %v5318_v47 = vmul.f32 0.02, %v5317_v32 }
 0xb9b   :  { %v5319_v12 = vadd.f32 1e-05, %v5318_v47 }
 0xb9d   :  { %8573 = vrsqrt.f32 %v5319_v12 }
 0xba7   :  { %v8574_v15 = vpop.eup %8573 }
 0xba8   :  { %v5321_v38 = vmul.f32 %v8574_v15, %v5313_v11 }
 0xbaa   :  { %v5329_v5 = vmul.f32 %v6635_v18, %v5321_v38 }
 0xbac   :  { %v5337_v57 = vadd.f32 %v6636_v42, %v5329_v5 }
 0xbae   :  { %8575 = vtanh.f32 %v5337_v57 }
 0xbb8   :  { %v8576_v28 = vpop.eup %8575 }
 0xbb9   :  { %6830 = vmatmul.mubr.msk.f32.vlgmr.msra.gmra.mrb[22].mxu1 %vm5307_vm7, %v8576_v28 }
 0xbba   :  { %6867 = vmatprep.mubr.msk.f32.mxu1 %vm8705_vm6, %v12708_v4  ;;  %8511 = vmatpush3.bf16.msra.mxu1 %v8510_v29  ;;  %v5605_v4 = vld [vmem:[#allocation13 + $0x20] sm:$0xff] }
 0xbbb   :  { %8512 = vmatprep.subr.bf16.mxu1 %v8704_v14  ;;  %v8516_v54 = vpack.c.bf16 %v5606_v13, %v5605_v4 }
 0xbbe   :  { %8514 = vmatpush3.bf16.msra.mxu1 %v8513_v51 }
 0xbbf   :  { %8515 = vmatprep.subr.bf16.mxu1 %v8704_v14 }
 0xbc2   :  { %8517 = vmatpush3.bf16.msra.mxu1 %v8516_v54 }
 0xbc3   :  { %8518 = vmatprep.subr.bf16.mxu1 %v8704_v14 }
 0xbc6   :  { %8520 = vmatpush3.bf16.msra.mxu1 %v8519_v62 }
 0xc8c   :  { %v5499_v55 = vpop.f32.mrb[22].mxu1 }
 0xc8d   :  { %v5500_v40 = vadd.f32 %v5499_v55, %v5422_v35  ;;  %v6831_v45 = vpop.f32.mrb[23].mxu1 }
 0xc8f   :  { %v5510_v39 = vadd.f32 %v6641_v34, %v5500_v40 }
 0xc91   :  { %v5511_v58 = vmax.f32 %v5510_v39, 0.0 }
 0xc93   :  { %6849 = vmatmul.mubr.msk.f32.vlgmr.msra.gmra.mrb[30].mxu0 %vm601_vm2, %v5511_v58 }
 0xd66   :  { %v5596_v14 = vpop.f32.mrb[30].mxu0 }
 0xd67   :  { %v5597_v60 = vadd.f32 %v6642_v52, %v5596_v14  ;;  %v6850_v16 = vpop.f32.mrb[31].mxu0 }
 0xd69   :  { %v5600_v22 = vmax.f32 %v5597_v60, 0.0 }
 0xd6b   :  { %6868 = vmatmul.mubr.msk.f32.vlgmr.msra.gmra.mrb[24].mxu1 %vm601_vm2, %v5600_v22 }
 0xe3e   :  { %v5685_v49 = vpop.f32.mrb[24].mxu1 }
 0xe3f   :  { %v5686_v11 = vadd.f32 %v6644_v6, %v5685_v49  ;;  %v6869_v2 = vpop.f32.mrb[25].mxu1 }
 0xe41   :  { %5690 = vst.msk [vmem:[%s12709_s5] sm:$0xff] %vm5689_vm11, %v5686_v11 }
 0xe42   :  { %5695 = vsyncpa [#allocation7], 1 }
 0xe43   :  { %5696 = vsyncpa [#allocation9], 1 }
 0xe44   :  { %5697 = vsyncpa [#allocation12], 1 }

</bundles_post_ra>
